<compile_context>
chip_gen: v6e
topology: v6e:2x2x1
jax: 0.10.0
libtpu: 0.0.40
codegen_flags: <defaults>
</compile_context>

<pallas_src>
import functools

import jax
import jax.numpy as jnp
import numpy as np
from jax.experimental import pallas as pl
from jax.experimental.pallas import tpu as pltpu


def _interp_weights_np(out_size: int, in_size: int) -> np.ndarray:
    """Dense (out_size, in_size) 1-D linear interpolation matrix with
    PyTorch's align_corners=True convention, built in float64 for parity."""
    w = np.zeros((out_size, in_size), dtype=np.float64)
    if out_size == 1 or in_size == 1:
        w[:, 0] = 1.0
        return w
    src = np.arange(out_size, dtype=np.float64) * (in_size - 1) / (out_size - 1)
    lo = np.clip(np.floor(src).astype(np.int64), 0, in_size - 1)
    hi = np.minimum(lo + 1, in_size - 1)
    frac = src - lo.astype(np.float64)
    rows = np.arange(out_size)
    w[rows, lo] += 1.0 - frac
    w[rows, hi] += frac
    return w


@functools.lru_cache(maxsize=None)
def _packed_row_weights(out_h: int, h_in: int) -> jnp.ndarray:
    """bf16_3x-packed row-interp matrix, shape (out_h, 3*h_in) bf16.
    Column blocks are [Wh_hi | Wh_lo | Wh_hi]."""
    wh = jnp.asarray(_interp_weights_np(out_h, h_in).astype(np.float32))
    hi = wh.astype(jnp.bfloat16)
    lo = (wh - hi.astype(jnp.float32)).astype(jnp.bfloat16)
    return jnp.concatenate([hi, lo, hi], axis=1)


@functools.lru_cache(maxsize=None)
def _col_weights_T(out_w: int, w_in: int) -> jnp.ndarray:
    """(w_in, out_w) f32 column-interp matrix (transposed)."""
    return jnp.asarray(_interp_weights_np(out_w, w_in).T.astype(np.float32))


def _upsample_kernel(a_ref, b_ref, o_ref):
    # a_ref: (out_h, 3*h_in)    bf16  packed row-interp weights (grid-invariant)
    # b_ref: (1, 3*h_in, out_w) bf16  packed column-interpolated image
    # o_ref: (1, out_h, out_w)
    o_ref[0] = jnp.dot(a_ref[...], b_ref[0],
                       preferred_element_type=jnp.float32).astype(o_ref.dtype)


@functools.partial(jax.jit, static_argnums=(3, 4))
def _forward_impl(x_flat, a_big, wwT, out_h, out_w):
    nc, h_in, _ = x_flat.shape
    k3 = 3 * h_in

    # Tiny column interpolation in plain XLA at full f32 accuracy.
    cols = jnp.einsum("bhw,wo->bho", x_flat.astype(jnp.float32), wwT,
                      precision=jax.lax.Precision.HIGHEST)    # (nc, h_in, out_w)
    b_hi = cols.astype(jnp.bfloat16)
    b_lo = (cols - b_hi.astype(jnp.float32)).astype(jnp.bfloat16)
    b_big = jnp.concatenate([b_hi, b_hi, b_lo], axis=1)       # (nc, 3*h_in, out_w)

    cost = pl.CostEstimate(
        flops=2 * nc * out_h * k3 * out_w,
        transcendentals=0,
        bytes_accessed=(out_h * k3 * 2                # packed Wh (bf16), once
                        + nc * k3 * out_w * 2         # packed cols (bf16)
                        + nc * out_h * out_w * 4),    # f32 output
    )

    out = pl.pallas_call(
        _upsample_kernel,
        out_shape=jax.ShapeDtypeStruct((nc, out_h, out_w), jnp.float32),
        grid_spec=pltpu.PrefetchScalarGridSpec(
            num_scalar_prefetch=0,
            grid=(nc,),
            in_specs=[
                # Packed row-interp weights: grid-invariant, DMA'd once.
                pl.BlockSpec((out_h, k3), lambda i: (0, 0)),
                # Packed column-interpolated image for this grid step.
                pl.BlockSpec((1, k3, out_w), lambda i: (i, 0, 0)),
            ],
            out_specs=pl.BlockSpec((1, out_h, out_w), lambda i: (i, 0, 0)),
        ),
        compiler_params=pltpu.CompilerParams(
            # Single independent axis (nc, even) -> clean 4/4 split on v7x's
            # two TensorCores; a plain loop on single-TC v5e/v6e.
            dimension_semantics=("parallel",),
            # ~18 MB/step footprint: raise above v5e's 16 MiB default scoped
            # limit, stay well under v7x's 64 MiB physical VMEM.
            vmem_limit_bytes=40 * 1024 * 1024,
        ),
        cost_estimate=cost,
    )(a_big, b_big)
    return out.astype(x_flat.dtype)


def tomonet222_forward(x: jnp.ndarray,
                       out_h: int = 5000,
                       out_w: int = 199) -> jnp.ndarray:
    """Pallas implementation of TomoNet222.forward: bilinear upsample of an
    NCHW tensor to (out_h, out_w) with align_corners=True.  (The module's
    `p` / `training` arguments are unused by its forward.)"""
    n, c, h_in, w_in = x.shape
    a_big = _packed_row_weights(out_h, h_in)
    wwT = _col_weights_T(out_w, w_in)
    out_flat = _forward_impl(x.reshape(n * c, h_in, w_in), a_big, wwT,
                             out_h, out_w)
    return out_flat.reshape(n, c, out_h, out_w)


if __name__ == "__main__":
    key = jax.random.PRNGKey(0)
    # Small NCHW input consistent with the module's forward (output spatial
    # size is fixed by the module to (5000, 199)).
    x = jax.random.normal(key, (2, 4, 16, 16), dtype=jnp.float32)

    out = jax.block_until_ready(tomonet222_forward(x))

    assert out.shape == (2, 4, 5000, 199), out.shape
    assert out.dtype == jnp.float32, out.dtype

    # align_corners=True preserves the four corner values.
    corners_in = x[:, :, [0, 0, -1, -1], [0, -1, 0, -1]]
    corners_out = out[:, :, [0, 0, -1, -1], [0, -1, 0, -1]]
    assert jnp.allclose(corners_in, corners_out, atol=1e-4), "corner mismatch"

    # Full cross-check against a pure-JAX separable reference computed at
    # HIGHEST matmul precision (so the reference itself is f32-accurate).
    wh_ref = jnp.asarray(_interp_weights_np(5000, 16).astype(np.float32))
    ww_ref = jnp.asarray(_interp_weights_np(199, 16).astype(np.float32))
    ref = jnp.einsum("oh,nchw,pw->ncop", wh_ref, x, ww_ref,
                     precision=jax.lax.Precision.HIGHEST)
    max_err = float(jnp.max(jnp.abs(out - ref)))
    assert max_err < 5e-4, f"mismatch vs separable reference: {max_err}"

    print("KERNEL_OK")
</pallas_src>

<mosaic_0001>
module attributes {stable_mosaic.version = 11 : i64} {
  func.func @_upsample_kernel(%arg0: i32, %arg1: memref<5000x48xbf16, #tpu.memory_space<vmem>>, %arg2: memref<1x48x199xbf16, #tpu.memory_space<vmem>>, %arg3: memref<1x5000x199xf32, #tpu.memory_space<vmem>>) attributes {dimension_semantics = [#tpu.dimension_semantics<parallel>], iteration_bounds = array<i64: 8>, scalar_prefetch = 0 : i64, scratch_operands = 0 : i64, tpu.core_type = #tpu.core_type<tc>, window_params = [{pipeline_mode = #tpu.pipeline_mode<synchronous>, transform_indices = @transform_0, window_bounds = array<i64: 5000, 48>}, {transform_indices = @transform_1, window_bounds = array<i64: 1, 48, 199>}, {transform_indices = @transform_2, window_bounds = array<i64: 1, 5000, 199>}]} {
    %c0 = arith.constant 0 : index
    %c0_0 = arith.constant 0 : index
    %0 = vector.load %arg1[%c0, %c0_0] : memref<5000x48xbf16, #tpu.memory_space<vmem>>, vector<5000x48xbf16>
    %c0_1 = arith.constant 0 : index
    %c0_2 = arith.constant 0 : index
    %c0_3 = arith.constant 0 : index
    %1 = vector.load %arg2[%c0_1, %c0_2, %c0_3] : memref<1x48x199xbf16, #tpu.memory_space<vmem>>, vector<1x48x199xbf16>
    %2 = vector.shape_cast %1 : vector<1x48x199xbf16> to vector<48x199xbf16>
    %cst = arith.constant dense<0.000000e+00> : vector<5000x199xf32>
    %3 = tpu.matmul %0, %2, %cst {dimension_numbers = #tpu.dot_dimension_numbers<[1], [0], [0], [1], [0, 0, 1, 1], [], []>} : vector<5000x48xbf16>, vector<48x199xbf16>, vector<5000x199xf32> -> vector<5000x199xf32>
    %c0_4 = arith.constant 0 : index
    %c0_5 = arith.constant 0 : index
    %c0_6 = arith.constant 0 : index
    %4 = vector.load %arg3[%c0_4, %c0_5, %c0_6] : memref<1x5000x199xf32, #tpu.memory_space<vmem>>, vector<1x5000x199xf32>
    %5 = vector.shape_cast %4 : vector<1x5000x199xf32> to vector<5000x199xf32>
    %6 = vector.shape_cast %3 : vector<5000x199xf32> to vector<1x5000x199xf32>
    tpu.vector_store %arg3[%c0_4, %c0_5, %c0_6], %6 {strides = array<i32>} : memref<1x5000x199xf32, #tpu.memory_space<vmem>>, vector<1x5000x199xf32>,
    return
  }
  func.func @transform_0(%arg0: i32) -> (i32, i32) {
    %c0_i32 = arith.constant 0 : i32
    %c0_i32_0 = arith.constant 0 : i32
    %c0_i32_1 = arith.constant 0 : i32
    return %c0_i32, %c0_i32_0 : i32, i32
  }
  func.func @transform_1(%arg0: i32) -> (i32, i32, i32) {
    %c0_i32 = arith.constant 0 : i32
    %c0_i32_0 = arith.constant 0 : i32
    %c0_i32_1 = arith.constant 0 : i32
    return %arg0, %c0_i32, %c0_i32_0 : i32, i32, i32
  }
  func.func @transform_2(%arg0: i32) -> (i32, i32, i32) {
    %c0_i32 = arith.constant 0 : i32
    %c0_i32_0 = arith.constant 0 : i32
    %c0_i32_1 = arith.constant 0 : i32
    return %arg0, %c0_i32, %c0_i32_0 : i32, i32, i32
  }
}

</mosaic_0001>

<bundles_post_ra>
// kernel: _forward_impl.1
= control target key start
LH: loop header
LB: loop body
LE: loop exit
PB: predicated region body
PF: predicated region fallthrough
CT: control target
= control target key end

     0   :  { %s8780_s9 = smov 0   ;;  %s12243_s0 = inlined_call_operand.vmem [shape: bf16[5000,48], index: 0, kind: input, shape index: {}]   ;;  %s12244_s1 = inlined_call_operand.vmem [shape: bf16[8,48,199], index: 1, kind: input, shape index: {}]   ;;  %s12245_s2 = inlined_call_operand.vmem [shape: f32[8,5000,199], index: 2, kind: output, shape index: {}]  }
   0x1 LB: > { %s7776_s10 = sadd.s32 4294967295, %s8762_s9   ;;  %p7780_p0 = scmp.ge.s32.totalorder %s8762_s9, 1  ;;  %s8762_s9 = sphi %s8780_s9, %s12_s9  }
   0x2   : > { %p112_p1 = scmp.lt.s32.totalorder %s8762_s9, 9 }
   0x4   : > { %p113_p2 = pnand %p7780_p0, %p112_p1 }
   0x5   : > { %p134_p3 = scmp.lt.s32.totalorder (!%p113_p2), %s7776_s10, 7 }
   0x6   : > { %116 = sbr.rel (%p113_p2) target bundleno = 1476 (0x5c4), region = 28 }
   0xb   : > { %v8764_v0 = vmov 0   ;;  %s12247_s10 = smov (!%p134_p3, %s7776_s10), 7  ;;  %v8443_v7 = vld [vmem:[%s12243_s0] sm:$0xff]   ;;  %v8444_v8 = vld [vmem:[%s12243_s0 + $0x4e8] sm:$0xff]   ;;  %vm2369_vm0 = vcmask 392192   ;;  %v8446_v10 = vld [vmem:[%s12243_s0 + $0x4f0] sm:$0xff]  }
   0xc   : > { %3341 = vmatprep.mubr.bf16.mxu0 %v8764_v0  ;;  %4911 = vmatprep.mubr.bf16.mxu1 %v8764_v0  ;;  %s8423_s11 = smul.u32 48, %s12247_s10  ;;  %v8445_v9 = vld [vmem:[%s12243_s0 + $0x8] sm:$0xff]   ;;  %v8447_v11 = vld [vmem:[%s12243_s0 + $0x10] sm:$0xff]   ;;  %v8448_v12 = vld [vmem:[%s12243_s0 + $0x4f8] sm:$0xff]   ;;  %vm6471_vm1 = vcmask 580608  }
   0xd   : > { %v8449_v13 = vld [vmem:[%s12243_s0 + $0x18] sm:$0xff]   ;;  %v8450_v14 = vld [vmem:[%s12243_s0 + $0x500] sm:$0xff]   ;;  %v8452_v16 = vld [vmem:[%s12243_s0 + $0x508] sm:$0xff]   ;;  %s8424_s5 = smul.u32 10000, %s12247_s10 }
   0xe   : > { %s138_s14 = scalar_lea.vmem %s12244_s1, %s8423_s11  ;;  %v8451_v15 = vld [vmem:[%s12243_s0 + $0x20] sm:$0xff]   ;;  %v8453_v17 = vld [vmem:[%s12243_s0 + $0x28] sm:$0xff]   ;;  %v8454_v18 = vld [vmem:[%s12243_s0 + $0x510] sm:$0xff]  }
   0xf   : > { %v8434_v1 = vld [vmem:[%s138_s14 + $0x24] ss:$8 sps:$4 sm:$0xff]   ;;  %v8436_v2 = vld [vmem:[%s138_s14 + $0x20] ss:$8 sps:$4 sm:$0xff]   ;;  %v8437_v3 = vld [vmem:[%s138_s14 + $0x14] ss:$8 sps:$4 sm:$0xff]  }
  0x10   : > { %3319 = vmatprep.subr.bf16.mxu0 %v8434_v1  ;;  %8417 = vmatprep.subr.bf16.mxu1 %v8434_v1  ;;  %v8439_v4 = vld [vmem:[%s138_s14 + $0x10] ss:$8 sps:$4 sm:$0xff]   ;;  %v8440_v5 = vld [vmem:[%s138_s14 + $0x4] ss:$8 sps:$4 sm:$0xff]   ;;  %v8442_v6 = vld [vmem:[%s138_s14] ss:$8 sps:$4 sm:$0xff]   ;;  %s9046_s14 = scalar_lea.vmem %s12245_s2, %s8424_s5 }
  0x11   : > { %3320 = vmatpush1.bf16.msra.mxu0 %v8436_v2  ;;  %8420 = vmatpush1.bf16.msra.mxu1 %v8436_v2  ;;  %v8455_v19 = vld [vmem:[%s12243_s0 + $0x30] sm:$0xff]   ;;  %v8456_v20 = vld [vmem:[%s12243_s0 + $0x518] sm:$0xff]   ;;  %v8458_v22 = vld [vmem:[%s12243_s0 + $0x520] sm:$0xff]  }
  0x12   : > { %3321 = vmatprep.subr.bf16.mxu0 %v8437_v3  ;;  %8418 = vmatprep.subr.bf16.mxu1 %v8437_v3  ;;  %v8457_v21 = vld [vmem:[%s12243_s0 + $0x38] sm:$0xff]   ;;  %v8459_v23 = vld [vmem:[%s12243_s0 + $0x40] sm:$0xff]   ;;  %v8460_v24 = vld [vmem:[%s12243_s0 + $0x528] sm:$0xff]  }
  0x13   : > { %v8461_v25 = vld [vmem:[%s12243_s0 + $0x48] sm:$0xff]   ;;  %v8462_v26 = vld [vmem:[%s12243_s0 + $0x530] sm:$0xff]   ;;  %v8464_v28 = vld [vmem:[%s12243_s0 + $0x538] sm:$0xff]  }
  0x14   : > { %v8463_v27 = vld [vmem:[%s12243_s0 + $0x50] sm:$0xff]   ;;  %v8465_v29 = vld [vmem:[%s12243_s0 + $0x58] sm:$0xff]   ;;  %v8466_v30 = vld [vmem:[%s12243_s0 + $0x540] sm:$0xff]  }
  0x15   : > { %3322 = vmatpush1.bf16.msra.mxu0 %v8439_v4  ;;  %8421 = vmatpush1.bf16.msra.mxu1 %v8439_v4  ;;  %v8467_v31 = vld [vmem:[%s12243_s0 + $0x60] sm:$0xff]   ;;  %v8468_v32 = vld [vmem:[%s12243_s0 + $0x548] sm:$0xff]   ;;  %v8470_v34 = vld [vmem:[%s12243_s0 + $0x550] sm:$0xff]  }
  0x16   : > { %3323 = vmatprep.subr.bf16.mxu0 %v8440_v5  ;;  %8419 = vmatprep.subr.bf16.mxu1 %v8440_v5  ;;  %v8469_v33 = vld [vmem:[%s12243_s0 + $0x68] sm:$0xff]   ;;  %v8471_v35 = vld [vmem:[%s12243_s0 + $0x70] sm:$0xff]   ;;  %v8472_v36 = vld [vmem:[%s12243_s0 + $0x558] sm:$0xff]  }
  0x17   : > { %v8473_v37 = vld [vmem:[%s12243_s0 + $0x78] sm:$0xff]   ;;  %v8474_v38 = vld [vmem:[%s12243_s0 + $0x560] sm:$0xff]   ;;  %v8476_v40 = vld [vmem:[%s12243_s0 + $0x568] sm:$0xff]  }
  0x18   : > { %v8475_v39 = vld [vmem:[%s12243_s0 + $0x80] sm:$0xff]   ;;  %v8477_v41 = vld [vmem:[%s12243_s0 + $0x88] sm:$0xff]   ;;  %v8478_v42 = vld [vmem:[%s12243_s0 + $0x570] sm:$0xff]  }
  0x19   : > { %3324 = vmatpush1.bf16.msra.mxu0 %v8442_v6  ;;  %8422 = vmatpush1.bf16.msra.mxu1 %v8442_v6  ;;  %v8479_v43 = vld [vmem:[%s12243_s0 + $0x90] sm:$0xff]   ;;  %v8480_v44 = vld [vmem:[%s12243_s0 + $0x578] sm:$0xff]   ;;  %v8482_v46 = vld [vmem:[%s12243_s0 + $0x580] sm:$0xff]  }
  0x1a   : > { %v8481_v45 = vld [vmem:[%s12243_s0 + $0x98] sm:$0xff]   ;;  %v8483_v47 = vld [vmem:[%s12243_s0 + $0xa0] sm:$0xff]   ;;  %v8484_v48 = vld [vmem:[%s12243_s0 + $0x588] sm:$0xff]  }
  0x1b   : > { %v8485_v49 = vld [vmem:[%s12243_s0 + $0xa8] sm:$0xff]   ;;  %v8486_v50 = vld [vmem:[%s12243_s0 + $0x590] sm:$0xff]   ;;  %v8488_v52 = vld [vmem:[%s12243_s0 + $0x598] sm:$0xff]  }
  0x1c   : > { %8102 = vmatmul.mubr.msk.bf16.vlgmr.msra.gmra.mxu0 %vm2369_vm0, %v8443_v7  ;;  %8259 = vmatmul.mubr.msk.bf16.vlgmr.msra.gmra.mxu1 %vm2369_vm0, %v8444_v8  ;;  %v8487_v51 = vld [vmem:[%s12243_s0 + $0xb0] sm:$0xff]   ;;  %v8489_v53 = vld [vmem:[%s12243_s0 + $0xb8] sm:$0xff]   ;;  %v8490_v54 = vld [vmem:[%s12243_s0 + $0x5a0] sm:$0xff]  }
  0x1d   : > { %3351 = vmatprep.mubr.bf16.mxu0 %v8764_v0  ;;  %4921 = vmatprep.mubr.bf16.mxu1 %v8764_v0  ;;  %v8491_v55 = vld [vmem:[%s12243_s0 + $0xc0] sm:$0xff]   ;;  %v8492_v56 = vld [vmem:[%s12243_s0 + $0x5a8] sm:$0xff]   ;;  %v8494_v62 = vld [vmem:[%s12243_s0 + $0x5b0] sm:$0xff]  }
  0x1e   : > { %v8493_v61 = vld [vmem:[%s12243_s0 + $0xc8] sm:$0xff]   ;;  %v8495_v8 = vld [vmem:[%s12243_s0 + $0xd0] sm:$0xff]  }
  0x24   : > { %8103 = vmatmul.mubr.msk.bf16.gmra.mxu0 %vm2369_vm0, %v8445_v9  ;;  %8260 = vmatmul.mubr.msk.bf16.gmra.mxu1 %vm2369_vm0, %v8446_v10  ;;  %v8496_v9 = vld [vmem:[%s12243_s0 + $0x5b8] sm:$0xff]  }
  0x25   : > { %3361 = vmatprep.mubr.bf16.mxu0 %v8764_v0  ;;  %4931 = vmatprep.mubr.bf16.mxu1 %v8764_v0 }
  0x2c   : > { %8104 = vmatmul.mubr.msk.bf16.gmra.mxu0 %vm2369_vm0, %v8447_v11  ;;  %8261 = vmatmul.mubr.msk.bf16.gmra.mxu1 %vm2369_vm0, %v8448_v12 }
  0x2d   : > { %3371 = vmatprep.mubr.bf16.mxu0 %v8764_v0  ;;  %4941 = vmatprep.mubr.bf16.mxu1 %v8764_v0 }
  0x34   : > { %8105 = vmatmul.mubr.msk.bf16.gmra.mxu0 %vm2369_vm0, %v8449_v13  ;;  %8262 = vmatmul.mubr.msk.bf16.gmra.mxu1 %vm2369_vm0, %v8450_v14 }
  0x35   : > { %3381 = vmatprep.mubr.bf16.mxu0 %v8764_v0  ;;  %4951 = vmatprep.mubr.bf16.mxu1 %v8764_v0 }
  0x3c   : > { %8106 = vmatmul.mubr.msk.bf16.gmra.mxu0 %vm2369_vm0, %v8451_v15  ;;  %8263 = vmatmul.mubr.msk.bf16.gmra.mxu1 %vm2369_vm0, %v8452_v16 }
  0x3d   : > { %3391 = vmatprep.mubr.bf16.mxu0 %v8764_v0  ;;  %4961 = vmatprep.mubr.bf16.mxu1 %v8764_v0 }
  0x44   : > { %8107 = vmatmul.mubr.msk.bf16.gmra.mxu0 %vm2369_vm0, %v8453_v17  ;;  %8264 = vmatmul.mubr.msk.bf16.gmra.mxu1 %vm2369_vm0, %v8454_v18  ;;  %v8497_v18 = vld [vmem:[%s12243_s0 + $0xd8] sm:$0xff]  }
  0x45   : > { %3401 = vmatprep.mubr.bf16.mxu0 %v8764_v0  ;;  %4971 = vmatprep.mubr.bf16.mxu1 %v8764_v0 }
  0x4c   : > { %8108 = vmatmul.mubr.msk.bf16.gmra.mxu0 %vm2369_vm0, %v8455_v19  ;;  %8265 = vmatmul.mubr.msk.bf16.gmra.mxu1 %vm2369_vm0, %v8456_v20  ;;  %v8498_v19 = vld [vmem:[%s12243_s0 + $0x5c0] sm:$0xff]  }
  0x4d   : > { %3411 = vmatprep.mubr.bf16.mxu0 %v8764_v0  ;;  %4981 = vmatprep.mubr.bf16.mxu1 %v8764_v0 }
  0x54   : > { %8109 = vmatmul.mubr.msk.bf16.gmra.mxu0 %vm2369_vm0, %v8457_v21  ;;  %8266 = vmatmul.mubr.msk.bf16.gmra.mxu1 %vm2369_vm0, %v8458_v22 }
  0x55   : > { %3421 = vmatprep.mubr.bf16.mxu0 %v8764_v0  ;;  %4991 = vmatprep.mubr.bf16.mxu1 %v8764_v0 }
  0x5c   : > { %8110 = vmatmul.mubr.msk.bf16.gmra.mxu0 %vm2369_vm0, %v8459_v23  ;;  %8267 = vmatmul.mubr.msk.bf16.gmra.mxu1 %vm2369_vm0, %v8460_v24 }
  0x5d   : > { %3431 = vmatprep.mubr.bf16.mxu0 %v8764_v0  ;;  %5001 = vmatprep.mubr.bf16.mxu1 %v8764_v0 }
  0x64   : > { %8111 = vmatmul.mubr.msk.bf16.gmra.mxu0 %vm2369_vm0, %v8461_v25  ;;  %8268 = vmatmul.mubr.msk.bf16.gmra.mxu1 %vm2369_vm0, %v8462_v26 }
  0x65   : > { %3441 = vmatprep.mubr.bf16.mxu0 %v8764_v0  ;;  %5011 = vmatprep.mubr.bf16.mxu1 %v8764_v0 }
  0x6c   : > { %8112 = vmatmul.mubr.msk.bf16.gmra.mxu0 %vm2369_vm0, %v8463_v27  ;;  %8269 = vmatmul.mubr.msk.bf16.gmra.mxu1 %vm2369_vm0, %v8464_v28  ;;  %v8499_v28 = vld [vmem:[%s12243_s0 + $0xe0] sm:$0xff]  }
  0x6d   : > { %3451 = vmatprep.mubr.bf16.mxu0 %v8764_v0  ;;  %5021 = vmatprep.mubr.bf16.mxu1 %v8764_v0 }
  0x74   : > { %8113 = vmatmul.mubr.msk.bf16.gmra.mxu0 %vm2369_vm0, %v8465_v29  ;;  %8270 = vmatmul.mubr.msk.bf16.gmra.mxu1 %vm2369_vm0, %v8466_v30  ;;  %v8500_v29 = vld [vmem:[%s12243_s0 + $0x5c8] sm:$0xff]  }
  0x75   : > { %3461 = vmatprep.mubr.bf16.mxu0 %v8764_v0  ;;  %5031 = vmatprep.mubr.bf16.mxu1 %v8764_v0 }
  0x7c   : > { %8114 = vmatmul.mubr.msk.bf16.gmra.mxu0 %vm2369_vm0, %v8467_v31  ;;  %8271 = vmatmul.mubr.msk.bf16.gmra.mxu1 %vm2369_vm0, %v8468_v32 }
  0x7d   : > { %3471 = vmatprep.mubr.bf16.mxu0 %v8764_v0  ;;  %5041 = vmatprep.mubr.bf16.mxu1 %v8764_v0 }
  0x84   : > { %8115 = vmatmul.mubr.msk.bf16.gmra.mxu0 %vm2369_vm0, %v8469_v33  ;;  %8272 = vmatmul.mubr.msk.bf16.gmra.mxu1 %vm2369_vm0, %v8470_v34 }
  0x85   : > { %3481 = vmatprep.mubr.bf16.mxu0 %v8764_v0  ;;  %5051 = vmatprep.mubr.bf16.mxu1 %v8764_v0 }
  0x8c   : > { %8116 = vmatmul.mubr.msk.bf16.gmra.mxu0 %vm2369_vm0, %v8471_v35  ;;  %8273 = vmatmul.mubr.msk.bf16.gmra.mxu1 %vm2369_vm0, %v8472_v36 }
  0x8d   : > { %3491 = vmatprep.mubr.bf16.mxu0 %v8764_v0  ;;  %5061 = vmatprep.mubr.bf16.mxu1 %v8764_v0 }
  0x94   : > { %8117 = vmatmul.mubr.msk.bf16.gmra.mxu0 %vm2369_vm0, %v8473_v37  ;;  %8274 = vmatmul.mubr.msk.bf16.gmra.mxu1 %vm2369_vm0, %v8474_v38 }
  0x95   : > { %3501 = vmatprep.mubr.bf16.mxu0 %v8764_v0  ;;  %5071 = vmatprep.mubr.bf16.mxu1 %v8764_v0 }
  0x9c   : > { %8118 = vmatmul.mubr.msk.bf16.gmra.mxu0 %vm2369_vm0, %v8475_v39  ;;  %8275 = vmatmul.mubr.msk.bf16.gmra.mxu1 %vm2369_vm0, %v8476_v40  ;;  %v8501_v40 = vld [vmem:[%s12243_s0 + $0xe8] sm:$0xff]  }
  0x9d   : > { %3511 = vmatprep.mubr.bf16.mxu0 %v8764_v0  ;;  %5081 = vmatprep.mubr.bf16.mxu1 %v8764_v0 }
  0xa4   : > { %8119 = vmatmul.mubr.msk.bf16.gmra.mxu0 %vm2369_vm0, %v8477_v41  ;;  %8276 = vmatmul.mubr.msk.bf16.gmra.mxu1 %vm2369_vm0, %v8478_v42  ;;  %v8502_v41 = vld [vmem:[%s12243_s0 + $0x5d0] sm:$0xff]  }
  0xa5   : > { %3521 = vmatprep.mubr.bf16.mxu0 %v8764_v0  ;;  %5091 = vmatprep.mubr.bf16.mxu1 %v8764_v0 }
  0xac   : > { %8120 = vmatmul.mubr.msk.bf16.gmra.mxu0 %vm2369_vm0, %v8479_v43  ;;  %8277 = vmatmul.mubr.msk.bf16.gmra.mxu1 %vm2369_vm0, %v8480_v44 }
  0xad   : > { %3531 = vmatprep.mubr.bf16.mxu0 %v8764_v0  ;;  %5101 = vmatprep.mubr.bf16.mxu1 %v8764_v0 }
  0xb4   : > { %8121 = vmatmul.mubr.msk.bf16.gmra.mxu0 %vm2369_vm0, %v8481_v45  ;;  %8278 = vmatmul.mubr.msk.bf16.gmra.mxu1 %vm2369_vm0, %v8482_v46 }
  0xb5   : > { %3541 = vmatprep.mubr.bf16.mxu0 %v8764_v0  ;;  %5111 = vmatprep.mubr.bf16.mxu1 %v8764_v0 }
  0xbc   : > { %8122 = vmatmul.mubr.msk.bf16.gmra.mxu0 %vm2369_vm0, %v8483_v47  ;;  %8279 = vmatmul.mubr.msk.bf16.gmra.mxu1 %vm2369_vm0, %v8484_v48 }
  0xbd   : > { %3551 = vmatprep.mubr.bf16.mxu0 %v8764_v0  ;;  %5121 = vmatprep.mubr.bf16.mxu1 %v8764_v0 }
  0xc4   : > { %8123 = vmatmul.mubr.msk.bf16.gmra.mxu0 %vm2369_vm0, %v8485_v49  ;;  %8280 = vmatmul.mubr.msk.bf16.gmra.mxu1 %vm2369_vm0, %v8486_v50  ;;  %v8503_v50 = vld [vmem:[%s12243_s0 + $0xf0] sm:$0xff]  }
  0xc5   : > { %3561 = vmatprep.mubr.bf16.mxu0 %v8764_v0  ;;  %5131 = vmatprep.mubr.bf16.mxu1 %v8764_v0 }
  0xcc   : > { %8124 = vmatmul.mubr.msk.bf16.gmra.mxu0 %vm2369_vm0, %v8487_v51  ;;  %8281 = vmatmul.mubr.msk.bf16.gmra.mxu1 %vm2369_vm0, %v8488_v52  ;;  %v8504_v51 = vld [vmem:[%s12243_s0 + $0x5d8] sm:$0xff]  }
  0xcd   : > { %3571 = vmatprep.mubr.bf16.mxu0 %v8764_v0  ;;  %5141 = vmatprep.mubr.bf16.mxu1 %v8764_v0 }
  0xd4   : > { %8125 = vmatmul.mubr.msk.bf16.gmra.mxu0 %vm2369_vm0, %v8489_v53  ;;  %8282 = vmatmul.mubr.msk.bf16.gmra.mxu1 %vm2369_vm0, %v8490_v54 }
  0xd5   : > { %3581 = vmatprep.mubr.bf16.mxu0 %v8764_v0  ;;  %5151 = vmatprep.mubr.bf16.mxu1 %v8764_v0 }
  0xdc   : > { %v3343_v57 = vpop.f32.mrf.mxu0  ;;  %8126 = vmatmul.mubr.msk.bf16.gmra.mxu0 %vm2369_vm0, %v8491_v55  ;;  %v4913_v58 = vpop.f32.mrf.mxu1  ;;  %8283 = vmatmul.mubr.msk.bf16.gmra.mxu1 %vm2369_vm0, %v8492_v56 }
  0xdd   : > { %6470 = vst [vmem:[%s9046_s14] sm:$0xff] %v3343_v57  ;;  %7099 = vst [vmem:[%s9046_s14 + $0x13a0] sm:$0xff] %v4913_v58  ;;  %3591 = vmatprep.mubr.bf16.mxu0 %v8764_v0  ;;  %5161 = vmatprep.mubr.bf16.mxu1 %v8764_v0 }
  0xde   : > { %v3345_v59 = vpop.f32.mrf.mxu0  ;;  %v4915_v60 = vpop.f32.mrf.mxu1 }
  0xdf   : > { %6472 = vst.msk [vmem:[%s9046_s14 + $0x8] sm:$0xff] %vm6471_vm1, %v3345_v59  ;;  %7100 = vst.msk [vmem:[%s9046_s14 + $0x13a8] sm:$0xff] %vm6471_vm1, %v4915_v60  ;;  %v8505_v60 = vld [vmem:[%s12243_s0 + $0xf8] sm:$0xff]  }
  0xe0   : > { %v3347_v63 = vpop.f32.mrf.mxu0  ;;  %v4917_v1 = vpop.f32.mrf.mxu1 }
  0xe1   : > { %6473 = vst [vmem:[%s9046_s14 + $0x10] sm:$0xff] %v3347_v63  ;;  %7101 = vst [vmem:[%s9046_s14 + $0x13b0] sm:$0xff] %v4917_v1 }
  0xe2   : > { %v3349_v2 = vpop.f32.mrf.mxu0  ;;  %v4919_v3 = vpop.f32.mrf.mxu1 }
  0xe3   : > { %6474 = vst.msk [vmem:[%s9046_s14 + $0x18] sm:$0xff] %vm6471_vm1, %v3349_v2  ;;  %7102 = vst.msk [vmem:[%s9046_s14 + $0x13b8] sm:$0xff] %vm6471_vm1, %v4919_v3 }
  0xe4   : > { %v3353_v4 = vpop.f32.mrf.mxu0  ;;  %8127 = vmatmul.mubr.msk.bf16.gmra.mxu0 %vm2369_vm0, %v8493_v61  ;;  %v4923_v5 = vpop.f32.mrf.mxu1  ;;  %8284 = vmatmul.mubr.msk.bf16.gmra.mxu1 %vm2369_vm0, %v8494_v62  ;;  %v8506_v61 = vld [vmem:[%s12243_s0 + $0x5e0] sm:$0xff]  }
  0xe5   : > { %6475 = vst [vmem:[%s9046_s14 + $0x20] sm:$0xff] %v3353_v4  ;;  %7103 = vst [vmem:[%s9046_s14 + $0x13c0] sm:$0xff] %v4923_v5  ;;  %3601 = vmatprep.mubr.bf16.mxu0 %v8764_v0  ;;  %5171 = vmatprep.mubr.bf16.mxu1 %v8764_v0 }
  0xe6   : > { %v3355_v6 = vpop.f32.mrf.mxu0  ;;  %v4925_v7 = vpop.f32.mrf.mxu1 }
  0xe7   : > { %6476 = vst.msk [vmem:[%s9046_s14 + $0x28] sm:$0xff] %vm6471_vm1, %v3355_v6  ;;  %7104 = vst.msk [vmem:[%s9046_s14 + $0x13c8] sm:$0xff] %vm6471_vm1, %v4925_v7  ;;  %v8507_v7 = vld [vmem:[%s12243_s0 + $0x100] sm:$0xff]  }
  0xe8   : > { %v3357_v10 = vpop.f32.mrf.mxu0  ;;  %v4927_v11 = vpop.f32.mrf.mxu1 }
  0xe9   : > { %6477 = vst [vmem:[%s9046_s14 + $0x30] sm:$0xff] %v3357_v10  ;;  %7105 = vst [vmem:[%s9046_s14 + $0x13d0] sm:$0xff] %v4927_v11 }
  0xea   : > { %v3359_v12 = vpop.f32.mrf.mxu0  ;;  %v4929_v13 = vpop.f32.mrf.mxu1 }
  0xeb   : > { %6478 = vst.msk [vmem:[%s9046_s14 + $0x38] sm:$0xff] %vm6471_vm1, %v3359_v12  ;;  %7106 = vst.msk [vmem:[%s9046_s14 + $0x13d8] sm:$0xff] %vm6471_vm1, %v4929_v13 }
  0xec   : > { %v3363_v14 = vpop.f32.mrf.mxu0  ;;  %8128 = vmatmul.mubr.msk.bf16.gmra.mxu0 %vm2369_vm0, %v8495_v8  ;;  %v4933_v15 = vpop.f32.mrf.mxu1  ;;  %8285 = vmatmul.mubr.msk.bf16.gmra.mxu1 %vm2369_vm0, %v8496_v9  ;;  %v8508_v8 = vld [vmem:[%s12243_s0 + $0x5e8] sm:$0xff]  }
  0xed   : > { %6479 = vst [vmem:[%s9046_s14 + $0x40] sm:$0xff] %v3363_v14  ;;  %7107 = vst [vmem:[%s9046_s14 + $0x13e0] sm:$0xff] %v4933_v15  ;;  %3611 = vmatprep.mubr.bf16.mxu0 %v8764_v0  ;;  %5181 = vmatprep.mubr.bf16.mxu1 %v8764_v0 }
  0xee   : > { %v3365_v16 = vpop.f32.mrf.mxu0  ;;  %v4935_v17 = vpop.f32.mrf.mxu1 }
  0xef   : > { %6480 = vst.msk [vmem:[%s9046_s14 + $0x48] sm:$0xff] %vm6471_vm1, %v3365_v16  ;;  %7108 = vst.msk [vmem:[%s9046_s14 + $0x13e8] sm:$0xff] %vm6471_vm1, %v4935_v17  ;;  %v8509_v17 = vld [vmem:[%s12243_s0 + $0x108] sm:$0xff]  }
  0xf0   : > { %v3367_v20 = vpop.f32.mrf.mxu0  ;;  %v4937_v21 = vpop.f32.mrf.mxu1 }
  0xf1   : > { %6481 = vst [vmem:[%s9046_s14 + $0x50] sm:$0xff] %v3367_v20  ;;  %7109 = vst [vmem:[%s9046_s14 + $0x13f0] sm:$0xff] %v4937_v21 }
  0xf2   : > { %v3369_v22 = vpop.f32.mrf.mxu0  ;;  %v4939_v23 = vpop.f32.mrf.mxu1 }
  0xf3   : > { %6482 = vst.msk [vmem:[%s9046_s14 + $0x58] sm:$0xff] %vm6471_vm1, %v3369_v22  ;;  %7110 = vst.msk [vmem:[%s9046_s14 + $0x13f8] sm:$0xff] %vm6471_vm1, %v4939_v23 }
  0xf4   : > { %v3373_v24 = vpop.f32.mrf.mxu0  ;;  %8129 = vmatmul.mubr.msk.bf16.gmra.mxu0 %vm2369_vm0, %v8497_v18  ;;  %v4943_v25 = vpop.f32.mrf.mxu1  ;;  %8286 = vmatmul.mubr.msk.bf16.gmra.mxu1 %vm2369_vm0, %v8498_v19  ;;  %v8510_v18 = vld [vmem:[%s12243_s0 + $0x5f0] sm:$0xff]  }
  0xf5   : > { %6483 = vst [vmem:[%s9046_s14 + $0x60] sm:$0xff] %v3373_v24  ;;  %7111 = vst [vmem:[%s9046_s14 + $0x1400] sm:$0xff] %v4943_v25  ;;  %3621 = vmatprep.mubr.bf16.mxu0 %v8764_v0  ;;  %5191 = vmatprep.mubr.bf16.mxu1 %v8764_v0 }
  0xf6   : > { %v3375_v26 = vpop.f32.mrf.mxu0  ;;  %v4945_v27 = vpop.f32.mrf.mxu1 }
  0xf7   : > { %6484 = vst.msk [vmem:[%s9046_s14 + $0x68] sm:$0xff] %vm6471_vm1, %v3375_v26  ;;  %7112 = vst.msk [vmem:[%s9046_s14 + $0x1408] sm:$0xff] %vm6471_vm1, %v4945_v27  ;;  %v8511_v27 = vld [vmem:[%s12243_s0 + $0x110] sm:$0xff]  }
  0xf8   : > { %v3377_v30 = vpop.f32.mrf.mxu0  ;;  %v4947_v31 = vpop.f32.mrf.mxu1 }
  0xf9   : > { %6485 = vst [vmem:[%s9046_s14 + $0x70] sm:$0xff] %v3377_v30  ;;  %7113 = vst [vmem:[%s9046_s14 + $0x1410] sm:$0xff] %v4947_v31 }
  0xfa   : > { %v3379_v32 = vpop.f32.mrf.mxu0  ;;  %v4949_v33 = vpop.f32.mrf.mxu1 }
  0xfb   : > { %6486 = vst.msk [vmem:[%s9046_s14 + $0x78] sm:$0xff] %vm6471_vm1, %v3379_v32  ;;  %7114 = vst.msk [vmem:[%s9046_s14 + $0x1418] sm:$0xff] %vm6471_vm1, %v4949_v33 }
  0xfc   : > { %v3383_v34 = vpop.f32.mrf.mxu0  ;;  %8130 = vmatmul.mubr.msk.bf16.gmra.mxu0 %vm2369_vm0, %v8499_v28  ;;  %v4953_v35 = vpop.f32.mrf.mxu1  ;;  %8287 = vmatmul.mubr.msk.bf16.gmra.mxu1 %vm2369_vm0, %v8500_v29  ;;  %v8512_v28 = vld [vmem:[%s12243_s0 + $0x5f8] sm:$0xff]  }
  0xfd   : > { %6487 = vst [vmem:[%s9046_s14 + $0x80] sm:$0xff] %v3383_v34  ;;  %7115 = vst [vmem:[%s9046_s14 + $0x1420] sm:$0xff] %v4953_v35  ;;  %3631 = vmatprep.mubr.bf16.mxu0 %v8764_v0  ;;  %5201 = vmatprep.mubr.bf16.mxu1 %v8764_v0 }
  0xfe   : > { %v3385_v36 = vpop.f32.mrf.mxu0  ;;  %v4955_v37 = vpop.f32.mrf.mxu1 }
  0xff   : > { %6488 = vst.msk [vmem:[%s9046_s14 + $0x88] sm:$0xff] %vm6471_vm1, %v3385_v36  ;;  %7116 = vst.msk [vmem:[%s9046_s14 + $0x1428] sm:$0xff] %vm6471_vm1, %v4955_v37  ;;  %v8513_v37 = vld [vmem:[%s12243_s0 + $0x118] sm:$0xff]  }
 0x100   : > { %v3387_v38 = vpop.f32.mrf.mxu0  ;;  %v4957_v39 = vpop.f32.mrf.mxu1 }
 0x101   : > { %6489 = vst [vmem:[%s9046_s14 + $0x90] sm:$0xff] %v3387_v38  ;;  %7117 = vst [vmem:[%s9046_s14 + $0x1430] sm:$0xff] %v4957_v39  ;;  %v8514_v38 = vld [vmem:[%s12243_s0 + $0x600] sm:$0xff]  }
 0x102   : > { %v3389_v42 = vpop.f32.mrf.mxu0  ;;  %v4959_v43 = vpop.f32.mrf.mxu1 }
 0x103   : > { %6490 = vst.msk [vmem:[%s9046_s14 + $0x98] sm:$0xff] %vm6471_vm1, %v3389_v42  ;;  %7118 = vst.msk [vmem:[%s9046_s14 + $0x1438] sm:$0xff] %vm6471_vm1, %v4959_v43 }
 0x104   : > { %v3393_v44 = vpop.f32.mrf.mxu0  ;;  %8131 = vmatmul.mubr.msk.bf16.gmra.mxu0 %vm2369_vm0, %v8501_v40  ;;  %v4963_v45 = vpop.f32.mrf.mxu1  ;;  %8288 = vmatmul.mubr.msk.bf16.gmra.mxu1 %vm2369_vm0, %v8502_v41 }
 0x105   : > { %6491 = vst [vmem:[%s9046_s14 + $0xa0] sm:$0xff] %v3393_v44  ;;  %7119 = vst [vmem:[%s9046_s14 + $0x1440] sm:$0xff] %v4963_v45  ;;  %3641 = vmatprep.mubr.bf16.mxu0 %v8764_v0  ;;  %5211 = vmatprep.mubr.bf16.mxu1 %v8764_v0 }
 0x106   : > { %v3395_v46 = vpop.f32.mrf.mxu0  ;;  %v4965_v47 = vpop.f32.mrf.mxu1 }
 0x107   : > { %6492 = vst.msk [vmem:[%s9046_s14 + $0xa8] sm:$0xff] %vm6471_vm1, %v3395_v46  ;;  %7120 = vst.msk [vmem:[%s9046_s14 + $0x1448] sm:$0xff] %vm6471_vm1, %v4965_v47  ;;  %v8515_v47 = vld [vmem:[%s12243_s0 + $0x120] sm:$0xff]  }
 0x108   : > { %v3397_v48 = vpop.f32.mrf.mxu0  ;;  %v4967_v49 = vpop.f32.mrf.mxu1 }
 0x109   : > { %6493 = vst [vmem:[%s9046_s14 + $0xb0] sm:$0xff] %v3397_v48  ;;  %7121 = vst [vmem:[%s9046_s14 + $0x1450] sm:$0xff] %v4967_v49  ;;  %v8516_v48 = vld [vmem:[%s12243_s0 + $0x608] sm:$0xff]  }
 0x10a   : > { %v3399_v52 = vpop.f32.mrf.mxu0  ;;  %v4969_v53 = vpop.f32.mrf.mxu1 }
 0x10b   : > { %6494 = vst.msk [vmem:[%s9046_s14 + $0xb8] sm:$0xff] %vm6471_vm1, %v3399_v52  ;;  %7122 = vst.msk [vmem:[%s9046_s14 + $0x1458] sm:$0xff] %vm6471_vm1, %v4969_v53 }
 0x10c   : > { %v3403_v54 = vpop.f32.mrf.mxu0  ;;  %8132 = vmatmul.mubr.msk.bf16.gmra.mxu0 %vm2369_vm0, %v8503_v50  ;;  %v4973_v55 = vpop.f32.mrf.mxu1  ;;  %8289 = vmatmul.mubr.msk.bf16.gmra.mxu1 %vm2369_vm0, %v8504_v51 }
 0x10d   : > { %6495 = vst [vmem:[%s9046_s14 + $0xc0] sm:$0xff] %v3403_v54  ;;  %7123 = vst [vmem:[%s9046_s14 + $0x1460] sm:$0xff] %v4973_v55  ;;  %3651 = vmatprep.mubr.bf16.mxu0 %v8764_v0  ;;  %5221 = vmatprep.mubr.bf16.mxu1 %v8764_v0 }
 0x10e   : > { %v3405_v56 = vpop.f32.mrf.mxu0  ;;  %v4975_v57 = vpop.f32.mrf.mxu1 }
 0x10f   : > { %6496 = vst.msk [vmem:[%s9046_s14 + $0xc8] sm:$0xff] %vm6471_vm1, %v3405_v56  ;;  %7124 = vst.msk [vmem:[%s9046_s14 + $0x1468] sm:$0xff] %vm6471_vm1, %v4975_v57  ;;  %v8517_v57 = vld [vmem:[%s12243_s0 + $0x128] sm:$0xff]  }
 0x110   : > { %v3407_v58 = vpop.f32.mrf.mxu0  ;;  %v4977_v59 = vpop.f32.mrf.mxu1 }
 0x111   : > { %6497 = vst [vmem:[%s9046_s14 + $0xd0] sm:$0xff] %v3407_v58  ;;  %7125 = vst [vmem:[%s9046_s14 + $0x1470] sm:$0xff] %v4977_v59  ;;  %v8518_v58 = vld [vmem:[%s12243_s0 + $0x610] sm:$0xff]  }
 0x112   : > { %v3409_v62 = vpop.f32.mrf.mxu0  ;;  %v4979_v63 = vpop.f32.mrf.mxu1 }
 0x113   : > { %6498 = vst.msk [vmem:[%s9046_s14 + $0xd8] sm:$0xff] %vm6471_vm1, %v3409_v62  ;;  %7126 = vst.msk [vmem:[%s9046_s14 + $0x1478] sm:$0xff] %vm6471_vm1, %v4979_v63 }
 0x114   : > { %v3413_v1 = vpop.f32.mrf.mxu0  ;;  %8133 = vmatmul.mubr.msk.bf16.gmra.mxu0 %vm2369_vm0, %v8505_v60  ;;  %v4983_v2 = vpop.f32.mrf.mxu1  ;;  %8290 = vmatmul.mubr.msk.bf16.gmra.mxu1 %vm2369_vm0, %v8506_v61 }
 0x115   : > { %6499 = vst [vmem:[%s9046_s14 + $0xe0] sm:$0xff] %v3413_v1  ;;  %7127 = vst [vmem:[%s9046_s14 + $0x1480] sm:$0xff] %v4983_v2  ;;  %3661 = vmatprep.mubr.bf16.mxu0 %v8764_v0  ;;  %5231 = vmatprep.mubr.bf16.mxu1 %v8764_v0 }
 0x116   : > { %v3415_v3 = vpop.f32.mrf.mxu0  ;;  %v4985_v4 = vpop.f32.mrf.mxu1 }
 0x117   : > { %6500 = vst.msk [vmem:[%s9046_s14 + $0xe8] sm:$0xff] %vm6471_vm1, %v3415_v3  ;;  %7128 = vst.msk [vmem:[%s9046_s14 + $0x1488] sm:$0xff] %vm6471_vm1, %v4985_v4  ;;  %v8519_v4 = vld [vmem:[%s12243_s0 + $0x130] sm:$0xff]  }
 0x118   : > { %v3417_v5 = vpop.f32.mrf.mxu0  ;;  %v4987_v6 = vpop.f32.mrf.mxu1 }
 0x119   : > { %6501 = vst [vmem:[%s9046_s14 + $0xf0] sm:$0xff] %v3417_v5  ;;  %7129 = vst [vmem:[%s9046_s14 + $0x1490] sm:$0xff] %v4987_v6  ;;  %v8520_v5 = vld [vmem:[%s12243_s0 + $0x618] sm:$0xff]  }
 0x11a   : > { %v3419_v9 = vpop.f32.mrf.mxu0  ;;  %v4989_v10 = vpop.f32.mrf.mxu1 }
 0x11b   : > { %6502 = vst.msk [vmem:[%s9046_s14 + $0xf8] sm:$0xff] %vm6471_vm1, %v3419_v9  ;;  %7130 = vst.msk [vmem:[%s9046_s14 + $0x1498] sm:$0xff] %vm6471_vm1, %v4989_v10 }
 0x11c   : > { %v3423_v11 = vpop.f32.mrf.mxu0  ;;  %8134 = vmatmul.mubr.msk.bf16.gmra.mxu0 %vm2369_vm0, %v8507_v7  ;;  %v4993_v12 = vpop.f32.mrf.mxu1  ;;  %8291 = vmatmul.mubr.msk.bf16.gmra.mxu1 %vm2369_vm0, %v8508_v8 }
 0x11d   : > { %6503 = vst [vmem:[%s9046_s14 + $0x100] sm:$0xff] %v3423_v11  ;;  %7131 = vst [vmem:[%s9046_s14 + $0x14a0] sm:$0xff] %v4993_v12  ;;  %3671 = vmatprep.mubr.bf16.mxu0 %v8764_v0  ;;  %5241 = vmatprep.mubr.bf16.mxu1 %v8764_v0 }
 0x11e   : > { %v3425_v13 = vpop.f32.mrf.mxu0  ;;  %v4995_v14 = vpop.f32.mrf.mxu1 }
 0x11f   : > { %6504 = vst.msk [vmem:[%s9046_s14 + $0x108] sm:$0xff] %vm6471_vm1, %v3425_v13  ;;  %7132 = vst.msk [vmem:[%s9046_s14 + $0x14a8] sm:$0xff] %vm6471_vm1, %v4995_v14  ;;  %v8521_v14 = vld [vmem:[%s12243_s0 + $0x138] sm:$0xff]  }
 0x120   : > { %v3427_v15 = vpop.f32.mrf.mxu0  ;;  %v4997_v16 = vpop.f32.mrf.mxu1 }
 0x121   : > { %6505 = vst [vmem:[%s9046_s14 + $0x110] sm:$0xff] %v3427_v15  ;;  %7133 = vst [vmem:[%s9046_s14 + $0x14b0] sm:$0xff] %v4997_v16  ;;  %v8522_v15 = vld [vmem:[%s12243_s0 + $0x620] sm:$0xff]  }
 0x122   : > { %v3429_v19 = vpop.f32.mrf.mxu0  ;;  %v4999_v20 = vpop.f32.mrf.mxu1 }
 0x123   : > { %6506 = vst.msk [vmem:[%s9046_s14 + $0x118] sm:$0xff] %vm6471_vm1, %v3429_v19  ;;  %7134 = vst.msk [vmem:[%s9046_s14 + $0x14b8] sm:$0xff] %vm6471_vm1, %v4999_v20 }
 0x124   : > { %v3433_v21 = vpop.f32.mrf.mxu0  ;;  %8135 = vmatmul.mubr.msk.bf16.gmra.mxu0 %vm2369_vm0, %v8509_v17  ;;  %v5003_v22 = vpop.f32.mrf.mxu1  ;;  %8292 = vmatmul.mubr.msk.bf16.gmra.mxu1 %vm2369_vm0, %v8510_v18 }
 0x125   : > { %6507 = vst [vmem:[%s9046_s14 + $0x120] sm:$0xff] %v3433_v21  ;;  %7135 = vst [vmem:[%s9046_s14 + $0x14c0] sm:$0xff] %v5003_v22  ;;  %3681 = vmatprep.mubr.bf16.mxu0 %v8764_v0  ;;  %5251 = vmatprep.mubr.bf16.mxu1 %v8764_v0 }
 0x126   : > { %v3435_v23 = vpop.f32.mrf.mxu0  ;;  %v5005_v24 = vpop.f32.mrf.mxu1 }
 0x127   : > { %6508 = vst.msk [vmem:[%s9046_s14 + $0x128] sm:$0xff] %vm6471_vm1, %v3435_v23  ;;  %7136 = vst.msk [vmem:[%s9046_s14 + $0x14c8] sm:$0xff] %vm6471_vm1, %v5005_v24  ;;  %v8523_v24 = vld [vmem:[%s12243_s0 + $0x140] sm:$0xff]  }
 0x128   : > { %v3437_v25 = vpop.f32.mrf.mxu0  ;;  %v5007_v26 = vpop.f32.mrf.mxu1 }
 0x129   : > { %6509 = vst [vmem:[%s9046_s14 + $0x130] sm:$0xff] %v3437_v25  ;;  %7137 = vst [vmem:[%s9046_s14 + $0x14d0] sm:$0xff] %v5007_v26  ;;  %v8524_v25 = vld [vmem:[%s12243_s0 + $0x628] sm:$0xff]  }
 0x12a   : > { %v3439_v29 = vpop.f32.mrf.mxu0  ;;  %v5009_v30 = vpop.f32.mrf.mxu1 }
 0x12b   : > { %6510 = vst.msk [vmem:[%s9046_s14 + $0x138] sm:$0xff] %vm6471_vm1, %v3439_v29  ;;  %7138 = vst.msk [vmem:[%s9046_s14 + $0x14d8] sm:$0xff] %vm6471_vm1, %v5009_v30 }
 0x12c   : > { %v3443_v31 = vpop.f32.mrf.mxu0  ;;  %8136 = vmatmul.mubr.msk.bf16.gmra.mxu0 %vm2369_vm0, %v8511_v27  ;;  %v5013_v32 = vpop.f32.mrf.mxu1  ;;  %8293 = vmatmul.mubr.msk.bf16.gmra.mxu1 %vm2369_vm0, %v8512_v28 }
 0x12d   : > { %6511 = vst [vmem:[%s9046_s14 + $0x140] sm:$0xff] %v3443_v31  ;;  %7139 = vst [vmem:[%s9046_s14 + $0x14e0] sm:$0xff] %v5013_v32  ;;  %3691 = vmatprep.mubr.bf16.mxu0 %v8764_v0  ;;  %5261 = vmatprep.mubr.bf16.mxu1 %v8764_v0 }
 0x12e   : > { %v3445_v33 = vpop.f32.mrf.mxu0  ;;  %v5015_v34 = vpop.f32.mrf.mxu1 }
 0x12f   : > { %6512 = vst.msk [vmem:[%s9046_s14 + $0x148] sm:$0xff] %vm6471_vm1, %v3445_v33  ;;  %7140 = vst.msk [vmem:[%s9046_s14 + $0x14e8] sm:$0xff] %vm6471_vm1, %v5015_v34  ;;  %v8525_v34 = vld [vmem:[%s12243_s0 + $0x148] sm:$0xff]  }
 0x130   : > { %v3447_v35 = vpop.f32.mrf.mxu0  ;;  %v5017_v36 = vpop.f32.mrf.mxu1 }
 0x131   : > { %6513 = vst [vmem:[%s9046_s14 + $0x150] sm:$0xff] %v3447_v35  ;;  %7141 = vst [vmem:[%s9046_s14 + $0x14f0] sm:$0xff] %v5017_v36  ;;  %v8526_v35 = vld [vmem:[%s12243_s0 + $0x630] sm:$0xff]  }
 0x132   : > { %v3449_v39 = vpop.f32.mrf.mxu0  ;;  %v5019_v40 = vpop.f32.mrf.mxu1 }
 0x133   : > { %6514 = vst.msk [vmem:[%s9046_s14 + $0x158] sm:$0xff] %vm6471_vm1, %v3449_v39  ;;  %7142 = vst.msk [vmem:[%s9046_s14 + $0x14f8] sm:$0xff] %vm6471_vm1, %v5019_v40 }
 0x134   : > { %v3453_v41 = vpop.f32.mrf.mxu0  ;;  %8137 = vmatmul.mubr.msk.bf16.gmra.mxu0 %vm2369_vm0, %v8513_v37  ;;  %v5023_v42 = vpop.f32.mrf.mxu1  ;;  %8294 = vmatmul.mubr.msk.bf16.gmra.mxu1 %vm2369_vm0, %v8514_v38 }
 0x135   : > { %6515 = vst [vmem:[%s9046_s14 + $0x160] sm:$0xff] %v3453_v41  ;;  %7143 = vst [vmem:[%s9046_s14 + $0x1500] sm:$0xff] %v5023_v42  ;;  %3701 = vmatprep.mubr.bf16.mxu0 %v8764_v0  ;;  %5271 = vmatprep.mubr.bf16.mxu1 %v8764_v0 }
 0x136   : > { %v3455_v43 = vpop.f32.mrf.mxu0  ;;  %v5025_v44 = vpop.f32.mrf.mxu1 }
 0x137   : > { %6516 = vst.msk [vmem:[%s9046_s14 + $0x168] sm:$0xff] %vm6471_vm1, %v3455_v43  ;;  %7144 = vst.msk [vmem:[%s9046_s14 + $0x1508] sm:$0xff] %vm6471_vm1, %v5025_v44  ;;  %v8527_v44 = vld [vmem:[%s12243_s0 + $0x150] sm:$0xff]  }
 0x138   : > { %v3457_v45 = vpop.f32.mrf.mxu0  ;;  %v5027_v46 = vpop.f32.mrf.mxu1 }
 0x139   : > { %6517 = vst [vmem:[%s9046_s14 + $0x170] sm:$0xff] %v3457_v45  ;;  %7145 = vst [vmem:[%s9046_s14 + $0x1510] sm:$0xff] %v5027_v46  ;;  %v8528_v45 = vld [vmem:[%s12243_s0 + $0x638] sm:$0xff]  }
 0x13a   : > { %v3459_v49 = vpop.f32.mrf.mxu0  ;;  %v5029_v50 = vpop.f32.mrf.mxu1 }
 0x13b   : > { %6518 = vst.msk [vmem:[%s9046_s14 + $0x178] sm:$0xff] %vm6471_vm1, %v3459_v49  ;;  %7146 = vst.msk [vmem:[%s9046_s14 + $0x1518] sm:$0xff] %vm6471_vm1, %v5029_v50 }
 0x13c   : > { %v3463_v51 = vpop.f32.mrf.mxu0  ;;  %8138 = vmatmul.mubr.msk.bf16.gmra.mxu0 %vm2369_vm0, %v8515_v47  ;;  %v5033_v52 = vpop.f32.mrf.mxu1  ;;  %8295 = vmatmul.mubr.msk.bf16.gmra.mxu1 %vm2369_vm0, %v8516_v48 }
 0x13d   : > { %6519 = vst [vmem:[%s9046_s14 + $0x180] sm:$0xff] %v3463_v51  ;;  %7147 = vst [vmem:[%s9046_s14 + $0x1520] sm:$0xff] %v5033_v52  ;;  %3711 = vmatprep.mubr.bf16.mxu0 %v8764_v0  ;;  %5281 = vmatprep.mubr.bf16.mxu1 %v8764_v0 }
 0x13e   : > { %v3465_v53 = vpop.f32.mrf.mxu0  ;;  %v5035_v54 = vpop.f32.mrf.mxu1 }
 0x13f   : > { %6520 = vst.msk [vmem:[%s9046_s14 + $0x188] sm:$0xff] %vm6471_vm1, %v3465_v53  ;;  %7148 = vst.msk [vmem:[%s9046_s14 + $0x1528] sm:$0xff] %vm6471_vm1, %v5035_v54  ;;  %v8529_v54 = vld [vmem:[%s12243_s0 + $0x158] sm:$0xff]  }
 0x140   : > { %v3467_v55 = vpop.f32.mrf.mxu0  ;;  %v5037_v56 = vpop.f32.mrf.mxu1 }
 0x141   : > { %6521 = vst [vmem:[%s9046_s14 + $0x190] sm:$0xff] %v3467_v55  ;;  %7149 = vst [vmem:[%s9046_s14 + $0x1530] sm:$0xff] %v5037_v56  ;;  %v8530_v55 = vld [vmem:[%s12243_s0 + $0x640] sm:$0xff]  }
 0x142   : > { %v3469_v59 = vpop.f32.mrf.mxu0  ;;  %v5039_v60 = vpop.f32.mrf.mxu1 }
 0x143   : > { %6522 = vst.msk [vmem:[%s9046_s14 + $0x198] sm:$0xff] %vm6471_vm1, %v3469_v59  ;;  %7150 = vst.msk [vmem:[%s9046_s14 + $0x1538] sm:$0xff] %vm6471_vm1, %v5039_v60 }
 0x144   : > { %v3473_v61 = vpop.f32.mrf.mxu0  ;;  %8139 = vmatmul.mubr.msk.bf16.gmra.mxu0 %vm2369_vm0, %v8517_v57  ;;  %v5043_v62 = vpop.f32.mrf.mxu1  ;;  %8296 = vmatmul.mubr.msk.bf16.gmra.mxu1 %vm2369_vm0, %v8518_v58 }
 0x145   : > { %6523 = vst [vmem:[%s9046_s14 + $0x1a0] sm:$0xff] %v3473_v61  ;;  %7151 = vst [vmem:[%s9046_s14 + $0x1540] sm:$0xff] %v5043_v62  ;;  %3721 = vmatprep.mubr.bf16.mxu0 %v8764_v0  ;;  %5291 = vmatprep.mubr.bf16.mxu1 %v8764_v0 }
 0x146   : > { %v3475_v63 = vpop.f32.mrf.mxu0  ;;  %v5045_v1 = vpop.f32.mrf.mxu1 }
 0x147   : > { %6524 = vst.msk [vmem:[%s9046_s14 + $0x1a8] sm:$0xff] %vm6471_vm1, %v3475_v63  ;;  %7152 = vst.msk [vmem:[%s9046_s14 + $0x1548] sm:$0xff] %vm6471_vm1, %v5045_v1  ;;  %v8531_v1 = vld [vmem:[%s12243_s0 + $0x160] sm:$0xff]  }
 0x148   : > { %v3477_v2 = vpop.f32.mrf.mxu0  ;;  %v5047_v3 = vpop.f32.mrf.mxu1 }
 0x149   : > { %6525 = vst [vmem:[%s9046_s14 + $0x1b0] sm:$0xff] %v3477_v2  ;;  %7153 = vst [vmem:[%s9046_s14 + $0x1550] sm:$0xff] %v5047_v3  ;;  %v8532_v2 = vld [vmem:[%s12243_s0 + $0x648] sm:$0xff]  }
 0x14a   : > { %v3479_v6 = vpop.f32.mrf.mxu0  ;;  %v5049_v7 = vpop.f32.mrf.mxu1 }
 0x14b   : > { %6526 = vst.msk [vmem:[%s9046_s14 + $0x1b8] sm:$0xff] %vm6471_vm1, %v3479_v6  ;;  %7154 = vst.msk [vmem:[%s9046_s14 + $0x1558] sm:$0xff] %vm6471_vm1, %v5049_v7 }
 0x14c   : > { %v3483_v8 = vpop.f32.mrf.mxu0  ;;  %8140 = vmatmul.mubr.msk.bf16.gmra.mxu0 %vm2369_vm0, %v8519_v4  ;;  %v5053_v9 = vpop.f32.mrf.mxu1  ;;  %8297 = vmatmul.mubr.msk.bf16.gmra.mxu1 %vm2369_vm0, %v8520_v5 }
 0x14d   : > { %6527 = vst [vmem:[%s9046_s14 + $0x1c0] sm:$0xff] %v3483_v8  ;;  %7155 = vst [vmem:[%s9046_s14 + $0x1560] sm:$0xff] %v5053_v9  ;;  %3731 = vmatprep.mubr.bf16.mxu0 %v8764_v0  ;;  %5301 = vmatprep.mubr.bf16.mxu1 %v8764_v0 }
 0x14e   : > { %v3485_v10 = vpop.f32.mrf.mxu0  ;;  %v5055_v11 = vpop.f32.mrf.mxu1 }
 0x14f   : > { %6528 = vst.msk [vmem:[%s9046_s14 + $0x1c8] sm:$0xff] %vm6471_vm1, %v3485_v10  ;;  %7156 = vst.msk [vmem:[%s9046_s14 + $0x1568] sm:$0xff] %vm6471_vm1, %v5055_v11  ;;  %v8533_v11 = vld [vmem:[%s12243_s0 + $0x168] sm:$0xff]  }
 0x150   : > { %v3487_v12 = vpop.f32.mrf.mxu0  ;;  %v5057_v13 = vpop.f32.mrf.mxu1 }
 0x151   : > { %6529 = vst [vmem:[%s9046_s14 + $0x1d0] sm:$0xff] %v3487_v12  ;;  %7157 = vst [vmem:[%s9046_s14 + $0x1570] sm:$0xff] %v5057_v13  ;;  %v8534_v12 = vld [vmem:[%s12243_s0 + $0x650] sm:$0xff]  }
 0x152   : > { %v3489_v16 = vpop.f32.mrf.mxu0  ;;  %v5059_v17 = vpop.f32.mrf.mxu1 }
 0x153   : > { %6530 = vst.msk [vmem:[%s9046_s14 + $0x1d8] sm:$0xff] %vm6471_vm1, %v3489_v16  ;;  %7158 = vst.msk [vmem:[%s9046_s14 + $0x1578] sm:$0xff] %vm6471_vm1, %v5059_v17 }
 0x154   : > { %v3493_v18 = vpop.f32.mrf.mxu0  ;;  %8141 = vmatmul.mubr.msk.bf16.gmra.mxu0 %vm2369_vm0, %v8521_v14  ;;  %v5063_v19 = vpop.f32.mrf.mxu1  ;;  %8298 = vmatmul.mubr.msk.bf16.gmra.mxu1 %vm2369_vm0, %v8522_v15 }
 0x155   : > { %6531 = vst [vmem:[%s9046_s14 + $0x1e0] sm:$0xff] %v3493_v18  ;;  %7159 = vst [vmem:[%s9046_s14 + $0x1580] sm:$0xff] %v5063_v19  ;;  %3741 = vmatprep.mubr.bf16.mxu0 %v8764_v0  ;;  %5311 = vmatprep.mubr.bf16.mxu1 %v8764_v0 }
 0x156   : > { %v3495_v20 = vpop.f32.mrf.mxu0  ;;  %v5065_v21 = vpop.f32.mrf.mxu1 }
 0x157   : > { %6532 = vst.msk [vmem:[%s9046_s14 + $0x1e8] sm:$0xff] %vm6471_vm1, %v3495_v20  ;;  %7160 = vst.msk [vmem:[%s9046_s14 + $0x1588] sm:$0xff] %vm6471_vm1, %v5065_v21  ;;  %v8535_v21 = vld [vmem:[%s12243_s0 + $0x170] sm:$0xff]  }
 0x158   : > { %v3497_v22 = vpop.f32.mrf.mxu0  ;;  %v5067_v23 = vpop.f32.mrf.mxu1 }
 0x159   : > { %6533 = vst [vmem:[%s9046_s14 + $0x1f0] sm:$0xff] %v3497_v22  ;;  %7161 = vst [vmem:[%s9046_s14 + $0x1590] sm:$0xff] %v5067_v23  ;;  %v8536_v22 = vld [vmem:[%s12243_s0 + $0x658] sm:$0xff]  }
 0x15a   : > { %v3499_v26 = vpop.f32.mrf.mxu0  ;;  %v5069_v27 = vpop.f32.mrf.mxu1 }
 0x15b   : > { %6534 = vst.msk [vmem:[%s9046_s14 + $0x1f8] sm:$0xff] %vm6471_vm1, %v3499_v26  ;;  %7162 = vst.msk [vmem:[%s9046_s14 + $0x1598] sm:$0xff] %vm6471_vm1, %v5069_v27 }
 0x15c   : > { %v3503_v28 = vpop.f32.mrf.mxu0  ;;  %8142 = vmatmul.mubr.msk.bf16.gmra.mxu0 %vm2369_vm0, %v8523_v24  ;;  %v5073_v29 = vpop.f32.mrf.mxu1  ;;  %8299 = vmatmul.mubr.msk.bf16.gmra.mxu1 %vm2369_vm0, %v8524_v25 }
 0x15d   : > { %6535 = vst [vmem:[%s9046_s14 + $0x200] sm:$0xff] %v3503_v28  ;;  %7163 = vst [vmem:[%s9046_s14 + $0x15a0] sm:$0xff] %v5073_v29  ;;  %3751 = vmatprep.mubr.bf16.mxu0 %v8764_v0  ;;  %5321 = vmatprep.mubr.bf16.mxu1 %v8764_v0 }
 0x15e   : > { %v3505_v30 = vpop.f32.mrf.mxu0  ;;  %v5075_v31 = vpop.f32.mrf.mxu1 }
 0x15f   : > { %6536 = vst.msk [vmem:[%s9046_s14 + $0x208] sm:$0xff] %vm6471_vm1, %v3505_v30  ;;  %7164 = vst.msk [vmem:[%s9046_s14 + $0x15a8] sm:$0xff] %vm6471_vm1, %v5075_v31  ;;  %v8537_v31 = vld [vmem:[%s12243_s0 + $0x178] sm:$0xff]  }
 0x160   : > { %v3507_v32 = vpop.f32.mrf.mxu0  ;;  %v5077_v33 = vpop.f32.mrf.mxu1 }
 0x161   : > { %6537 = vst [vmem:[%s9046_s14 + $0x210] sm:$0xff] %v3507_v32  ;;  %7165 = vst [vmem:[%s9046_s14 + $0x15b0] sm:$0xff] %v5077_v33  ;;  %v8538_v32 = vld [vmem:[%s12243_s0 + $0x660] sm:$0xff]  }
 0x162   : > { %v3509_v36 = vpop.f32.mrf.mxu0  ;;  %v5079_v37 = vpop.f32.mrf.mxu1 }
 0x163   : > { %6538 = vst.msk [vmem:[%s9046_s14 + $0x218] sm:$0xff] %vm6471_vm1, %v3509_v36  ;;  %7166 = vst.msk [vmem:[%s9046_s14 + $0x15b8] sm:$0xff] %vm6471_vm1, %v5079_v37 }
 0x164   : > { %v3513_v38 = vpop.f32.mrf.mxu0  ;;  %8143 = vmatmul.mubr.msk.bf16.gmra.mxu0 %vm2369_vm0, %v8525_v34  ;;  %v5083_v39 = vpop.f32.mrf.mxu1  ;;  %8300 = vmatmul.mubr.msk.bf16.gmra.mxu1 %vm2369_vm0, %v8526_v35 }
 0x165   : > { %6539 = vst [vmem:[%s9046_s14 + $0x220] sm:$0xff] %v3513_v38  ;;  %7167 = vst [vmem:[%s9046_s14 + $0x15c0] sm:$0xff] %v5083_v39  ;;  %3761 = vmatprep.mubr.bf16.mxu0 %v8764_v0  ;;  %5331 = vmatprep.mubr.bf16.mxu1 %v8764_v0 }
 0x166   : > { %v3515_v40 = vpop.f32.mrf.mxu0  ;;  %v5085_v41 = vpop.f32.mrf.mxu1 }
 0x167   : > { %6540 = vst.msk [vmem:[%s9046_s14 + $0x228] sm:$0xff] %vm6471_vm1, %v3515_v40  ;;  %7168 = vst.msk [vmem:[%s9046_s14 + $0x15c8] sm:$0xff] %vm6471_vm1, %v5085_v41  ;;  %v8539_v41 = vld [vmem:[%s12243_s0 + $0x180] sm:$0xff]  }
 0x168   : > { %v3517_v42 = vpop.f32.mrf.mxu0  ;;  %v5087_v43 = vpop.f32.mrf.mxu1 }
 0x169   : > { %6541 = vst [vmem:[%s9046_s14 + $0x230] sm:$0xff] %v3517_v42  ;;  %7169 = vst [vmem:[%s9046_s14 + $0x15d0] sm:$0xff] %v5087_v43  ;;  %v8540_v42 = vld [vmem:[%s12243_s0 + $0x668] sm:$0xff]  }
 0x16a   : > { %v3519_v46 = vpop.f32.mrf.mxu0  ;;  %v5089_v47 = vpop.f32.mrf.mxu1 }
 0x16b   : > { %6542 = vst.msk [vmem:[%s9046_s14 + $0x238] sm:$0xff] %vm6471_vm1, %v3519_v46  ;;  %7170 = vst.msk [vmem:[%s9046_s14 + $0x15d8] sm:$0xff] %vm6471_vm1, %v5089_v47 }
 0x16c   : > { %v3523_v48 = vpop.f32.mrf.mxu0  ;;  %8144 = vmatmul.mubr.msk.bf16.gmra.mxu0 %vm2369_vm0, %v8527_v44  ;;  %v5093_v49 = vpop.f32.mrf.mxu1  ;;  %8301 = vmatmul.mubr.msk.bf16.gmra.mxu1 %vm2369_vm0, %v8528_v45 }
 0x16d   : > { %6543 = vst [vmem:[%s9046_s14 + $0x240] sm:$0xff] %v3523_v48  ;;  %7171 = vst [vmem:[%s9046_s14 + $0x15e0] sm:$0xff] %v5093_v49  ;;  %3771 = vmatprep.mubr.bf16.mxu0 %v8764_v0  ;;  %5341 = vmatprep.mubr.bf16.mxu1 %v8764_v0 }
 0x16e   : > { %v3525_v50 = vpop.f32.mrf.mxu0  ;;  %v5095_v51 = vpop.f32.mrf.mxu1 }
 0x16f   : > { %6544 = vst.msk [vmem:[%s9046_s14 + $0x248] sm:$0xff] %vm6471_vm1, %v3525_v50  ;;  %7172 = vst.msk [vmem:[%s9046_s14 + $0x15e8] sm:$0xff] %vm6471_vm1, %v5095_v51  ;;  %v8541_v51 = vld [vmem:[%s12243_s0 + $0x188] sm:$0xff]  }
 0x170   : > { %v3527_v52 = vpop.f32.mrf.mxu0  ;;  %v5097_v53 = vpop.f32.mrf.mxu1 }
 0x171   : > { %6545 = vst [vmem:[%s9046_s14 + $0x250] sm:$0xff] %v3527_v52  ;;  %7173 = vst [vmem:[%s9046_s14 + $0x15f0] sm:$0xff] %v5097_v53  ;;  %v8542_v52 = vld [vmem:[%s12243_s0 + $0x670] sm:$0xff]  }
 0x172   : > { %v3529_v56 = vpop.f32.mrf.mxu0  ;;  %v5099_v57 = vpop.f32.mrf.mxu1 }
 0x173   : > { %6546 = vst.msk [vmem:[%s9046_s14 + $0x258] sm:$0xff] %vm6471_vm1, %v3529_v56  ;;  %7174 = vst.msk [vmem:[%s9046_s14 + $0x15f8] sm:$0xff] %vm6471_vm1, %v5099_v57 }
 0x174   : > { %v3533_v58 = vpop.f32.mrf.mxu0  ;;  %8145 = vmatmul.mubr.msk.bf16.gmra.mxu0 %vm2369_vm0, %v8529_v54  ;;  %v5103_v59 = vpop.f32.mrf.mxu1  ;;  %8302 = vmatmul.mubr.msk.bf16.gmra.mxu1 %vm2369_vm0, %v8530_v55 }
 0x175   : > { %6547 = vst [vmem:[%s9046_s14 + $0x260] sm:$0xff] %v3533_v58  ;;  %7175 = vst [vmem:[%s9046_s14 + $0x1600] sm:$0xff] %v5103_v59  ;;  %3781 = vmatprep.mubr.bf16.mxu0 %v8764_v0  ;;  %5351 = vmatprep.mubr.bf16.mxu1 %v8764_v0 }
 0x176   : > { %v3535_v60 = vpop.f32.mrf.mxu0  ;;  %v5105_v61 = vpop.f32.mrf.mxu1 }
 0x177   : > { %6548 = vst.msk [vmem:[%s9046_s14 + $0x268] sm:$0xff] %vm6471_vm1, %v3535_v60  ;;  %7176 = vst.msk [vmem:[%s9046_s14 + $0x1608] sm:$0xff] %vm6471_vm1, %v5105_v61  ;;  %v8543_v61 = vld [vmem:[%s12243_s0 + $0x190] sm:$0xff]  }
 0x178   : > { %v3537_v62 = vpop.f32.mrf.mxu0  ;;  %v5107_v63 = vpop.f32.mrf.mxu1 }
 0x179   : > { %6549 = vst [vmem:[%s9046_s14 + $0x270] sm:$0xff] %v3537_v62  ;;  %7177 = vst [vmem:[%s9046_s14 + $0x1610] sm:$0xff] %v5107_v63  ;;  %v8544_v62 = vld [vmem:[%s12243_s0 + $0x678] sm:$0xff]  }
 0x17a   : > { %v3539_v3 = vpop.f32.mrf.mxu0  ;;  %v5109_v4 = vpop.f32.mrf.mxu1 }
 0x17b   : > { %6550 = vst.msk [vmem:[%s9046_s14 + $0x278] sm:$0xff] %vm6471_vm1, %v3539_v3  ;;  %7178 = vst.msk [vmem:[%s9046_s14 + $0x1618] sm:$0xff] %vm6471_vm1, %v5109_v4 }
 0x17c   : > { %v3543_v5 = vpop.f32.mrf.mxu0  ;;  %8146 = vmatmul.mubr.msk.bf16.gmra.mxu0 %vm2369_vm0, %v8531_v1  ;;  %v5113_v6 = vpop.f32.mrf.mxu1  ;;  %8303 = vmatmul.mubr.msk.bf16.gmra.mxu1 %vm2369_vm0, %v8532_v2 }
 0x17d   : > { %6551 = vst [vmem:[%s9046_s14 + $0x280] sm:$0xff] %v3543_v5  ;;  %7179 = vst [vmem:[%s9046_s14 + $0x1620] sm:$0xff] %v5113_v6  ;;  %3791 = vmatprep.mubr.bf16.mxu0 %v8764_v0  ;;  %5361 = vmatprep.mubr.bf16.mxu1 %v8764_v0 }
 0x17e   : > { %v3545_v7 = vpop.f32.mrf.mxu0  ;;  %v5115_v8 = vpop.f32.mrf.mxu1 }
 0x17f   : > { %6552 = vst.msk [vmem:[%s9046_s14 + $0x288] sm:$0xff] %vm6471_vm1, %v3545_v7  ;;  %7180 = vst.msk [vmem:[%s9046_s14 + $0x1628] sm:$0xff] %vm6471_vm1, %v5115_v8  ;;  %v8545_v8 = vld [vmem:[%s12243_s0 + $0x198] sm:$0xff]  }
 0x180   : > { %v3547_v9 = vpop.f32.mrf.mxu0  ;;  %v5117_v10 = vpop.f32.mrf.mxu1 }
 0x181   : > { %6553 = vst [vmem:[%s9046_s14 + $0x290] sm:$0xff] %v3547_v9  ;;  %7181 = vst [vmem:[%s9046_s14 + $0x1630] sm:$0xff] %v5117_v10  ;;  %v8546_v9 = vld [vmem:[%s12243_s0 + $0x680] sm:$0xff]  }
 0x182   : > { %v3549_v13 = vpop.f32.mrf.mxu0  ;;  %v5119_v14 = vpop.f32.mrf.mxu1 }
 0x183   : > { %6554 = vst.msk [vmem:[%s9046_s14 + $0x298] sm:$0xff] %vm6471_vm1, %v3549_v13  ;;  %7182 = vst.msk [vmem:[%s9046_s14 + $0x1638] sm:$0xff] %vm6471_vm1, %v5119_v14 }
 0x184   : > { %v3553_v15 = vpop.f32.mrf.mxu0  ;;  %8147 = vmatmul.mubr.msk.bf16.gmra.mxu0 %vm2369_vm0, %v8533_v11  ;;  %v5123_v16 = vpop.f32.mrf.mxu1  ;;  %8304 = vmatmul.mubr.msk.bf16.gmra.mxu1 %vm2369_vm0, %v8534_v12 }
 0x185   : > { %6555 = vst [vmem:[%s9046_s14 + $0x2a0] sm:$0xff] %v3553_v15  ;;  %7183 = vst [vmem:[%s9046_s14 + $0x1640] sm:$0xff] %v5123_v16  ;;  %3801 = vmatprep.mubr.bf16.mxu0 %v8764_v0  ;;  %5371 = vmatprep.mubr.bf16.mxu1 %v8764_v0 }
 0x186   : > { %v3555_v17 = vpop.f32.mrf.mxu0  ;;  %v5125_v18 = vpop.f32.mrf.mxu1 }
 0x187   : > { %6556 = vst.msk [vmem:[%s9046_s14 + $0x2a8] sm:$0xff] %vm6471_vm1, %v3555_v17  ;;  %7184 = vst.msk [vmem:[%s9046_s14 + $0x1648] sm:$0xff] %vm6471_vm1, %v5125_v18  ;;  %v8547_v18 = vld [vmem:[%s12243_s0 + $0x1a0] sm:$0xff]  }
 0x188   : > { %v3557_v19 = vpop.f32.mrf.mxu0  ;;  %v5127_v20 = vpop.f32.mrf.mxu1 }
 0x189   : > { %6557 = vst [vmem:[%s9046_s14 + $0x2b0] sm:$0xff] %v3557_v19  ;;  %7185 = vst [vmem:[%s9046_s14 + $0x1650] sm:$0xff] %v5127_v20  ;;  %v8548_v19 = vld [vmem:[%s12243_s0 + $0x688] sm:$0xff]  }
 0x18a   : > { %v3559_v23 = vpop.f32.mrf.mxu0  ;;  %v5129_v24 = vpop.f32.mrf.mxu1 }
 0x18b   : > { %6558 = vst.msk [vmem:[%s9046_s14 + $0x2b8] sm:$0xff] %vm6471_vm1, %v3559_v23  ;;  %7186 = vst.msk [vmem:[%s9046_s14 + $0x1658] sm:$0xff] %vm6471_vm1, %v5129_v24 }
 0x18c   : > { %v3563_v25 = vpop.f32.mrf.mxu0  ;;  %8148 = vmatmul.mubr.msk.bf16.gmra.mxu0 %vm2369_vm0, %v8535_v21  ;;  %v5133_v26 = vpop.f32.mrf.mxu1  ;;  %8305 = vmatmul.mubr.msk.bf16.gmra.mxu1 %vm2369_vm0, %v8536_v22 }
 0x18d   : > { %6559 = vst [vmem:[%s9046_s14 + $0x2c0] sm:$0xff] %v3563_v25  ;;  %7187 = vst [vmem:[%s9046_s14 + $0x1660] sm:$0xff] %v5133_v26  ;;  %3811 = vmatprep.mubr.bf16.mxu0 %v8764_v0  ;;  %5381 = vmatprep.mubr.bf16.mxu1 %v8764_v0 }
 0x18e   : > { %v3565_v27 = vpop.f32.mrf.mxu0  ;;  %v5135_v28 = vpop.f32.mrf.mxu1 }
 0x18f   : > { %6560 = vst.msk [vmem:[%s9046_s14 + $0x2c8] sm:$0xff] %vm6471_vm1, %v3565_v27  ;;  %7188 = vst.msk [vmem:[%s9046_s14 + $0x1668] sm:$0xff] %vm6471_vm1, %v5135_v28  ;;  %v8549_v28 = vld [vmem:[%s12243_s0 + $0x1a8] sm:$0xff]  }
 0x190   : > { %v3567_v29 = vpop.f32.mrf.mxu0  ;;  %v5137_v30 = vpop.f32.mrf.mxu1 }
 0x191   : > { %6561 = vst [vmem:[%s9046_s14 + $0x2d0] sm:$0xff] %v3567_v29  ;;  %7189 = vst [vmem:[%s9046_s14 + $0x1670] sm:$0xff] %v5137_v30  ;;  %v8550_v29 = vld [vmem:[%s12243_s0 + $0x690] sm:$0xff]  }
 0x192   : > { %v3569_v33 = vpop.f32.mrf.mxu0  ;;  %v5139_v34 = vpop.f32.mrf.mxu1 }
 0x193   : > { %6562 = vst.msk [vmem:[%s9046_s14 + $0x2d8] sm:$0xff] %vm6471_vm1, %v3569_v33  ;;  %7190 = vst.msk [vmem:[%s9046_s14 + $0x1678] sm:$0xff] %vm6471_vm1, %v5139_v34 }
 0x194   : > { %v3573_v35 = vpop.f32.mrf.mxu0  ;;  %8149 = vmatmul.mubr.msk.bf16.gmra.mxu0 %vm2369_vm0, %v8537_v31  ;;  %v5143_v36 = vpop.f32.mrf.mxu1  ;;  %8306 = vmatmul.mubr.msk.bf16.gmra.mxu1 %vm2369_vm0, %v8538_v32 }
 0x195   : > { %6563 = vst [vmem:[%s9046_s14 + $0x2e0] sm:$0xff] %v3573_v35  ;;  %7191 = vst [vmem:[%s9046_s14 + $0x1680] sm:$0xff] %v5143_v36  ;;  %3821 = vmatprep.mubr.bf16.mxu0 %v8764_v0  ;;  %5391 = vmatprep.mubr.bf16.mxu1 %v8764_v0 }
 0x196   : > { %v3575_v37 = vpop.f32.mrf.mxu0  ;;  %v5145_v38 = vpop.f32.mrf.mxu1 }
 0x197   : > { %6564 = vst.msk [vmem:[%s9046_s14 + $0x2e8] sm:$0xff] %vm6471_vm1, %v3575_v37  ;;  %7192 = vst.msk [vmem:[%s9046_s14 + $0x1688] sm:$0xff] %vm6471_vm1, %v5145_v38  ;;  %v8551_v38 = vld [vmem:[%s12243_s0 + $0x1b0] sm:$0xff]  }
 0x198   : > { %v3577_v39 = vpop.f32.mrf.mxu0  ;;  %v5147_v40 = vpop.f32.mrf.mxu1 }
 0x199   : > { %6565 = vst [vmem:[%s9046_s14 + $0x2f0] sm:$0xff] %v3577_v39  ;;  %7193 = vst [vmem:[%s9046_s14 + $0x1690] sm:$0xff] %v5147_v40  ;;  %v8552_v39 = vld [vmem:[%s12243_s0 + $0x698] sm:$0xff]  }
 0x19a   : > { %v3579_v43 = vpop.f32.mrf.mxu0  ;;  %v5149_v44 = vpop.f32.mrf.mxu1 }
 0x19b   : > { %6566 = vst.msk [vmem:[%s9046_s14 + $0x2f8] sm:$0xff] %vm6471_vm1, %v3579_v43  ;;  %7194 = vst.msk [vmem:[%s9046_s14 + $0x1698] sm:$0xff] %vm6471_vm1, %v5149_v44 }
 0x19c   : > { %v3583_v45 = vpop.f32.mrf.mxu0  ;;  %8150 = vmatmul.mubr.msk.bf16.gmra.mxu0 %vm2369_vm0, %v8539_v41  ;;  %v5153_v46 = vpop.f32.mrf.mxu1  ;;  %8307 = vmatmul.mubr.msk.bf16.gmra.mxu1 %vm2369_vm0, %v8540_v42 }
 0x19d   : > { %6567 = vst [vmem:[%s9046_s14 + $0x300] sm:$0xff] %v3583_v45  ;;  %7195 = vst [vmem:[%s9046_s14 + $0x16a0] sm:$0xff] %v5153_v46  ;;  %3831 = vmatprep.mubr.bf16.mxu0 %v8764_v0  ;;  %5401 = vmatprep.mubr.bf16.mxu1 %v8764_v0 }
 0x19e   : > { %v3585_v47 = vpop.f32.mrf.mxu0  ;;  %v5155_v48 = vpop.f32.mrf.mxu1 }
 0x19f   : > { %6568 = vst.msk [vmem:[%s9046_s14 + $0x308] sm:$0xff] %vm6471_vm1, %v3585_v47  ;;  %7196 = vst.msk [vmem:[%s9046_s14 + $0x16a8] sm:$0xff] %vm6471_vm1, %v5155_v48  ;;  %v8553_v48 = vld [vmem:[%s12243_s0 + $0x1b8] sm:$0xff]  }
 0x1a0   : > { %v3587_v49 = vpop.f32.mrf.mxu0  ;;  %v5157_v50 = vpop.f32.mrf.mxu1 }
 0x1a1   : > { %6569 = vst [vmem:[%s9046_s14 + $0x310] sm:$0xff] %v3587_v49  ;;  %7197 = vst [vmem:[%s9046_s14 + $0x16b0] sm:$0xff] %v5157_v50  ;;  %v8554_v49 = vld [vmem:[%s12243_s0 + $0x6a0] sm:$0xff]  }
 0x1a2   : > { %v3589_v53 = vpop.f32.mrf.mxu0  ;;  %v5159_v54 = vpop.f32.mrf.mxu1 }
 0x1a3   : > { %6570 = vst.msk [vmem:[%s9046_s14 + $0x318] sm:$0xff] %vm6471_vm1, %v3589_v53  ;;  %7198 = vst.msk [vmem:[%s9046_s14 + $0x16b8] sm:$0xff] %vm6471_vm1, %v5159_v54 }
 0x1a4   : > { %v3593_v55 = vpop.f32.mrf.mxu0  ;;  %8151 = vmatmul.mubr.msk.bf16.gmra.mxu0 %vm2369_vm0, %v8541_v51  ;;  %v5163_v56 = vpop.f32.mrf.mxu1  ;;  %8308 = vmatmul.mubr.msk.bf16.gmra.mxu1 %vm2369_vm0, %v8542_v52 }
 0x1a5   : > { %6571 = vst [vmem:[%s9046_s14 + $0x320] sm:$0xff] %v3593_v55  ;;  %7199 = vst [vmem:[%s9046_s14 + $0x16c0] sm:$0xff] %v5163_v56  ;;  %3841 = vmatprep.mubr.bf16.mxu0 %v8764_v0  ;;  %5411 = vmatprep.mubr.bf16.mxu1 %v8764_v0 }
 0x1a6   : > { %v3595_v57 = vpop.f32.mrf.mxu0  ;;  %v5165_v58 = vpop.f32.mrf.mxu1 }
 0x1a7   : > { %6572 = vst.msk [vmem:[%s9046_s14 + $0x328] sm:$0xff] %vm6471_vm1, %v3595_v57  ;;  %7200 = vst.msk [vmem:[%s9046_s14 + $0x16c8] sm:$0xff] %vm6471_vm1, %v5165_v58  ;;  %v8555_v58 = vld [vmem:[%s12243_s0 + $0x1c0] sm:$0xff]  }
 0x1a8   : > { %v3597_v59 = vpop.f32.mrf.mxu0  ;;  %v5167_v60 = vpop.f32.mrf.mxu1 }
 0x1a9   : > { %6573 = vst [vmem:[%s9046_s14 + $0x330] sm:$0xff] %v3597_v59  ;;  %7201 = vst [vmem:[%s9046_s14 + $0x16d0] sm:$0xff] %v5167_v60  ;;  %v8556_v59 = vld [vmem:[%s12243_s0 + $0x6a8] sm:$0xff]  }
 0x1aa   : > { %v3599_v63 = vpop.f32.mrf.mxu0  ;;  %v5169_v1 = vpop.f32.mrf.mxu1 }
 0x1ab   : > { %6574 = vst.msk [vmem:[%s9046_s14 + $0x338] sm:$0xff] %vm6471_vm1, %v3599_v63  ;;  %7202 = vst.msk [vmem:[%s9046_s14 + $0x16d8] sm:$0xff] %vm6471_vm1, %v5169_v1 }
 0x1ac   : > { %v3603_v2 = vpop.f32.mrf.mxu0  ;;  %8152 = vmatmul.mubr.msk.bf16.gmra.mxu0 %vm2369_vm0, %v8543_v61  ;;  %v5173_v3 = vpop.f32.mrf.mxu1  ;;  %8309 = vmatmul.mubr.msk.bf16.gmra.mxu1 %vm2369_vm0, %v8544_v62 }
 0x1ad   : > { %6575 = vst [vmem:[%s9046_s14 + $0x340] sm:$0xff] %v3603_v2  ;;  %7203 = vst [vmem:[%s9046_s14 + $0x16e0] sm:$0xff] %v5173_v3  ;;  %3851 = vmatprep.mubr.bf16.mxu0 %v8764_v0  ;;  %5421 = vmatprep.mubr.bf16.mxu1 %v8764_v0 }
 0x1ae   : > { %v3605_v4 = vpop.f32.mrf.mxu0  ;;  %v5175_v5 = vpop.f32.mrf.mxu1 }
 0x1af   : > { %6576 = vst.msk [vmem:[%s9046_s14 + $0x348] sm:$0xff] %vm6471_vm1, %v3605_v4  ;;  %7204 = vst.msk [vmem:[%s9046_s14 + $0x16e8] sm:$0xff] %vm6471_vm1, %v5175_v5  ;;  %v8557_v5 = vld [vmem:[%s12243_s0 + $0x1c8] sm:$0xff]  }
 0x1b0   : > { %v3607_v6 = vpop.f32.mrf.mxu0  ;;  %v5177_v7 = vpop.f32.mrf.mxu1 }
 0x1b1   : > { %6577 = vst [vmem:[%s9046_s14 + $0x350] sm:$0xff] %v3607_v6  ;;  %7205 = vst [vmem:[%s9046_s14 + $0x16f0] sm:$0xff] %v5177_v7  ;;  %v8558_v6 = vld [vmem:[%s12243_s0 + $0x6b0] sm:$0xff]  }
 0x1b2   : > { %v3609_v10 = vpop.f32.mrf.mxu0  ;;  %v5179_v11 = vpop.f32.mrf.mxu1 }
 0x1b3   : > { %6578 = vst.msk [vmem:[%s9046_s14 + $0x358] sm:$0xff] %vm6471_vm1, %v3609_v10  ;;  %7206 = vst.msk [vmem:[%s9046_s14 + $0x16f8] sm:$0xff] %vm6471_vm1, %v5179_v11 }
 0x1b4   : > { %v3613_v12 = vpop.f32.mrf.mxu0  ;;  %8153 = vmatmul.mubr.msk.bf16.gmra.mxu0 %vm2369_vm0, %v8545_v8  ;;  %v5183_v13 = vpop.f32.mrf.mxu1  ;;  %8310 = vmatmul.mubr.msk.bf16.gmra.mxu1 %vm2369_vm0, %v8546_v9 }
 0x1b5   : > { %6579 = vst [vmem:[%s9046_s14 + $0x360] sm:$0xff] %v3613_v12  ;;  %7207 = vst [vmem:[%s9046_s14 + $0x1700] sm:$0xff] %v5183_v13  ;;  %3861 = vmatprep.mubr.bf16.mxu0 %v8764_v0  ;;  %5431 = vmatprep.mubr.bf16.mxu1 %v8764_v0 }
 0x1b6   : > { %v3615_v14 = vpop.f32.mrf.mxu0  ;;  %v5185_v15 = vpop.f32.mrf.mxu1 }
 0x1b7   : > { %6580 = vst.msk [vmem:[%s9046_s14 + $0x368] sm:$0xff] %vm6471_vm1, %v3615_v14  ;;  %7208 = vst.msk [vmem:[%s9046_s14 + $0x1708] sm:$0xff] %vm6471_vm1, %v5185_v15  ;;  %v8559_v15 = vld [vmem:[%s12243_s0 + $0x1d0] sm:$0xff]  }
 0x1b8   : > { %v3617_v16 = vpop.f32.mrf.mxu0  ;;  %v5187_v17 = vpop.f32.mrf.mxu1 }
 0x1b9   : > { %6581 = vst [vmem:[%s9046_s14 + $0x370] sm:$0xff] %v3617_v16  ;;  %7209 = vst [vmem:[%s9046_s14 + $0x1710] sm:$0xff] %v5187_v17  ;;  %v8560_v16 = vld [vmem:[%s12243_s0 + $0x6b8] sm:$0xff]  }
 0x1ba   : > { %v3619_v20 = vpop.f32.mrf.mxu0  ;;  %v5189_v21 = vpop.f32.mrf.mxu1 }
 0x1bb   : > { %6582 = vst.msk [vmem:[%s9046_s14 + $0x378] sm:$0xff] %vm6471_vm1, %v3619_v20  ;;  %7210 = vst.msk [vmem:[%s9046_s14 + $0x1718] sm:$0xff] %vm6471_vm1, %v5189_v21 }
 0x1bc   : > { %v3623_v22 = vpop.f32.mrf.mxu0  ;;  %8154 = vmatmul.mubr.msk.bf16.gmra.mxu0 %vm2369_vm0, %v8547_v18  ;;  %v5193_v23 = vpop.f32.mrf.mxu1  ;;  %8311 = vmatmul.mubr.msk.bf16.gmra.mxu1 %vm2369_vm0, %v8548_v19 }
 0x1bd   : > { %6583 = vst [vmem:[%s9046_s14 + $0x380] sm:$0xff] %v3623_v22  ;;  %7211 = vst [vmem:[%s9046_s14 + $0x1720] sm:$0xff] %v5193_v23  ;;  %3871 = vmatprep.mubr.bf16.mxu0 %v8764_v0  ;;  %5441 = vmatprep.mubr.bf16.mxu1 %v8764_v0 }
 0x1be   : > { %v3625_v24 = vpop.f32.mrf.mxu0  ;;  %v5195_v25 = vpop.f32.mrf.mxu1 }
 0x1bf   : > { %6584 = vst.msk [vmem:[%s9046_s14 + $0x388] sm:$0xff] %vm6471_vm1, %v3625_v24  ;;  %7212 = vst.msk [vmem:[%s9046_s14 + $0x1728] sm:$0xff] %vm6471_vm1, %v5195_v25  ;;  %v8561_v25 = vld [vmem:[%s12243_s0 + $0x1d8] sm:$0xff]  }
 0x1c0   : > { %v3627_v26 = vpop.f32.mrf.mxu0  ;;  %v5197_v27 = vpop.f32.mrf.mxu1 }
 0x1c1   : > { %6585 = vst [vmem:[%s9046_s14 + $0x390] sm:$0xff] %v3627_v26  ;;  %7213 = vst [vmem:[%s9046_s14 + $0x1730] sm:$0xff] %v5197_v27  ;;  %v8562_v26 = vld [vmem:[%s12243_s0 + $0x6c0] sm:$0xff]  }
 0x1c2   : > { %v3629_v30 = vpop.f32.mrf.mxu0  ;;  %v5199_v31 = vpop.f32.mrf.mxu1 }
 0x1c3   : > { %6586 = vst.msk [vmem:[%s9046_s14 + $0x398] sm:$0xff] %vm6471_vm1, %v3629_v30  ;;  %7214 = vst.msk [vmem:[%s9046_s14 + $0x1738] sm:$0xff] %vm6471_vm1, %v5199_v31 }
 0x1c4   : > { %v3633_v32 = vpop.f32.mrf.mxu0  ;;  %8155 = vmatmul.mubr.msk.bf16.gmra.mxu0 %vm2369_vm0, %v8549_v28  ;;  %v5203_v33 = vpop.f32.mrf.mxu1  ;;  %8312 = vmatmul.mubr.msk.bf16.gmra.mxu1 %vm2369_vm0, %v8550_v29 }
 0x1c5   : > { %6587 = vst [vmem:[%s9046_s14 + $0x3a0] sm:$0xff] %v3633_v32  ;;  %7215 = vst [vmem:[%s9046_s14 + $0x1740] sm:$0xff] %v5203_v33  ;;  %3881 = vmatprep.mubr.bf16.mxu0 %v8764_v0  ;;  %5451 = vmatprep.mubr.bf16.mxu1 %v8764_v0 }
 0x1c6   : > { %v3635_v34 = vpop.f32.mrf.mxu0  ;;  %v5205_v35 = vpop.f32.mrf.mxu1 }
 0x1c7   : > { %6588 = vst.msk [vmem:[%s9046_s14 + $0x3a8] sm:$0xff] %vm6471_vm1, %v3635_v34  ;;  %7216 = vst.msk [vmem:[%s9046_s14 + $0x1748] sm:$0xff] %vm6471_vm1, %v5205_v35  ;;  %v8563_v35 = vld [vmem:[%s12243_s0 + $0x1e0] sm:$0xff]  }
 0x1c8   : > { %v3637_v36 = vpop.f32.mrf.mxu0  ;;  %v5207_v37 = vpop.f32.mrf.mxu1 }
 0x1c9   : > { %6589 = vst [vmem:[%s9046_s14 + $0x3b0] sm:$0xff] %v3637_v36  ;;  %7217 = vst [vmem:[%s9046_s14 + $0x1750] sm:$0xff] %v5207_v37  ;;  %v8564_v36 = vld [vmem:[%s12243_s0 + $0x6c8] sm:$0xff]  }
 0x1ca   : > { %v3639_v40 = vpop.f32.mrf.mxu0  ;;  %v5209_v41 = vpop.f32.mrf.mxu1 }
 0x1cb   : > { %6590 = vst.msk [vmem:[%s9046_s14 + $0x3b8] sm:$0xff] %vm6471_vm1, %v3639_v40  ;;  %7218 = vst.msk [vmem:[%s9046_s14 + $0x1758] sm:$0xff] %vm6471_vm1, %v5209_v41 }
 0x1cc   : > { %v3643_v42 = vpop.f32.mrf.mxu0  ;;  %8156 = vmatmul.mubr.msk.bf16.gmra.mxu0 %vm2369_vm0, %v8551_v38  ;;  %v5213_v43 = vpop.f32.mrf.mxu1  ;;  %8313 = vmatmul.mubr.msk.bf16.gmra.mxu1 %vm2369_vm0, %v8552_v39 }
 0x1cd   : > { %6591 = vst [vmem:[%s9046_s14 + $0x3c0] sm:$0xff] %v3643_v42  ;;  %7219 = vst [vmem:[%s9046_s14 + $0x1760] sm:$0xff] %v5213_v43  ;;  %3891 = vmatprep.mubr.bf16.mxu0 %v8764_v0  ;;  %5461 = vmatprep.mubr.bf16.mxu1 %v8764_v0 }
 0x1ce   : > { %v3645_v44 = vpop.f32.mrf.mxu0  ;;  %v5215_v45 = vpop.f32.mrf.mxu1 }
 0x1cf   : > { %6592 = vst.msk [vmem:[%s9046_s14 + $0x3c8] sm:$0xff] %vm6471_vm1, %v3645_v44  ;;  %7220 = vst.msk [vmem:[%s9046_s14 + $0x1768] sm:$0xff] %vm6471_vm1, %v5215_v45  ;;  %v8565_v45 = vld [vmem:[%s12243_s0 + $0x1e8] sm:$0xff]  }
 0x1d0   : > { %v3647_v46 = vpop.f32.mrf.mxu0  ;;  %v5217_v47 = vpop.f32.mrf.mxu1 }
 0x1d1   : > { %6593 = vst [vmem:[%s9046_s14 + $0x3d0] sm:$0xff] %v3647_v46  ;;  %7221 = vst [vmem:[%s9046_s14 + $0x1770] sm:$0xff] %v5217_v47  ;;  %v8566_v46 = vld [vmem:[%s12243_s0 + $0x6d0] sm:$0xff]  }
 0x1d2   : > { %v3649_v50 = vpop.f32.mrf.mxu0  ;;  %v5219_v51 = vpop.f32.mrf.mxu1 }
 0x1d3   : > { %6594 = vst.msk [vmem:[%s9046_s14 + $0x3d8] sm:$0xff] %vm6471_vm1, %v3649_v50  ;;  %7222 = vst.msk [vmem:[%s9046_s14 + $0x1778] sm:$0xff] %vm6471_vm1, %v5219_v51 }
 0x1d4   : > { %v3653_v52 = vpop.f32.mrf.mxu0  ;;  %8157 = vmatmul.mubr.msk.bf16.gmra.mxu0 %vm2369_vm0, %v8553_v48  ;;  %v5223_v53 = vpop.f32.mrf.mxu1  ;;  %8314 = vmatmul.mubr.msk.bf16.gmra.mxu1 %vm2369_vm0, %v8554_v49 }
 0x1d5   : > { %6595 = vst [vmem:[%s9046_s14 + $0x3e0] sm:$0xff] %v3653_v52  ;;  %7223 = vst [vmem:[%s9046_s14 + $0x1780] sm:$0xff] %v5223_v53  ;;  %3901 = vmatprep.mubr.bf16.mxu0 %v8764_v0  ;;  %5471 = vmatprep.mubr.bf16.mxu1 %v8764_v0 }
 0x1d6   : > { %v3655_v54 = vpop.f32.mrf.mxu0  ;;  %v5225_v55 = vpop.f32.mrf.mxu1 }
 0x1d7   : > { %6596 = vst.msk [vmem:[%s9046_s14 + $0x3e8] sm:$0xff] %vm6471_vm1, %v3655_v54  ;;  %7224 = vst.msk [vmem:[%s9046_s14 + $0x1788] sm:$0xff] %vm6471_vm1, %v5225_v55  ;;  %v8567_v55 = vld [vmem:[%s12243_s0 + $0x1f0] sm:$0xff]  }
 0x1d8   : > { %v3657_v56 = vpop.f32.mrf.mxu0  ;;  %v5227_v57 = vpop.f32.mrf.mxu1 }
 0x1d9   : > { %6597 = vst [vmem:[%s9046_s14 + $0x3f0] sm:$0xff] %v3657_v56  ;;  %7225 = vst [vmem:[%s9046_s14 + $0x1790] sm:$0xff] %v5227_v57  ;;  %v8568_v56 = vld [vmem:[%s12243_s0 + $0x6d8] sm:$0xff]  }
 0x1da   : > { %v3659_v60 = vpop.f32.mrf.mxu0  ;;  %v5229_v61 = vpop.f32.mrf.mxu1 }
 0x1db   : > { %6598 = vst.msk [vmem:[%s9046_s14 + $0x3f8] sm:$0xff] %vm6471_vm1, %v3659_v60  ;;  %7226 = vst.msk [vmem:[%s9046_s14 + $0x1798] sm:$0xff] %vm6471_vm1, %v5229_v61 }
 0x1dc   : > { %v3663_v62 = vpop.f32.mrf.mxu0  ;;  %8158 = vmatmul.mubr.msk.bf16.gmra.mxu0 %vm2369_vm0, %v8555_v58  ;;  %v5233_v63 = vpop.f32.mrf.mxu1  ;;  %8315 = vmatmul.mubr.msk.bf16.gmra.mxu1 %vm2369_vm0, %v8556_v59 }
 0x1dd   : > { %6599 = vst [vmem:[%s9046_s14 + $0x400] sm:$0xff] %v3663_v62  ;;  %7227 = vst [vmem:[%s9046_s14 + $0x17a0] sm:$0xff] %v5233_v63  ;;  %3911 = vmatprep.mubr.bf16.mxu0 %v8764_v0  ;;  %5481 = vmatprep.mubr.bf16.mxu1 %v8764_v0 }
 0x1de   : > { %v3665_v1 = vpop.f32.mrf.mxu0  ;;  %v5235_v2 = vpop.f32.mrf.mxu1 }
 0x1df   : > { %6600 = vst.msk [vmem:[%s9046_s14 + $0x408] sm:$0xff] %vm6471_vm1, %v3665_v1  ;;  %7228 = vst.msk [vmem:[%s9046_s14 + $0x17a8] sm:$0xff] %vm6471_vm1, %v5235_v2  ;;  %v8569_v2 = vld [vmem:[%s12243_s0 + $0x1f8] sm:$0xff]  }
 0x1e0   : > { %v3667_v3 = vpop.f32.mrf.mxu0  ;;  %v5237_v4 = vpop.f32.mrf.mxu1 }
 0x1e1   : > { %6601 = vst [vmem:[%s9046_s14 + $0x410] sm:$0xff] %v3667_v3  ;;  %7229 = vst [vmem:[%s9046_s14 + $0x17b0] sm:$0xff] %v5237_v4  ;;  %v8570_v3 = vld [vmem:[%s12243_s0 + $0x6e0] sm:$0xff]  }
 0x1e2   : > { %v3669_v7 = vpop.f32.mrf.mxu0  ;;  %v5239_v8 = vpop.f32.mrf.mxu1 }
 0x1e3   : > { %6602 = vst.msk [vmem:[%s9046_s14 + $0x418] sm:$0xff] %vm6471_vm1, %v3669_v7  ;;  %7230 = vst.msk [vmem:[%s9046_s14 + $0x17b8] sm:$0xff] %vm6471_vm1, %v5239_v8 }
 0x1e4   : > { %v3673_v9 = vpop.f32.mrf.mxu0  ;;  %8159 = vmatmul.mubr.msk.bf16.gmra.mxu0 %vm2369_vm0, %v8557_v5  ;;  %v5243_v10 = vpop.f32.mrf.mxu1  ;;  %8316 = vmatmul.mubr.msk.bf16.gmra.mxu1 %vm2369_vm0, %v8558_v6 }
 0x1e5   : > { %6603 = vst [vmem:[%s9046_s14 + $0x420] sm:$0xff] %v3673_v9  ;;  %7231 = vst [vmem:[%s9046_s14 + $0x17c0] sm:$0xff] %v5243_v10  ;;  %3921 = vmatprep.mubr.bf16.mxu0 %v8764_v0  ;;  %5491 = vmatprep.mubr.bf16.mxu1 %v8764_v0 }
 0x1e6   : > { %v3675_v11 = vpop.f32.mrf.mxu0  ;;  %v5245_v12 = vpop.f32.mrf.mxu1 }
 0x1e7   : > { %6604 = vst.msk [vmem:[%s9046_s14 + $0x428] sm:$0xff] %vm6471_vm1, %v3675_v11  ;;  %7232 = vst.msk [vmem:[%s9046_s14 + $0x17c8] sm:$0xff] %vm6471_vm1, %v5245_v12  ;;  %v8571_v12 = vld [vmem:[%s12243_s0 + $0x200] sm:$0xff]  }
 0x1e8   : > { %v3677_v13 = vpop.f32.mrf.mxu0  ;;  %v5247_v14 = vpop.f32.mrf.mxu1 }
 0x1e9   : > { %6605 = vst [vmem:[%s9046_s14 + $0x430] sm:$0xff] %v3677_v13  ;;  %7233 = vst [vmem:[%s9046_s14 + $0x17d0] sm:$0xff] %v5247_v14  ;;  %v8572_v13 = vld [vmem:[%s12243_s0 + $0x6e8] sm:$0xff]  }
 0x1ea   : > { %v3679_v17 = vpop.f32.mrf.mxu0  ;;  %v5249_v18 = vpop.f32.mrf.mxu1 }
 0x1eb   : > { %6606 = vst.msk [vmem:[%s9046_s14 + $0x438] sm:$0xff] %vm6471_vm1, %v3679_v17  ;;  %7234 = vst.msk [vmem:[%s9046_s14 + $0x17d8] sm:$0xff] %vm6471_vm1, %v5249_v18 }
 0x1ec   : > { %v3683_v19 = vpop.f32.mrf.mxu0  ;;  %8160 = vmatmul.mubr.msk.bf16.gmra.mxu0 %vm2369_vm0, %v8559_v15  ;;  %v5253_v20 = vpop.f32.mrf.mxu1  ;;  %8317 = vmatmul.mubr.msk.bf16.gmra.mxu1 %vm2369_vm0, %v8560_v16 }
 0x1ed   : > { %6607 = vst [vmem:[%s9046_s14 + $0x440] sm:$0xff] %v3683_v19  ;;  %7235 = vst [vmem:[%s9046_s14 + $0x17e0] sm:$0xff] %v5253_v20  ;;  %3931 = vmatprep.mubr.bf16.mxu0 %v8764_v0  ;;  %5501 = vmatprep.mubr.bf16.mxu1 %v8764_v0 }
 0x1ee   : > { %v3685_v21 = vpop.f32.mrf.mxu0  ;;  %v5255_v22 = vpop.f32.mrf.mxu1 }
 0x1ef   : > { %6608 = vst.msk [vmem:[%s9046_s14 + $0x448] sm:$0xff] %vm6471_vm1, %v3685_v21  ;;  %7236 = vst.msk [vmem:[%s9046_s14 + $0x17e8] sm:$0xff] %vm6471_vm1, %v5255_v22  ;;  %v8573_v22 = vld [vmem:[%s12243_s0 + $0x208] sm:$0xff]  }
 0x1f0   : > { %v3687_v23 = vpop.f32.mrf.mxu0  ;;  %v5257_v24 = vpop.f32.mrf.mxu1 }
 0x1f1   : > { %6609 = vst [vmem:[%s9046_s14 + $0x450] sm:$0xff] %v3687_v23  ;;  %7237 = vst [vmem:[%s9046_s14 + $0x17f0] sm:$0xff] %v5257_v24  ;;  %v8574_v23 = vld [vmem:[%s12243_s0 + $0x6f0] sm:$0xff]  }
 0x1f2   : > { %v3689_v27 = vpop.f32.mrf.mxu0  ;;  %v5259_v28 = vpop.f32.mrf.mxu1 }
 0x1f3   : > { %6610 = vst.msk [vmem:[%s9046_s14 + $0x458] sm:$0xff] %vm6471_vm1, %v3689_v27  ;;  %7238 = vst.msk [vmem:[%s9046_s14 + $0x17f8] sm:$0xff] %vm6471_vm1, %v5259_v28 }
 0x1f4   : > { %v3693_v29 = vpop.f32.mrf.mxu0  ;;  %8161 = vmatmul.mubr.msk.bf16.gmra.mxu0 %vm2369_vm0, %v8561_v25  ;;  %v5263_v30 = vpop.f32.mrf.mxu1  ;;  %8318 = vmatmul.mubr.msk.bf16.gmra.mxu1 %vm2369_vm0, %v8562_v26 }
 0x1f5   : > { %6611 = vst [vmem:[%s9046_s14 + $0x460] sm:$0xff] %v3693_v29  ;;  %7239 = vst [vmem:[%s9046_s14 + $0x1800] sm:$0xff] %v5263_v30  ;;  %3941 = vmatprep.mubr.bf16.mxu0 %v8764_v0  ;;  %5511 = vmatprep.mubr.bf16.mxu1 %v8764_v0 }
 0x1f6   : > { %v3695_v31 = vpop.f32.mrf.mxu0  ;;  %v5265_v32 = vpop.f32.mrf.mxu1 }
 0x1f7   : > { %6612 = vst.msk [vmem:[%s9046_s14 + $0x468] sm:$0xff] %vm6471_vm1, %v3695_v31  ;;  %7240 = vst.msk [vmem:[%s9046_s14 + $0x1808] sm:$0xff] %vm6471_vm1, %v5265_v32  ;;  %v8575_v32 = vld [vmem:[%s12243_s0 + $0x210] sm:$0xff]  }
 0x1f8   : > { %v3697_v33 = vpop.f32.mrf.mxu0  ;;  %v5267_v34 = vpop.f32.mrf.mxu1 }
 0x1f9   : > { %6613 = vst [vmem:[%s9046_s14 + $0x470] sm:$0xff] %v3697_v33  ;;  %7241 = vst [vmem:[%s9046_s14 + $0x1810] sm:$0xff] %v5267_v34  ;;  %v8576_v33 = vld [vmem:[%s12243_s0 + $0x6f8] sm:$0xff]  }
 0x1fa   : > { %v3699_v37 = vpop.f32.mrf.mxu0  ;;  %v5269_v38 = vpop.f32.mrf.mxu1 }
 0x1fb   : > { %6614 = vst.msk [vmem:[%s9046_s14 + $0x478] sm:$0xff] %vm6471_vm1, %v3699_v37  ;;  %7242 = vst.msk [vmem:[%s9046_s14 + $0x1818] sm:$0xff] %vm6471_vm1, %v5269_v38 }
 0x1fc   : > { %v3703_v39 = vpop.f32.mrf.mxu0  ;;  %8162 = vmatmul.mubr.msk.bf16.gmra.mxu0 %vm2369_vm0, %v8563_v35  ;;  %v5273_v40 = vpop.f32.mrf.mxu1  ;;  %8319 = vmatmul.mubr.msk.bf16.gmra.mxu1 %vm2369_vm0, %v8564_v36 }
 0x1fd   : > { %6615 = vst [vmem:[%s9046_s14 + $0x480] sm:$0xff] %v3703_v39  ;;  %7243 = vst [vmem:[%s9046_s14 + $0x1820] sm:$0xff] %v5273_v40  ;;  %3951 = vmatprep.mubr.bf16.mxu0 %v8764_v0  ;;  %5521 = vmatprep.mubr.bf16.mxu1 %v8764_v0 }
 0x1fe   : > { %v3705_v41 = vpop.f32.mrf.mxu0  ;;  %v5275_v42 = vpop.f32.mrf.mxu1 }
 0x1ff   : > { %6616 = vst.msk [vmem:[%s9046_s14 + $0x488] sm:$0xff] %vm6471_vm1, %v3705_v41  ;;  %7244 = vst.msk [vmem:[%s9046_s14 + $0x1828] sm:$0xff] %vm6471_vm1, %v5275_v42  ;;  %v8577_v42 = vld [vmem:[%s12243_s0 + $0x218] sm:$0xff]  }
 0x200   : > { %v3707_v43 = vpop.f32.mrf.mxu0  ;;  %v5277_v44 = vpop.f32.mrf.mxu1 }
 0x201   : > { %6617 = vst [vmem:[%s9046_s14 + $0x490] sm:$0xff] %v3707_v43  ;;  %7245 = vst [vmem:[%s9046_s14 + $0x1830] sm:$0xff] %v5277_v44  ;;  %v8578_v43 = vld [vmem:[%s12243_s0 + $0x700] sm:$0xff]  }
 0x202   : > { %v3709_v47 = vpop.f32.mrf.mxu0  ;;  %v5279_v48 = vpop.f32.mrf.mxu1 }
 0x203   : > { %6618 = vst.msk [vmem:[%s9046_s14 + $0x498] sm:$0xff] %vm6471_vm1, %v3709_v47  ;;  %7246 = vst.msk [vmem:[%s9046_s14 + $0x1838] sm:$0xff] %vm6471_vm1, %v5279_v48 }
 0x204   : > { %v3713_v49 = vpop.f32.mrf.mxu0  ;;  %8163 = vmatmul.mubr.msk.bf16.gmra.mxu0 %vm2369_vm0, %v8565_v45  ;;  %v5283_v50 = vpop.f32.mrf.mxu1  ;;  %8320 = vmatmul.mubr.msk.bf16.gmra.mxu1 %vm2369_vm0, %v8566_v46 }
 0x205   : > { %6619 = vst [vmem:[%s9046_s14 + $0x4a0] sm:$0xff] %v3713_v49  ;;  %7247 = vst [vmem:[%s9046_s14 + $0x1840] sm:$0xff] %v5283_v50  ;;  %3961 = vmatprep.mubr.bf16.mxu0 %v8764_v0  ;;  %5531 = vmatprep.mubr.bf16.mxu1 %v8764_v0 }
 0x206   : > { %v3715_v51 = vpop.f32.mrf.mxu0  ;;  %v5285_v52 = vpop.f32.mrf.mxu1 }
 0x207   : > { %6620 = vst.msk [vmem:[%s9046_s14 + $0x4a8] sm:$0xff] %vm6471_vm1, %v3715_v51  ;;  %7248 = vst.msk [vmem:[%s9046_s14 + $0x1848] sm:$0xff] %vm6471_vm1, %v5285_v52  ;;  %v8579_v52 = vld [vmem:[%s12243_s0 + $0x220] sm:$0xff]  }
 0x208   : > { %v3717_v53 = vpop.f32.mrf.mxu0  ;;  %v5287_v54 = vpop.f32.mrf.mxu1 }
 0x209   : > { %6621 = vst [vmem:[%s9046_s14 + $0x4b0] sm:$0xff] %v3717_v53  ;;  %7249 = vst [vmem:[%s9046_s14 + $0x1850] sm:$0xff] %v5287_v54  ;;  %v8580_v53 = vld [vmem:[%s12243_s0 + $0x708] sm:$0xff]  }
 0x20a   : > { %v3719_v57 = vpop.f32.mrf.mxu0  ;;  %v5289_v58 = vpop.f32.mrf.mxu1 }
 0x20b   : > { %6622 = vst.msk [vmem:[%s9046_s14 + $0x4b8] sm:$0xff] %vm6471_vm1, %v3719_v57  ;;  %7250 = vst.msk [vmem:[%s9046_s14 + $0x1858] sm:$0xff] %vm6471_vm1, %v5289_v58 }
 0x20c   : > { %v3723_v59 = vpop.f32.mrf.mxu0  ;;  %8164 = vmatmul.mubr.msk.bf16.gmra.mxu0 %vm2369_vm0, %v8567_v55  ;;  %v5293_v60 = vpop.f32.mrf.mxu1  ;;  %8321 = vmatmul.mubr.msk.bf16.gmra.mxu1 %vm2369_vm0, %v8568_v56 }
 0x20d   : > { %6623 = vst [vmem:[%s9046_s14 + $0x4c0] sm:$0xff] %v3723_v59  ;;  %7251 = vst [vmem:[%s9046_s14 + $0x1860] sm:$0xff] %v5293_v60  ;;  %3971 = vmatprep.mubr.bf16.mxu0 %v8764_v0  ;;  %5541 = vmatprep.mubr.bf16.mxu1 %v8764_v0 }
 0x20e   : > { %v3725_v61 = vpop.f32.mrf.mxu0  ;;  %v5295_v62 = vpop.f32.mrf.mxu1 }
 0x20f   : > { %6624 = vst.msk [vmem:[%s9046_s14 + $0x4c8] sm:$0xff] %vm6471_vm1, %v3725_v61  ;;  %7252 = vst.msk [vmem:[%s9046_s14 + $0x1868] sm:$0xff] %vm6471_vm1, %v5295_v62  ;;  %v8581_v62 = vld [vmem:[%s12243_s0 + $0x228] sm:$0xff]  }
 0x210   : > { %v3727_v63 = vpop.f32.mrf.mxu0  ;;  %v5297_v1 = vpop.f32.mrf.mxu1 }
 0x211   : > { %6625 = vst [vmem:[%s9046_s14 + $0x4d0] sm:$0xff] %v3727_v63  ;;  %7253 = vst [vmem:[%s9046_s14 + $0x1870] sm:$0xff] %v5297_v1  ;;  %v8582_v63 = vld [vmem:[%s12243_s0 + $0x710] sm:$0xff]  }
 0x212   : > { %v3729_v4 = vpop.f32.mrf.mxu0  ;;  %v5299_v5 = vpop.f32.mrf.mxu1 }
 0x213   : > { %6626 = vst.msk [vmem:[%s9046_s14 + $0x4d8] sm:$0xff] %vm6471_vm1, %v3729_v4  ;;  %7254 = vst.msk [vmem:[%s9046_s14 + $0x1878] sm:$0xff] %vm6471_vm1, %v5299_v5 }
 0x214   : > { %v3733_v6 = vpop.f32.mrf.mxu0  ;;  %8165 = vmatmul.mubr.msk.bf16.gmra.mxu0 %vm2369_vm0, %v8569_v2  ;;  %v5303_v7 = vpop.f32.mrf.mxu1  ;;  %8322 = vmatmul.mubr.msk.bf16.gmra.mxu1 %vm2369_vm0, %v8570_v3 }
 0x215   : > { %6627 = vst [vmem:[%s9046_s14 + $0x4e0] sm:$0xff] %v3733_v6  ;;  %7255 = vst [vmem:[%s9046_s14 + $0x1880] sm:$0xff] %v5303_v7  ;;  %3981 = vmatprep.mubr.bf16.mxu0 %v8764_v0  ;;  %5551 = vmatprep.mubr.bf16.mxu1 %v8764_v0 }
 0x216   : > { %v3735_v8 = vpop.f32.mrf.mxu0  ;;  %v5305_v9 = vpop.f32.mrf.mxu1 }
 0x217   : > { %6628 = vst.msk [vmem:[%s9046_s14 + $0x4e8] sm:$0xff] %vm6471_vm1, %v3735_v8  ;;  %7256 = vst.msk [vmem:[%s9046_s14 + $0x1888] sm:$0xff] %vm6471_vm1, %v5305_v9  ;;  %v8583_v9 = vld [vmem:[%s12243_s0 + $0x230] sm:$0xff]  }
 0x218   : > { %v3737_v10 = vpop.f32.mrf.mxu0  ;;  %v5307_v11 = vpop.f32.mrf.mxu1 }
 0x219   : > { %6629 = vst [vmem:[%s9046_s14 + $0x4f0] sm:$0xff] %v3737_v10  ;;  %7257 = vst [vmem:[%s9046_s14 + $0x1890] sm:$0xff] %v5307_v11  ;;  %v8584_v10 = vld [vmem:[%s12243_s0 + $0x718] sm:$0xff]  }
 0x21a   : > { %v3739_v14 = vpop.f32.mrf.mxu0  ;;  %v5309_v15 = vpop.f32.mrf.mxu1 }
 0x21b   : > { %6630 = vst.msk [vmem:[%s9046_s14 + $0x4f8] sm:$0xff] %vm6471_vm1, %v3739_v14  ;;  %7258 = vst.msk [vmem:[%s9046_s14 + $0x1898] sm:$0xff] %vm6471_vm1, %v5309_v15 }
 0x21c   : > { %v3743_v16 = vpop.f32.mrf.mxu0  ;;  %8166 = vmatmul.mubr.msk.bf16.gmra.mxu0 %vm2369_vm0, %v8571_v12  ;;  %v5313_v17 = vpop.f32.mrf.mxu1  ;;  %8323 = vmatmul.mubr.msk.bf16.gmra.mxu1 %vm2369_vm0, %v8572_v13 }
 0x21d   : > { %6631 = vst [vmem:[%s9046_s14 + $0x500] sm:$0xff] %v3743_v16  ;;  %7259 = vst [vmem:[%s9046_s14 + $0x18a0] sm:$0xff] %v5313_v17  ;;  %3991 = vmatprep.mubr.bf16.mxu0 %v8764_v0  ;;  %5561 = vmatprep.mubr.bf16.mxu1 %v8764_v0 }
 0x21e   : > { %v3745_v18 = vpop.f32.mrf.mxu0  ;;  %v5315_v19 = vpop.f32.mrf.mxu1 }
 0x21f   : > { %6632 = vst.msk [vmem:[%s9046_s14 + $0x508] sm:$0xff] %vm6471_vm1, %v3745_v18  ;;  %7260 = vst.msk [vmem:[%s9046_s14 + $0x18a8] sm:$0xff] %vm6471_vm1, %v5315_v19  ;;  %v8585_v19 = vld [vmem:[%s12243_s0 + $0x238] sm:$0xff]  }
 0x220   : > { %v3747_v20 = vpop.f32.mrf.mxu0  ;;  %v5317_v21 = vpop.f32.mrf.mxu1 }
 0x221   : > { %6633 = vst [vmem:[%s9046_s14 + $0x510] sm:$0xff] %v3747_v20  ;;  %7261 = vst [vmem:[%s9046_s14 + $0x18b0] sm:$0xff] %v5317_v21  ;;  %v8586_v20 = vld [vmem:[%s12243_s0 + $0x720] sm:$0xff]  }
 0x222   : > { %v3749_v24 = vpop.f32.mrf.mxu0  ;;  %v5319_v25 = vpop.f32.mrf.mxu1 }
 0x223   : > { %6634 = vst.msk [vmem:[%s9046_s14 + $0x518] sm:$0xff] %vm6471_vm1, %v3749_v24  ;;  %7262 = vst.msk [vmem:[%s9046_s14 + $0x18b8] sm:$0xff] %vm6471_vm1, %v5319_v25 }
 0x224   : > { %v3753_v26 = vpop.f32.mrf.mxu0  ;;  %8167 = vmatmul.mubr.msk.bf16.gmra.mxu0 %vm2369_vm0, %v8573_v22  ;;  %v5323_v27 = vpop.f32.mrf.mxu1  ;;  %8324 = vmatmul.mubr.msk.bf16.gmra.mxu1 %vm2369_vm0, %v8574_v23 }
 0x225   : > { %6635 = vst [vmem:[%s9046_s14 + $0x520] sm:$0xff] %v3753_v26  ;;  %7263 = vst [vmem:[%s9046_s14 + $0x18c0] sm:$0xff] %v5323_v27  ;;  %4001 = vmatprep.mubr.bf16.mxu0 %v8764_v0  ;;  %5571 = vmatprep.mubr.bf16.mxu1 %v8764_v0 }
 0x226   : > { %v3755_v28 = vpop.f32.mrf.mxu0  ;;  %v5325_v29 = vpop.f32.mrf.mxu1 }
 0x227   : > { %6636 = vst.msk [vmem:[%s9046_s14 + $0x528] sm:$0xff] %vm6471_vm1, %v3755_v28  ;;  %7264 = vst.msk [vmem:[%s9046_s14 + $0x18c8] sm:$0xff] %vm6471_vm1, %v5325_v29  ;;  %v8587_v29 = vld [vmem:[%s12243_s0 + $0x240] sm:$0xff]  }
 0x228   : > { %v3757_v30 = vpop.f32.mrf.mxu0  ;;  %v5327_v31 = vpop.f32.mrf.mxu1 }
 0x229   : > { %6637 = vst [vmem:[%s9046_s14 + $0x530] sm:$0xff] %v3757_v30  ;;  %7265 = vst [vmem:[%s9046_s14 + $0x18d0] sm:$0xff] %v5327_v31  ;;  %v8588_v30 = vld [vmem:[%s12243_s0 + $0x728] sm:$0xff]  }
 0x22a   : > { %v3759_v34 = vpop.f32.mrf.mxu0  ;;  %v5329_v35 = vpop.f32.mrf.mxu1 }
 0x22b   : > { %6638 = vst.msk [vmem:[%s9046_s14 + $0x538] sm:$0xff] %vm6471_vm1, %v3759_v34  ;;  %7266 = vst.msk [vmem:[%s9046_s14 + $0x18d8] sm:$0xff] %vm6471_vm1, %v5329_v35 }
 0x22c   : > { %v3763_v36 = vpop.f32.mrf.mxu0  ;;  %8168 = vmatmul.mubr.msk.bf16.gmra.mxu0 %vm2369_vm0, %v8575_v32  ;;  %v5333_v37 = vpop.f32.mrf.mxu1  ;;  %8325 = vmatmul.mubr.msk.bf16.gmra.mxu1 %vm2369_vm0, %v8576_v33 }
 0x22d   : > { %6639 = vst [vmem:[%s9046_s14 + $0x540] sm:$0xff] %v3763_v36  ;;  %7267 = vst [vmem:[%s9046_s14 + $0x18e0] sm:$0xff] %v5333_v37  ;;  %4011 = vmatprep.mubr.bf16.mxu0 %v8764_v0  ;;  %5581 = vmatprep.mubr.bf16.mxu1 %v8764_v0 }
 0x22e   : > { %v3765_v38 = vpop.f32.mrf.mxu0  ;;  %v5335_v39 = vpop.f32.mrf.mxu1 }
 0x22f   : > { %6640 = vst.msk [vmem:[%s9046_s14 + $0x548] sm:$0xff] %vm6471_vm1, %v3765_v38  ;;  %7268 = vst.msk [vmem:[%s9046_s14 + $0x18e8] sm:$0xff] %vm6471_vm1, %v5335_v39  ;;  %v8589_v39 = vld [vmem:[%s12243_s0 + $0x248] sm:$0xff]  }
 0x230   : > { %v3767_v40 = vpop.f32.mrf.mxu0  ;;  %v5337_v41 = vpop.f32.mrf.mxu1 }
 0x231   : > { %6641 = vst [vmem:[%s9046_s14 + $0x550] sm:$0xff] %v3767_v40  ;;  %7269 = vst [vmem:[%s9046_s14 + $0x18f0] sm:$0xff] %v5337_v41  ;;  %v8590_v40 = vld [vmem:[%s12243_s0 + $0x730] sm:$0xff]  }
 0x232   : > { %v3769_v44 = vpop.f32.mrf.mxu0  ;;  %v5339_v45 = vpop.f32.mrf.mxu1 }
 0x233   : > { %6642 = vst.msk [vmem:[%s9046_s14 + $0x558] sm:$0xff] %vm6471_vm1, %v3769_v44  ;;  %7270 = vst.msk [vmem:[%s9046_s14 + $0x18f8] sm:$0xff] %vm6471_vm1, %v5339_v45 }
 0x234   : > { %v3773_v46 = vpop.f32.mrf.mxu0  ;;  %8169 = vmatmul.mubr.msk.bf16.gmra.mxu0 %vm2369_vm0, %v8577_v42  ;;  %v5343_v47 = vpop.f32.mrf.mxu1  ;;  %8326 = vmatmul.mubr.msk.bf16.gmra.mxu1 %vm2369_vm0, %v8578_v43 }
 0x235   : > { %6643 = vst [vmem:[%s9046_s14 + $0x560] sm:$0xff] %v3773_v46  ;;  %7271 = vst [vmem:[%s9046_s14 + $0x1900] sm:$0xff] %v5343_v47  ;;  %4021 = vmatprep.mubr.bf16.mxu0 %v8764_v0  ;;  %5591 = vmatprep.mubr.bf16.mxu1 %v8764_v0 }
 0x236   : > { %v3775_v48 = vpop.f32.mrf.mxu0  ;;  %v5345_v49 = vpop.f32.mrf.mxu1 }
 0x237   : > { %6644 = vst.msk [vmem:[%s9046_s14 + $0x568] sm:$0xff] %vm6471_vm1, %v3775_v48  ;;  %7272 = vst.msk [vmem:[%s9046_s14 + $0x1908] sm:$0xff] %vm6471_vm1, %v5345_v49  ;;  %v8591_v49 = vld [vmem:[%s12243_s0 + $0x250] sm:$0xff]  }
 0x238   : > { %v3777_v50 = vpop.f32.mrf.mxu0  ;;  %v5347_v51 = vpop.f32.mrf.mxu1 }
 0x239   : > { %6645 = vst [vmem:[%s9046_s14 + $0x570] sm:$0xff] %v3777_v50  ;;  %7273 = vst [vmem:[%s9046_s14 + $0x1910] sm:$0xff] %v5347_v51  ;;  %v8592_v50 = vld [vmem:[%s12243_s0 + $0x738] sm:$0xff]  }
 0x23a   : > { %v3779_v54 = vpop.f32.mrf.mxu0  ;;  %v5349_v55 = vpop.f32.mrf.mxu1 }
 0x23b   : > { %6646 = vst.msk [vmem:[%s9046_s14 + $0x578] sm:$0xff] %vm6471_vm1, %v3779_v54  ;;  %7274 = vst.msk [vmem:[%s9046_s14 + $0x1918] sm:$0xff] %vm6471_vm1, %v5349_v55 }
 0x23c   : > { %v3783_v56 = vpop.f32.mrf.mxu0  ;;  %8170 = vmatmul.mubr.msk.bf16.gmra.mxu0 %vm2369_vm0, %v8579_v52  ;;  %v5353_v57 = vpop.f32.mrf.mxu1  ;;  %8327 = vmatmul.mubr.msk.bf16.gmra.mxu1 %vm2369_vm0, %v8580_v53 }
 0x23d   : > { %6647 = vst [vmem:[%s9046_s14 + $0x580] sm:$0xff] %v3783_v56  ;;  %7275 = vst [vmem:[%s9046_s14 + $0x1920] sm:$0xff] %v5353_v57  ;;  %4031 = vmatprep.mubr.bf16.mxu0 %v8764_v0  ;;  %5601 = vmatprep.mubr.bf16.mxu1 %v8764_v0 }
 0x23e   : > { %v3785_v58 = vpop.f32.mrf.mxu0  ;;  %v5355_v59 = vpop.f32.mrf.mxu1 }
 0x23f   : > { %6648 = vst.msk [vmem:[%s9046_s14 + $0x588] sm:$0xff] %vm6471_vm1, %v3785_v58  ;;  %7276 = vst.msk [vmem:[%s9046_s14 + $0x1928] sm:$0xff] %vm6471_vm1, %v5355_v59  ;;  %v8593_v59 = vld [vmem:[%s12243_s0 + $0x258] sm:$0xff]  }
 0x240   : > { %v3787_v60 = vpop.f32.mrf.mxu0  ;;  %v5357_v61 = vpop.f32.mrf.mxu1 }
 0x241   : > { %6649 = vst [vmem:[%s9046_s14 + $0x590] sm:$0xff] %v3787_v60  ;;  %7277 = vst [vmem:[%s9046_s14 + $0x1930] sm:$0xff] %v5357_v61  ;;  %v8594_v60 = vld [vmem:[%s12243_s0 + $0x740] sm:$0xff]  }
 0x242   : > { %v3789_v1 = vpop.f32.mrf.mxu0  ;;  %v5359_v2 = vpop.f32.mrf.mxu1 }
 0x243   : > { %6650 = vst.msk [vmem:[%s9046_s14 + $0x598] sm:$0xff] %vm6471_vm1, %v3789_v1  ;;  %7278 = vst.msk [vmem:[%s9046_s14 + $0x1938] sm:$0xff] %vm6471_vm1, %v5359_v2 }
 0x244   : > { %v3793_v3 = vpop.f32.mrf.mxu0  ;;  %8171 = vmatmul.mubr.msk.bf16.gmra.mxu0 %vm2369_vm0, %v8581_v62  ;;  %v5363_v4 = vpop.f32.mrf.mxu1  ;;  %8328 = vmatmul.mubr.msk.bf16.gmra.mxu1 %vm2369_vm0, %v8582_v63 }
 0x245   : > { %6651 = vst [vmem:[%s9046_s14 + $0x5a0] sm:$0xff] %v3793_v3  ;;  %7279 = vst [vmem:[%s9046_s14 + $0x1940] sm:$0xff] %v5363_v4  ;;  %4041 = vmatprep.mubr.bf16.mxu0 %v8764_v0  ;;  %5611 = vmatprep.mubr.bf16.mxu1 %v8764_v0 }
 0x246   : > { %v3795_v5 = vpop.f32.mrf.mxu0  ;;  %v5365_v6 = vpop.f32.mrf.mxu1 }
 0x247   : > { %6652 = vst.msk [vmem:[%s9046_s14 + $0x5a8] sm:$0xff] %vm6471_vm1, %v3795_v5  ;;  %7280 = vst.msk [vmem:[%s9046_s14 + $0x1948] sm:$0xff] %vm6471_vm1, %v5365_v6  ;;  %v8595_v6 = vld [vmem:[%s12243_s0 + $0x260] sm:$0xff]  }
 0x248   : > { %v3797_v7 = vpop.f32.mrf.mxu0  ;;  %v5367_v8 = vpop.f32.mrf.mxu1 }
 0x249   : > { %6653 = vst [vmem:[%s9046_s14 + $0x5b0] sm:$0xff] %v3797_v7  ;;  %7281 = vst [vmem:[%s9046_s14 + $0x1950] sm:$0xff] %v5367_v8  ;;  %v8596_v7 = vld [vmem:[%s12243_s0 + $0x748] sm:$0xff]  }
 0x24a   : > { %v3799_v11 = vpop.f32.mrf.mxu0  ;;  %v5369_v12 = vpop.f32.mrf.mxu1 }
 0x24b   : > { %6654 = vst.msk [vmem:[%s9046_s14 + $0x5b8] sm:$0xff] %vm6471_vm1, %v3799_v11  ;;  %7282 = vst.msk [vmem:[%s9046_s14 + $0x1958] sm:$0xff] %vm6471_vm1, %v5369_v12 }
 0x24c   : > { %v3803_v13 = vpop.f32.mrf.mxu0  ;;  %8172 = vmatmul.mubr.msk.bf16.gmra.mxu0 %vm2369_vm0, %v8583_v9  ;;  %v5373_v14 = vpop.f32.mrf.mxu1  ;;  %8329 = vmatmul.mubr.msk.bf16.gmra.mxu1 %vm2369_vm0, %v8584_v10 }
 0x24d   : > { %6655 = vst [vmem:[%s9046_s14 + $0x5c0] sm:$0xff] %v3803_v13  ;;  %7283 = vst [vmem:[%s9046_s14 + $0x1960] sm:$0xff] %v5373_v14  ;;  %4051 = vmatprep.mubr.bf16.mxu0 %v8764_v0  ;;  %5621 = vmatprep.mubr.bf16.mxu1 %v8764_v0 }
 0x24e   : > { %v3805_v15 = vpop.f32.mrf.mxu0  ;;  %v5375_v16 = vpop.f32.mrf.mxu1 }
 0x24f   : > { %6656 = vst.msk [vmem:[%s9046_s14 + $0x5c8] sm:$0xff] %vm6471_vm1, %v3805_v15  ;;  %7284 = vst.msk [vmem:[%s9046_s14 + $0x1968] sm:$0xff] %vm6471_vm1, %v5375_v16  ;;  %v8597_v16 = vld [vmem:[%s12243_s0 + $0x268] sm:$0xff]  }
 0x250   : > { %v3807_v17 = vpop.f32.mrf.mxu0  ;;  %v5377_v18 = vpop.f32.mrf.mxu1 }
 0x251   : > { %6657 = vst [vmem:[%s9046_s14 + $0x5d0] sm:$0xff] %v3807_v17  ;;  %7285 = vst [vmem:[%s9046_s14 + $0x1970] sm:$0xff] %v5377_v18  ;;  %v8598_v17 = vld [vmem:[%s12243_s0 + $0x750] sm:$0xff]  }
 0x252   : > { %v3809_v21 = vpop.f32.mrf.mxu0  ;;  %v5379_v22 = vpop.f32.mrf.mxu1 }
 0x253   : > { %6658 = vst.msk [vmem:[%s9046_s14 + $0x5d8] sm:$0xff] %vm6471_vm1, %v3809_v21  ;;  %7286 = vst.msk [vmem:[%s9046_s14 + $0x1978] sm:$0xff] %vm6471_vm1, %v5379_v22 }
 0x254   : > { %v3813_v23 = vpop.f32.mrf.mxu0  ;;  %8173 = vmatmul.mubr.msk.bf16.gmra.mxu0 %vm2369_vm0, %v8585_v19  ;;  %v5383_v24 = vpop.f32.mrf.mxu1  ;;  %8330 = vmatmul.mubr.msk.bf16.gmra.mxu1 %vm2369_vm0, %v8586_v20 }
 0x255   : > { %6659 = vst [vmem:[%s9046_s14 + $0x5e0] sm:$0xff] %v3813_v23  ;;  %7287 = vst [vmem:[%s9046_s14 + $0x1980] sm:$0xff] %v5383_v24  ;;  %4061 = vmatprep.mubr.bf16.mxu0 %v8764_v0  ;;  %5631 = vmatprep.mubr.bf16.mxu1 %v8764_v0 }
 0x256   : > { %v3815_v25 = vpop.f32.mrf.mxu0  ;;  %v5385_v26 = vpop.f32.mrf.mxu1 }
 0x257   : > { %6660 = vst.msk [vmem:[%s9046_s14 + $0x5e8] sm:$0xff] %vm6471_vm1, %v3815_v25  ;;  %7288 = vst.msk [vmem:[%s9046_s14 + $0x1988] sm:$0xff] %vm6471_vm1, %v5385_v26  ;;  %v8599_v26 = vld [vmem:[%s12243_s0 + $0x270] sm:$0xff]  }
 0x258   : > { %v3817_v27 = vpop.f32.mrf.mxu0  ;;  %v5387_v28 = vpop.f32.mrf.mxu1 }
 0x259   : > { %6661 = vst [vmem:[%s9046_s14 + $0x5f0] sm:$0xff] %v3817_v27  ;;  %7289 = vst [vmem:[%s9046_s14 + $0x1990] sm:$0xff] %v5387_v28  ;;  %v8600_v27 = vld [vmem:[%s12243_s0 + $0x758] sm:$0xff]  }
 0x25a   : > { %v3819_v31 = vpop.f32.mrf.mxu0  ;;  %v5389_v32 = vpop.f32.mrf.mxu1 }
 0x25b   : > { %6662 = vst.msk [vmem:[%s9046_s14 + $0x5f8] sm:$0xff] %vm6471_vm1, %v3819_v31  ;;  %7290 = vst.msk [vmem:[%s9046_s14 + $0x1998] sm:$0xff] %vm6471_vm1, %v5389_v32 }
 0x25c   : > { %v3823_v33 = vpop.f32.mrf.mxu0  ;;  %8174 = vmatmul.mubr.msk.bf16.gmra.mxu0 %vm2369_vm0, %v8587_v29  ;;  %v5393_v34 = vpop.f32.mrf.mxu1  ;;  %8331 = vmatmul.mubr.msk.bf16.gmra.mxu1 %vm2369_vm0, %v8588_v30 }
 0x25d   : > { %6663 = vst [vmem:[%s9046_s14 + $0x600] sm:$0xff] %v3823_v33  ;;  %7291 = vst [vmem:[%s9046_s14 + $0x19a0] sm:$0xff] %v5393_v34  ;;  %4071 = vmatprep.mubr.bf16.mxu0 %v8764_v0  ;;  %5641 = vmatprep.mubr.bf16.mxu1 %v8764_v0 }
 0x25e   : > { %v3825_v35 = vpop.f32.mrf.mxu0  ;;  %v5395_v36 = vpop.f32.mrf.mxu1 }
 0x25f   : > { %6664 = vst.msk [vmem:[%s9046_s14 + $0x608] sm:$0xff] %vm6471_vm1, %v3825_v35  ;;  %7292 = vst.msk [vmem:[%s9046_s14 + $0x19a8] sm:$0xff] %vm6471_vm1, %v5395_v36  ;;  %v8601_v36 = vld [vmem:[%s12243_s0 + $0x278] sm:$0xff]  }
 0x260   : > { %v3827_v37 = vpop.f32.mrf.mxu0  ;;  %v5397_v38 = vpop.f32.mrf.mxu1 }
 0x261   : > { %6665 = vst [vmem:[%s9046_s14 + $0x610] sm:$0xff] %v3827_v37  ;;  %7293 = vst [vmem:[%s9046_s14 + $0x19b0] sm:$0xff] %v5397_v38  ;;  %v8602_v37 = vld [vmem:[%s12243_s0 + $0x760] sm:$0xff]  }
 0x262   : > { %v3829_v41 = vpop.f32.mrf.mxu0  ;;  %v5399_v42 = vpop.f32.mrf.mxu1 }
 0x263   : > { %6666 = vst.msk [vmem:[%s9046_s14 + $0x618] sm:$0xff] %vm6471_vm1, %v3829_v41  ;;  %7294 = vst.msk [vmem:[%s9046_s14 + $0x19b8] sm:$0xff] %vm6471_vm1, %v5399_v42 }
 0x264   : > { %v3833_v43 = vpop.f32.mrf.mxu0  ;;  %8175 = vmatmul.mubr.msk.bf16.gmra.mxu0 %vm2369_vm0, %v8589_v39  ;;  %v5403_v44 = vpop.f32.mrf.mxu1  ;;  %8332 = vmatmul.mubr.msk.bf16.gmra.mxu1 %vm2369_vm0, %v8590_v40 }
 0x265   : > { %6667 = vst [vmem:[%s9046_s14 + $0x620] sm:$0xff] %v3833_v43  ;;  %7295 = vst [vmem:[%s9046_s14 + $0x19c0] sm:$0xff] %v5403_v44  ;;  %4081 = vmatprep.mubr.bf16.mxu0 %v8764_v0  ;;  %5651 = vmatprep.mubr.bf16.mxu1 %v8764_v0 }
 0x266   : > { %v3835_v45 = vpop.f32.mrf.mxu0  ;;  %v5405_v46 = vpop.f32.mrf.mxu1 }
 0x267   : > { %6668 = vst.msk [vmem:[%s9046_s14 + $0x628] sm:$0xff] %vm6471_vm1, %v3835_v45  ;;  %7296 = vst.msk [vmem:[%s9046_s14 + $0x19c8] sm:$0xff] %vm6471_vm1, %v5405_v46  ;;  %v8603_v46 = vld [vmem:[%s12243_s0 + $0x280] sm:$0xff]  }
 0x268   : > { %v3837_v47 = vpop.f32.mrf.mxu0  ;;  %v5407_v48 = vpop.f32.mrf.mxu1 }
 0x269   : > { %6669 = vst [vmem:[%s9046_s14 + $0x630] sm:$0xff] %v3837_v47  ;;  %7297 = vst [vmem:[%s9046_s14 + $0x19d0] sm:$0xff] %v5407_v48  ;;  %v8604_v47 = vld [vmem:[%s12243_s0 + $0x768] sm:$0xff]  }
 0x26a   : > { %v3839_v51 = vpop.f32.mrf.mxu0  ;;  %v5409_v52 = vpop.f32.mrf.mxu1 }
 0x26b   : > { %6670 = vst.msk [vmem:[%s9046_s14 + $0x638] sm:$0xff] %vm6471_vm1, %v3839_v51  ;;  %7298 = vst.msk [vmem:[%s9046_s14 + $0x19d8] sm:$0xff] %vm6471_vm1, %v5409_v52 }
 0x26c   : > { %v3843_v53 = vpop.f32.mrf.mxu0  ;;  %8176 = vmatmul.mubr.msk.bf16.gmra.mxu0 %vm2369_vm0, %v8591_v49  ;;  %v5413_v54 = vpop.f32.mrf.mxu1  ;;  %8333 = vmatmul.mubr.msk.bf16.gmra.mxu1 %vm2369_vm0, %v8592_v50 }
 0x26d   : > { %6671 = vst [vmem:[%s9046_s14 + $0x640] sm:$0xff] %v3843_v53  ;;  %7299 = vst [vmem:[%s9046_s14 + $0x19e0] sm:$0xff] %v5413_v54  ;;  %4091 = vmatprep.mubr.bf16.mxu0 %v8764_v0  ;;  %5661 = vmatprep.mubr.bf16.mxu1 %v8764_v0 }
 0x26e   : > { %v3845_v55 = vpop.f32.mrf.mxu0  ;;  %v5415_v56 = vpop.f32.mrf.mxu1 }
 0x26f   : > { %6672 = vst.msk [vmem:[%s9046_s14 + $0x648] sm:$0xff] %vm6471_vm1, %v3845_v55  ;;  %7300 = vst.msk [vmem:[%s9046_s14 + $0x19e8] sm:$0xff] %vm6471_vm1, %v5415_v56  ;;  %v8605_v56 = vld [vmem:[%s12243_s0 + $0x288] sm:$0xff]  }
 0x270   : > { %v3847_v57 = vpop.f32.mrf.mxu0  ;;  %v5417_v58 = vpop.f32.mrf.mxu1 }
 0x271   : > { %6673 = vst [vmem:[%s9046_s14 + $0x650] sm:$0xff] %v3847_v57  ;;  %7301 = vst [vmem:[%s9046_s14 + $0x19f0] sm:$0xff] %v5417_v58  ;;  %v8606_v57 = vld [vmem:[%s12243_s0 + $0x770] sm:$0xff]  }
 0x272   : > { %v3849_v61 = vpop.f32.mrf.mxu0  ;;  %v5419_v62 = vpop.f32.mrf.mxu1 }
 0x273   : > { %6674 = vst.msk [vmem:[%s9046_s14 + $0x658] sm:$0xff] %vm6471_vm1, %v3849_v61  ;;  %7302 = vst.msk [vmem:[%s9046_s14 + $0x19f8] sm:$0xff] %vm6471_vm1, %v5419_v62 }
 0x274   : > { %v3853_v63 = vpop.f32.mrf.mxu0  ;;  %8177 = vmatmul.mubr.msk.bf16.gmra.mxu0 %vm2369_vm0, %v8593_v59  ;;  %v5423_v1 = vpop.f32.mrf.mxu1  ;;  %8334 = vmatmul.mubr.msk.bf16.gmra.mxu1 %vm2369_vm0, %v8594_v60 }
 0x275   : > { %6675 = vst [vmem:[%s9046_s14 + $0x660] sm:$0xff] %v3853_v63  ;;  %7303 = vst [vmem:[%s9046_s14 + $0x1a00] sm:$0xff] %v5423_v1  ;;  %4101 = vmatprep.mubr.bf16.mxu0 %v8764_v0  ;;  %5671 = vmatprep.mubr.bf16.mxu1 %v8764_v0 }
 0x276   : > { %v3855_v2 = vpop.f32.mrf.mxu0  ;;  %v5425_v3 = vpop.f32.mrf.mxu1 }
 0x277   : > { %6676 = vst.msk [vmem:[%s9046_s14 + $0x668] sm:$0xff] %vm6471_vm1, %v3855_v2  ;;  %7304 = vst.msk [vmem:[%s9046_s14 + $0x1a08] sm:$0xff] %vm6471_vm1, %v5425_v3  ;;  %v8607_v3 = vld [vmem:[%s12243_s0 + $0x290] sm:$0xff]  }
 0x278   : > { %v3857_v4 = vpop.f32.mrf.mxu0  ;;  %v5427_v5 = vpop.f32.mrf.mxu1 }
 0x279   : > { %6677 = vst [vmem:[%s9046_s14 + $0x670] sm:$0xff] %v3857_v4  ;;  %7305 = vst [vmem:[%s9046_s14 + $0x1a10] sm:$0xff] %v5427_v5  ;;  %v8608_v4 = vld [vmem:[%s12243_s0 + $0x778] sm:$0xff]  }
 0x27a   : > { %v3859_v8 = vpop.f32.mrf.mxu0  ;;  %v5429_v9 = vpop.f32.mrf.mxu1 }
 0x27b   : > { %6678 = vst.msk [vmem:[%s9046_s14 + $0x678] sm:$0xff] %vm6471_vm1, %v3859_v8  ;;  %7306 = vst.msk [vmem:[%s9046_s14 + $0x1a18] sm:$0xff] %vm6471_vm1, %v5429_v9 }
 0x27c   : > { %v3863_v10 = vpop.f32.mrf.mxu0  ;;  %8178 = vmatmul.mubr.msk.bf16.gmra.mxu0 %vm2369_vm0, %v8595_v6  ;;  %v5433_v11 = vpop.f32.mrf.mxu1  ;;  %8335 = vmatmul.mubr.msk.bf16.gmra.mxu1 %vm2369_vm0, %v8596_v7 }
 0x27d   : > { %6679 = vst [vmem:[%s9046_s14 + $0x680] sm:$0xff] %v3863_v10  ;;  %7307 = vst [vmem:[%s9046_s14 + $0x1a20] sm:$0xff] %v5433_v11  ;;  %4111 = vmatprep.mubr.bf16.mxu0 %v8764_v0  ;;  %5681 = vmatprep.mubr.bf16.mxu1 %v8764_v0 }
 0x27e   : > { %v3865_v12 = vpop.f32.mrf.mxu0  ;;  %v5435_v13 = vpop.f32.mrf.mxu1 }
 0x27f   : > { %6680 = vst.msk [vmem:[%s9046_s14 + $0x688] sm:$0xff] %vm6471_vm1, %v3865_v12  ;;  %7308 = vst.msk [vmem:[%s9046_s14 + $0x1a28] sm:$0xff] %vm6471_vm1, %v5435_v13  ;;  %v8609_v13 = vld [vmem:[%s12243_s0 + $0x298] sm:$0xff]  }
 0x280   : > { %v3867_v14 = vpop.f32.mrf.mxu0  ;;  %v5437_v15 = vpop.f32.mrf.mxu1 }
 0x281   : > { %6681 = vst [vmem:[%s9046_s14 + $0x690] sm:$0xff] %v3867_v14  ;;  %7309 = vst [vmem:[%s9046_s14 + $0x1a30] sm:$0xff] %v5437_v15  ;;  %v8610_v14 = vld [vmem:[%s12243_s0 + $0x780] sm:$0xff]  }
 0x282   : > { %v3869_v18 = vpop.f32.mrf.mxu0  ;;  %v5439_v19 = vpop.f32.mrf.mxu1 }
 0x283   : > { %6682 = vst.msk [vmem:[%s9046_s14 + $0x698] sm:$0xff] %vm6471_vm1, %v3869_v18  ;;  %7310 = vst.msk [vmem:[%s9046_s14 + $0x1a38] sm:$0xff] %vm6471_vm1, %v5439_v19 }
 0x284   : > { %v3873_v20 = vpop.f32.mrf.mxu0  ;;  %8179 = vmatmul.mubr.msk.bf16.gmra.mxu0 %vm2369_vm0, %v8597_v16  ;;  %v5443_v21 = vpop.f32.mrf.mxu1  ;;  %8336 = vmatmul.mubr.msk.bf16.gmra.mxu1 %vm2369_vm0, %v8598_v17 }
 0x285   : > { %6683 = vst [vmem:[%s9046_s14 + $0x6a0] sm:$0xff] %v3873_v20  ;;  %7311 = vst [vmem:[%s9046_s14 + $0x1a40] sm:$0xff] %v5443_v21  ;;  %4121 = vmatprep.mubr.bf16.mxu0 %v8764_v0  ;;  %5691 = vmatprep.mubr.bf16.mxu1 %v8764_v0 }
 0x286   : > { %v3875_v22 = vpop.f32.mrf.mxu0  ;;  %v5445_v23 = vpop.f32.mrf.mxu1 }
 0x287   : > { %6684 = vst.msk [vmem:[%s9046_s14 + $0x6a8] sm:$0xff] %vm6471_vm1, %v3875_v22  ;;  %7312 = vst.msk [vmem:[%s9046_s14 + $0x1a48] sm:$0xff] %vm6471_vm1, %v5445_v23  ;;  %v8611_v23 = vld [vmem:[%s12243_s0 + $0x2a0] sm:$0xff]  }
 0x288   : > { %v3877_v24 = vpop.f32.mrf.mxu0  ;;  %v5447_v25 = vpop.f32.mrf.mxu1 }
 0x289   : > { %6685 = vst [vmem:[%s9046_s14 + $0x6b0] sm:$0xff] %v3877_v24  ;;  %7313 = vst [vmem:[%s9046_s14 + $0x1a50] sm:$0xff] %v5447_v25  ;;  %v8612_v24 = vld [vmem:[%s12243_s0 + $0x788] sm:$0xff]  }
 0x28a   : > { %v3879_v28 = vpop.f32.mrf.mxu0  ;;  %v5449_v29 = vpop.f32.mrf.mxu1 }
 0x28b   : > { %6686 = vst.msk [vmem:[%s9046_s14 + $0x6b8] sm:$0xff] %vm6471_vm1, %v3879_v28  ;;  %7314 = vst.msk [vmem:[%s9046_s14 + $0x1a58] sm:$0xff] %vm6471_vm1, %v5449_v29 }
 0x28c   : > { %v3883_v30 = vpop.f32.mrf.mxu0  ;;  %8180 = vmatmul.mubr.msk.bf16.gmra.mxu0 %vm2369_vm0, %v8599_v26  ;;  %v5453_v31 = vpop.f32.mrf.mxu1  ;;  %8337 = vmatmul.mubr.msk.bf16.gmra.mxu1 %vm2369_vm0, %v8600_v27 }
 0x28d   : > { %6687 = vst [vmem:[%s9046_s14 + $0x6c0] sm:$0xff] %v3883_v30  ;;  %7315 = vst [vmem:[%s9046_s14 + $0x1a60] sm:$0xff] %v5453_v31  ;;  %4131 = vmatprep.mubr.bf16.mxu0 %v8764_v0  ;;  %5701 = vmatprep.mubr.bf16.mxu1 %v8764_v0 }
 0x28e   : > { %v3885_v32 = vpop.f32.mrf.mxu0  ;;  %v5455_v33 = vpop.f32.mrf.mxu1 }
 0x28f   : > { %6688 = vst.msk [vmem:[%s9046_s14 + $0x6c8] sm:$0xff] %vm6471_vm1, %v3885_v32  ;;  %7316 = vst.msk [vmem:[%s9046_s14 + $0x1a68] sm:$0xff] %vm6471_vm1, %v5455_v33  ;;  %v8613_v33 = vld [vmem:[%s12243_s0 + $0x2a8] sm:$0xff]  }
 0x290   : > { %v3887_v34 = vpop.f32.mrf.mxu0  ;;  %v5457_v35 = vpop.f32.mrf.mxu1 }
 0x291   : > { %6689 = vst [vmem:[%s9046_s14 + $0x6d0] sm:$0xff] %v3887_v34  ;;  %7317 = vst [vmem:[%s9046_s14 + $0x1a70] sm:$0xff] %v5457_v35  ;;  %v8614_v34 = vld [vmem:[%s12243_s0 + $0x790] sm:$0xff]  }
 0x292   : > { %v3889_v38 = vpop.f32.mrf.mxu0  ;;  %v5459_v39 = vpop.f32.mrf.mxu1 }
 0x293   : > { %6690 = vst.msk [vmem:[%s9046_s14 + $0x6d8] sm:$0xff] %vm6471_vm1, %v3889_v38  ;;  %7318 = vst.msk [vmem:[%s9046_s14 + $0x1a78] sm:$0xff] %vm6471_vm1, %v5459_v39 }
 0x294   : > { %v3893_v40 = vpop.f32.mrf.mxu0  ;;  %8181 = vmatmul.mubr.msk.bf16.gmra.mxu0 %vm2369_vm0, %v8601_v36  ;;  %v5463_v41 = vpop.f32.mrf.mxu1  ;;  %8338 = vmatmul.mubr.msk.bf16.gmra.mxu1 %vm2369_vm0, %v8602_v37 }
 0x295   : > { %6691 = vst [vmem:[%s9046_s14 + $0x6e0] sm:$0xff] %v3893_v40  ;;  %7319 = vst [vmem:[%s9046_s14 + $0x1a80] sm:$0xff] %v5463_v41  ;;  %4141 = vmatprep.mubr.bf16.mxu0 %v8764_v0  ;;  %5711 = vmatprep.mubr.bf16.mxu1 %v8764_v0 }
 0x296   : > { %v3895_v42 = vpop.f32.mrf.mxu0  ;;  %v5465_v43 = vpop.f32.mrf.mxu1 }
 0x297   : > { %6692 = vst.msk [vmem:[%s9046_s14 + $0x6e8] sm:$0xff] %vm6471_vm1, %v3895_v42  ;;  %7320 = vst.msk [vmem:[%s9046_s14 + $0x1a88] sm:$0xff] %vm6471_vm1, %v5465_v43  ;;  %v8615_v43 = vld [vmem:[%s12243_s0 + $0x2b0] sm:$0xff]  }
 0x298   : > { %v3897_v44 = vpop.f32.mrf.mxu0  ;;  %v5467_v45 = vpop.f32.mrf.mxu1 }
 0x299   : > { %6693 = vst [vmem:[%s9046_s14 + $0x6f0] sm:$0xff] %v3897_v44  ;;  %7321 = vst [vmem:[%s9046_s14 + $0x1a90] sm:$0xff] %v5467_v45  ;;  %v8616_v44 = vld [vmem:[%s12243_s0 + $0x798] sm:$0xff]  }
 0x29a   : > { %v3899_v48 = vpop.f32.mrf.mxu0  ;;  %v5469_v49 = vpop.f32.mrf.mxu1 }
 0x29b   : > { %6694 = vst.msk [vmem:[%s9046_s14 + $0x6f8] sm:$0xff] %vm6471_vm1, %v3899_v48  ;;  %7322 = vst.msk [vmem:[%s9046_s14 + $0x1a98] sm:$0xff] %vm6471_vm1, %v5469_v49 }
 0x29c   : > { %v3903_v50 = vpop.f32.mrf.mxu0  ;;  %8182 = vmatmul.mubr.msk.bf16.gmra.mxu0 %vm2369_vm0, %v8603_v46  ;;  %v5473_v51 = vpop.f32.mrf.mxu1  ;;  %8339 = vmatmul.mubr.msk.bf16.gmra.mxu1 %vm2369_vm0, %v8604_v47 }
 0x29d   : > { %6695 = vst [vmem:[%s9046_s14 + $0x700] sm:$0xff] %v3903_v50  ;;  %7323 = vst [vmem:[%s9046_s14 + $0x1aa0] sm:$0xff] %v5473_v51  ;;  %4151 = vmatprep.mubr.bf16.mxu0 %v8764_v0  ;;  %5721 = vmatprep.mubr.bf16.mxu1 %v8764_v0 }
 0x29e   : > { %v3905_v52 = vpop.f32.mrf.mxu0  ;;  %v5475_v53 = vpop.f32.mrf.mxu1 }
 0x29f   : > { %6696 = vst.msk [vmem:[%s9046_s14 + $0x708] sm:$0xff] %vm6471_vm1, %v3905_v52  ;;  %7324 = vst.msk [vmem:[%s9046_s14 + $0x1aa8] sm:$0xff] %vm6471_vm1, %v5475_v53  ;;  %v8617_v53 = vld [vmem:[%s12243_s0 + $0x2b8] sm:$0xff]  }
 0x2a0   : > { %v3907_v54 = vpop.f32.mrf.mxu0  ;;  %v5477_v55 = vpop.f32.mrf.mxu1 }
 0x2a1   : > { %6697 = vst [vmem:[%s9046_s14 + $0x710] sm:$0xff] %v3907_v54  ;;  %7325 = vst [vmem:[%s9046_s14 + $0x1ab0] sm:$0xff] %v5477_v55  ;;  %v8618_v54 = vld [vmem:[%s12243_s0 + $0x7a0] sm:$0xff]  }
 0x2a2   : > { %v3909_v58 = vpop.f32.mrf.mxu0  ;;  %v5479_v59 = vpop.f32.mrf.mxu1 }
 0x2a3   : > { %6698 = vst.msk [vmem:[%s9046_s14 + $0x718] sm:$0xff] %vm6471_vm1, %v3909_v58  ;;  %7326 = vst.msk [vmem:[%s9046_s14 + $0x1ab8] sm:$0xff] %vm6471_vm1, %v5479_v59 }
 0x2a4   : > { %v3913_v60 = vpop.f32.mrf.mxu0  ;;  %8183 = vmatmul.mubr.msk.bf16.gmra.mxu0 %vm2369_vm0, %v8605_v56  ;;  %v5483_v61 = vpop.f32.mrf.mxu1  ;;  %8340 = vmatmul.mubr.msk.bf16.gmra.mxu1 %vm2369_vm0, %v8606_v57 }
 0x2a5   : > { %6699 = vst [vmem:[%s9046_s14 + $0x720] sm:$0xff] %v3913_v60  ;;  %7327 = vst [vmem:[%s9046_s14 + $0x1ac0] sm:$0xff] %v5483_v61  ;;  %4161 = vmatprep.mubr.bf16.mxu0 %v8764_v0  ;;  %5731 = vmatprep.mubr.bf16.mxu1 %v8764_v0 }
 0x2a6   : > { %v3915_v62 = vpop.f32.mrf.mxu0  ;;  %v5485_v63 = vpop.f32.mrf.mxu1 }
 0x2a7   : > { %6700 = vst.msk [vmem:[%s9046_s14 + $0x728] sm:$0xff] %vm6471_vm1, %v3915_v62  ;;  %7328 = vst.msk [vmem:[%s9046_s14 + $0x1ac8] sm:$0xff] %vm6471_vm1, %v5485_v63  ;;  %v8619_v63 = vld [vmem:[%s12243_s0 + $0x2c0] sm:$0xff]  }
 0x2a8   : > { %v3917_v1 = vpop.f32.mrf.mxu0  ;;  %v5487_v2 = vpop.f32.mrf.mxu1 }
 0x2a9   : > { %6701 = vst [vmem:[%s9046_s14 + $0x730] sm:$0xff] %v3917_v1  ;;  %7329 = vst [vmem:[%s9046_s14 + $0x1ad0] sm:$0xff] %v5487_v2  ;;  %v8620_v1 = vld [vmem:[%s12243_s0 + $0x7a8] sm:$0xff]  }
 0x2aa   : > { %v3919_v5 = vpop.f32.mrf.mxu0  ;;  %v5489_v6 = vpop.f32.mrf.mxu1 }
 0x2ab   : > { %6702 = vst.msk [vmem:[%s9046_s14 + $0x738] sm:$0xff] %vm6471_vm1, %v3919_v5  ;;  %7330 = vst.msk [vmem:[%s9046_s14 + $0x1ad8] sm:$0xff] %vm6471_vm1, %v5489_v6 }
 0x2ac   : > { %v3923_v7 = vpop.f32.mrf.mxu0  ;;  %8184 = vmatmul.mubr.msk.bf16.gmra.mxu0 %vm2369_vm0, %v8607_v3  ;;  %v5493_v8 = vpop.f32.mrf.mxu1  ;;  %8341 = vmatmul.mubr.msk.bf16.gmra.mxu1 %vm2369_vm0, %v8608_v4 }
 0x2ad   : > { %6703 = vst [vmem:[%s9046_s14 + $0x740] sm:$0xff] %v3923_v7  ;;  %7331 = vst [vmem:[%s9046_s14 + $0x1ae0] sm:$0xff] %v5493_v8  ;;  %4171 = vmatprep.mubr.bf16.mxu0 %v8764_v0  ;;  %5741 = vmatprep.mubr.bf16.mxu1 %v8764_v0 }
 0x2ae   : > { %v3925_v9 = vpop.f32.mrf.mxu0  ;;  %v5495_v10 = vpop.f32.mrf.mxu1 }
 0x2af   : > { %6704 = vst.msk [vmem:[%s9046_s14 + $0x748] sm:$0xff] %vm6471_vm1, %v3925_v9  ;;  %7332 = vst.msk [vmem:[%s9046_s14 + $0x1ae8] sm:$0xff] %vm6471_vm1, %v5495_v10  ;;  %v8621_v10 = vld [vmem:[%s12243_s0 + $0x2c8] sm:$0xff]  }
 0x2b0   : > { %v3927_v11 = vpop.f32.mrf.mxu0  ;;  %v5497_v12 = vpop.f32.mrf.mxu1 }
 0x2b1   : > { %6705 = vst [vmem:[%s9046_s14 + $0x750] sm:$0xff] %v3927_v11  ;;  %7333 = vst [vmem:[%s9046_s14 + $0x1af0] sm:$0xff] %v5497_v12  ;;  %v8622_v11 = vld [vmem:[%s12243_s0 + $0x7b0] sm:$0xff]  }
 0x2b2   : > { %v3929_v15 = vpop.f32.mrf.mxu0  ;;  %v5499_v16 = vpop.f32.mrf.mxu1 }
 0x2b3   : > { %6706 = vst.msk [vmem:[%s9046_s14 + $0x758] sm:$0xff] %vm6471_vm1, %v3929_v15  ;;  %7334 = vst.msk [vmem:[%s9046_s14 + $0x1af8] sm:$0xff] %vm6471_vm1, %v5499_v16 }
 0x2b4   : > { %v3933_v17 = vpop.f32.mrf.mxu0  ;;  %8185 = vmatmul.mubr.msk.bf16.gmra.mxu0 %vm2369_vm0, %v8609_v13  ;;  %v5503_v18 = vpop.f32.mrf.mxu1  ;;  %8342 = vmatmul.mubr.msk.bf16.gmra.mxu1 %vm2369_vm0, %v8610_v14 }
 0x2b5   : > { %6707 = vst [vmem:[%s9046_s14 + $0x760] sm:$0xff] %v3933_v17  ;;  %7335 = vst [vmem:[%s9046_s14 + $0x1b00] sm:$0xff] %v5503_v18  ;;  %4181 = vmatprep.mubr.bf16.mxu0 %v8764_v0  ;;  %5751 = vmatprep.mubr.bf16.mxu1 %v8764_v0 }
 0x2b6   : > { %v3935_v19 = vpop.f32.mrf.mxu0  ;;  %v5505_v20 = vpop.f32.mrf.mxu1 }
 0x2b7   : > { %6708 = vst.msk [vmem:[%s9046_s14 + $0x768] sm:$0xff] %vm6471_vm1, %v3935_v19  ;;  %7336 = vst.msk [vmem:[%s9046_s14 + $0x1b08] sm:$0xff] %vm6471_vm1, %v5505_v20  ;;  %v8623_v20 = vld [vmem:[%s12243_s0 + $0x2d0] sm:$0xff]  }
 0x2b8   : > { %v3937_v21 = vpop.f32.mrf.mxu0  ;;  %v5507_v22 = vpop.f32.mrf.mxu1 }
 0x2b9   : > { %6709 = vst [vmem:[%s9046_s14 + $0x770] sm:$0xff] %v3937_v21  ;;  %7337 = vst [vmem:[%s9046_s14 + $0x1b10] sm:$0xff] %v5507_v22  ;;  %v8624_v21 = vld [vmem:[%s12243_s0 + $0x7b8] sm:$0xff]  }
 0x2ba   : > { %v3939_v25 = vpop.f32.mrf.mxu0  ;;  %v5509_v26 = vpop.f32.mrf.mxu1 }
 0x2bb   : > { %6710 = vst.msk [vmem:[%s9046_s14 + $0x778] sm:$0xff] %vm6471_vm1, %v3939_v25  ;;  %7338 = vst.msk [vmem:[%s9046_s14 + $0x1b18] sm:$0xff] %vm6471_vm1, %v5509_v26 }
 0x2bc   : > { %v3943_v27 = vpop.f32.mrf.mxu0  ;;  %8186 = vmatmul.mubr.msk.bf16.gmra.mxu0 %vm2369_vm0, %v8611_v23  ;;  %v5513_v28 = vpop.f32.mrf.mxu1  ;;  %8343 = vmatmul.mubr.msk.bf16.gmra.mxu1 %vm2369_vm0, %v8612_v24 }
 0x2bd   : > { %6711 = vst [vmem:[%s9046_s14 + $0x780] sm:$0xff] %v3943_v27  ;;  %7339 = vst [vmem:[%s9046_s14 + $0x1b20] sm:$0xff] %v5513_v28  ;;  %4191 = vmatprep.mubr.bf16.mxu0 %v8764_v0  ;;  %5761 = vmatprep.mubr.bf16.mxu1 %v8764_v0 }
 0x2be   : > { %v3945_v29 = vpop.f32.mrf.mxu0  ;;  %v5515_v30 = vpop.f32.mrf.mxu1 }
 0x2bf   : > { %6712 = vst.msk [vmem:[%s9046_s14 + $0x788] sm:$0xff] %vm6471_vm1, %v3945_v29  ;;  %7340 = vst.msk [vmem:[%s9046_s14 + $0x1b28] sm:$0xff] %vm6471_vm1, %v5515_v30  ;;  %v8625_v30 = vld [vmem:[%s12243_s0 + $0x2d8] sm:$0xff]  }
 0x2c0   : > { %v3947_v31 = vpop.f32.mrf.mxu0  ;;  %v5517_v32 = vpop.f32.mrf.mxu1 }
 0x2c1   : > { %6713 = vst [vmem:[%s9046_s14 + $0x790] sm:$0xff] %v3947_v31  ;;  %7341 = vst [vmem:[%s9046_s14 + $0x1b30] sm:$0xff] %v5517_v32  ;;  %v8626_v31 = vld [vmem:[%s12243_s0 + $0x7c0] sm:$0xff]  }
 0x2c2   : > { %v3949_v35 = vpop.f32.mrf.mxu0  ;;  %v5519_v36 = vpop.f32.mrf.mxu1 }
 0x2c3   : > { %6714 = vst.msk [vmem:[%s9046_s14 + $0x798] sm:$0xff] %vm6471_vm1, %v3949_v35  ;;  %7342 = vst.msk [vmem:[%s9046_s14 + $0x1b38] sm:$0xff] %vm6471_vm1, %v5519_v36 }
 0x2c4   : > { %v3953_v37 = vpop.f32.mrf.mxu0  ;;  %8187 = vmatmul.mubr.msk.bf16.gmra.mxu0 %vm2369_vm0, %v8613_v33  ;;  %v5523_v38 = vpop.f32.mrf.mxu1  ;;  %8344 = vmatmul.mubr.msk.bf16.gmra.mxu1 %vm2369_vm0, %v8614_v34 }
 0x2c5   : > { %6715 = vst [vmem:[%s9046_s14 + $0x7a0] sm:$0xff] %v3953_v37  ;;  %7343 = vst [vmem:[%s9046_s14 + $0x1b40] sm:$0xff] %v5523_v38  ;;  %4201 = vmatprep.mubr.bf16.mxu0 %v8764_v0  ;;  %5771 = vmatprep.mubr.bf16.mxu1 %v8764_v0 }
 0x2c6   : > { %v3955_v39 = vpop.f32.mrf.mxu0  ;;  %v5525_v40 = vpop.f32.mrf.mxu1 }
 0x2c7   : > { %6716 = vst.msk [vmem:[%s9046_s14 + $0x7a8] sm:$0xff] %vm6471_vm1, %v3955_v39  ;;  %7344 = vst.msk [vmem:[%s9046_s14 + $0x1b48] sm:$0xff] %vm6471_vm1, %v5525_v40  ;;  %v8627_v40 = vld [vmem:[%s12243_s0 + $0x2e0] sm:$0xff]  }
 0x2c8   : > { %v3957_v41 = vpop.f32.mrf.mxu0  ;;  %v5527_v42 = vpop.f32.mrf.mxu1 }
 0x2c9   : > { %6717 = vst [vmem:[%s9046_s14 + $0x7b0] sm:$0xff] %v3957_v41  ;;  %7345 = vst [vmem:[%s9046_s14 + $0x1b50] sm:$0xff] %v5527_v42  ;;  %v8628_v41 = vld [vmem:[%s12243_s0 + $0x7c8] sm:$0xff]  }
 0x2ca   : > { %v3959_v45 = vpop.f32.mrf.mxu0  ;;  %v5529_v46 = vpop.f32.mrf.mxu1 }
 0x2cb   : > { %6718 = vst.msk [vmem:[%s9046_s14 + $0x7b8] sm:$0xff] %vm6471_vm1, %v3959_v45  ;;  %7346 = vst.msk [vmem:[%s9046_s14 + $0x1b58] sm:$0xff] %vm6471_vm1, %v5529_v46 }
 0x2cc   : > { %v3963_v47 = vpop.f32.mrf.mxu0  ;;  %8188 = vmatmul.mubr.msk.bf16.gmra.mxu0 %vm2369_vm0, %v8615_v43  ;;  %v5533_v48 = vpop.f32.mrf.mxu1  ;;  %8345 = vmatmul.mubr.msk.bf16.gmra.mxu1 %vm2369_vm0, %v8616_v44 }
 0x2cd   : > { %6719 = vst [vmem:[%s9046_s14 + $0x7c0] sm:$0xff] %v3963_v47  ;;  %7347 = vst [vmem:[%s9046_s14 + $0x1b60] sm:$0xff] %v5533_v48  ;;  %4211 = vmatprep.mubr.bf16.mxu0 %v8764_v0  ;;  %5781 = vmatprep.mubr.bf16.mxu1 %v8764_v0 }
 0x2ce   : > { %v3965_v49 = vpop.f32.mrf.mxu0  ;;  %v5535_v50 = vpop.f32.mrf.mxu1 }
 0x2cf   : > { %6720 = vst.msk [vmem:[%s9046_s14 + $0x7c8] sm:$0xff] %vm6471_vm1, %v3965_v49  ;;  %7348 = vst.msk [vmem:[%s9046_s14 + $0x1b68] sm:$0xff] %vm6471_vm1, %v5535_v50  ;;  %v8629_v50 = vld [vmem:[%s12243_s0 + $0x2e8] sm:$0xff]  }
 0x2d0   : > { %v3967_v51 = vpop.f32.mrf.mxu0  ;;  %v5537_v52 = vpop.f32.mrf.mxu1 }
 0x2d1   : > { %6721 = vst [vmem:[%s9046_s14 + $0x7d0] sm:$0xff] %v3967_v51  ;;  %7349 = vst [vmem:[%s9046_s14 + $0x1b70] sm:$0xff] %v5537_v52  ;;  %v8630_v51 = vld [vmem:[%s12243_s0 + $0x7d0] sm:$0xff]  }
 0x2d2   : > { %v3969_v55 = vpop.f32.mrf.mxu0  ;;  %v5539_v56 = vpop.f32.mrf.mxu1 }
 0x2d3   : > { %6722 = vst.msk [vmem:[%s9046_s14 + $0x7d8] sm:$0xff] %vm6471_vm1, %v3969_v55  ;;  %7350 = vst.msk [vmem:[%s9046_s14 + $0x1b78] sm:$0xff] %vm6471_vm1, %v5539_v56 }
 0x2d4   : > { %v3973_v57 = vpop.f32.mrf.mxu0  ;;  %8189 = vmatmul.mubr.msk.bf16.gmra.mxu0 %vm2369_vm0, %v8617_v53  ;;  %v5543_v58 = vpop.f32.mrf.mxu1  ;;  %8346 = vmatmul.mubr.msk.bf16.gmra.mxu1 %vm2369_vm0, %v8618_v54 }
 0x2d5   : > { %6723 = vst [vmem:[%s9046_s14 + $0x7e0] sm:$0xff] %v3973_v57  ;;  %7351 = vst [vmem:[%s9046_s14 + $0x1b80] sm:$0xff] %v5543_v58  ;;  %4221 = vmatprep.mubr.bf16.mxu0 %v8764_v0  ;;  %5791 = vmatprep.mubr.bf16.mxu1 %v8764_v0 }
 0x2d6   : > { %v3975_v59 = vpop.f32.mrf.mxu0  ;;  %v5545_v60 = vpop.f32.mrf.mxu1 }
 0x2d7   : > { %6724 = vst.msk [vmem:[%s9046_s14 + $0x7e8] sm:$0xff] %vm6471_vm1, %v3975_v59  ;;  %7352 = vst.msk [vmem:[%s9046_s14 + $0x1b88] sm:$0xff] %vm6471_vm1, %v5545_v60  ;;  %v8631_v60 = vld [vmem:[%s12243_s0 + $0x2f0] sm:$0xff]  }
 0x2d8   : > { %v3977_v61 = vpop.f32.mrf.mxu0  ;;  %v5547_v62 = vpop.f32.mrf.mxu1 }
 0x2d9   : > { %6725 = vst [vmem:[%s9046_s14 + $0x7f0] sm:$0xff] %v3977_v61  ;;  %7353 = vst [vmem:[%s9046_s14 + $0x1b90] sm:$0xff] %v5547_v62  ;;  %v8632_v61 = vld [vmem:[%s12243_s0 + $0x7d8] sm:$0xff]  }
 0x2da   : > { %v3979_v2 = vpop.f32.mrf.mxu0  ;;  %v5549_v3 = vpop.f32.mrf.mxu1 }
 0x2db   : > { %6726 = vst.msk [vmem:[%s9046_s14 + $0x7f8] sm:$0xff] %vm6471_vm1, %v3979_v2  ;;  %7354 = vst.msk [vmem:[%s9046_s14 + $0x1b98] sm:$0xff] %vm6471_vm1, %v5549_v3 }
 0x2dc   : > { %v3983_v4 = vpop.f32.mrf.mxu0  ;;  %8190 = vmatmul.mubr.msk.bf16.gmra.mxu0 %vm2369_vm0, %v8619_v63  ;;  %v5553_v5 = vpop.f32.mrf.mxu1  ;;  %8347 = vmatmul.mubr.msk.bf16.gmra.mxu1 %vm2369_vm0, %v8620_v1 }
 0x2dd   : > { %6727 = vst [vmem:[%s9046_s14 + $0x800] sm:$0xff] %v3983_v4  ;;  %7355 = vst [vmem:[%s9046_s14 + $0x1ba0] sm:$0xff] %v5553_v5  ;;  %4231 = vmatprep.mubr.bf16.mxu0 %v8764_v0  ;;  %5801 = vmatprep.mubr.bf16.mxu1 %v8764_v0 }
 0x2de   : > { %v3985_v6 = vpop.f32.mrf.mxu0  ;;  %v5555_v7 = vpop.f32.mrf.mxu1 }
 0x2df   : > { %6728 = vst.msk [vmem:[%s9046_s14 + $0x808] sm:$0xff] %vm6471_vm1, %v3985_v6  ;;  %7356 = vst.msk [vmem:[%s9046_s14 + $0x1ba8] sm:$0xff] %vm6471_vm1, %v5555_v7  ;;  %v8633_v7 = vld [vmem:[%s12243_s0 + $0x2f8] sm:$0xff]  }
 0x2e0   : > { %v3987_v8 = vpop.f32.mrf.mxu0  ;;  %v5557_v9 = vpop.f32.mrf.mxu1 }
 0x2e1   : > { %6729 = vst [vmem:[%s9046_s14 + $0x810] sm:$0xff] %v3987_v8  ;;  %7357 = vst [vmem:[%s9046_s14 + $0x1bb0] sm:$0xff] %v5557_v9  ;;  %v8634_v8 = vld [vmem:[%s12243_s0 + $0x7e0] sm:$0xff]  }
 0x2e2   : > { %v3989_v12 = vpop.f32.mrf.mxu0  ;;  %v5559_v13 = vpop.f32.mrf.mxu1 }
 0x2e3   : > { %6730 = vst.msk [vmem:[%s9046_s14 + $0x818] sm:$0xff] %vm6471_vm1, %v3989_v12  ;;  %7358 = vst.msk [vmem:[%s9046_s14 + $0x1bb8] sm:$0xff] %vm6471_vm1, %v5559_v13 }
 0x2e4   : > { %v3993_v14 = vpop.f32.mrf.mxu0  ;;  %8191 = vmatmul.mubr.msk.bf16.gmra.mxu0 %vm2369_vm0, %v8621_v10  ;;  %v5563_v15 = vpop.f32.mrf.mxu1  ;;  %8348 = vmatmul.mubr.msk.bf16.gmra.mxu1 %vm2369_vm0, %v8622_v11 }
 0x2e5   : > { %6731 = vst [vmem:[%s9046_s14 + $0x820] sm:$0xff] %v3993_v14  ;;  %7359 = vst [vmem:[%s9046_s14 + $0x1bc0] sm:$0xff] %v5563_v15  ;;  %4241 = vmatprep.mubr.bf16.mxu0 %v8764_v0  ;;  %5811 = vmatprep.mubr.bf16.mxu1 %v8764_v0 }
 0x2e6   : > { %v3995_v16 = vpop.f32.mrf.mxu0  ;;  %v5565_v17 = vpop.f32.mrf.mxu1 }
 0x2e7   : > { %6732 = vst.msk [vmem:[%s9046_s14 + $0x828] sm:$0xff] %vm6471_vm1, %v3995_v16  ;;  %7360 = vst.msk [vmem:[%s9046_s14 + $0x1bc8] sm:$0xff] %vm6471_vm1, %v5565_v17  ;;  %v8635_v17 = vld [vmem:[%s12243_s0 + $0x300] sm:$0xff]  }
 0x2e8   : > { %v3997_v18 = vpop.f32.mrf.mxu0  ;;  %v5567_v19 = vpop.f32.mrf.mxu1 }
 0x2e9   : > { %6733 = vst [vmem:[%s9046_s14 + $0x830] sm:$0xff] %v3997_v18  ;;  %7361 = vst [vmem:[%s9046_s14 + $0x1bd0] sm:$0xff] %v5567_v19  ;;  %v8636_v18 = vld [vmem:[%s12243_s0 + $0x7e8] sm:$0xff]  }
 0x2ea   : > { %v3999_v22 = vpop.f32.mrf.mxu0  ;;  %v5569_v23 = vpop.f32.mrf.mxu1 }
 0x2eb   : > { %6734 = vst.msk [vmem:[%s9046_s14 + $0x838] sm:$0xff] %vm6471_vm1, %v3999_v22  ;;  %7362 = vst.msk [vmem:[%s9046_s14 + $0x1bd8] sm:$0xff] %vm6471_vm1, %v5569_v23 }
 0x2ec   : > { %v4003_v24 = vpop.f32.mrf.mxu0  ;;  %8192 = vmatmul.mubr.msk.bf16.gmra.mxu0 %vm2369_vm0, %v8623_v20  ;;  %v5573_v25 = vpop.f32.mrf.mxu1  ;;  %8349 = vmatmul.mubr.msk.bf16.gmra.mxu1 %vm2369_vm0, %v8624_v21 }
 0x2ed   : > { %6735 = vst [vmem:[%s9046_s14 + $0x840] sm:$0xff] %v4003_v24  ;;  %7363 = vst [vmem:[%s9046_s14 + $0x1be0] sm:$0xff] %v5573_v25  ;;  %4251 = vmatprep.mubr.bf16.mxu0 %v8764_v0  ;;  %5821 = vmatprep.mubr.bf16.mxu1 %v8764_v0 }
 0x2ee   : > { %v4005_v26 = vpop.f32.mrf.mxu0  ;;  %v5575_v27 = vpop.f32.mrf.mxu1 }
 0x2ef   : > { %6736 = vst.msk [vmem:[%s9046_s14 + $0x848] sm:$0xff] %vm6471_vm1, %v4005_v26  ;;  %7364 = vst.msk [vmem:[%s9046_s14 + $0x1be8] sm:$0xff] %vm6471_vm1, %v5575_v27  ;;  %v8637_v27 = vld [vmem:[%s12243_s0 + $0x308] sm:$0xff]  }
 0x2f0   : > { %v4007_v28 = vpop.f32.mrf.mxu0  ;;  %v5577_v29 = vpop.f32.mrf.mxu1 }
 0x2f1   : > { %6737 = vst [vmem:[%s9046_s14 + $0x850] sm:$0xff] %v4007_v28  ;;  %7365 = vst [vmem:[%s9046_s14 + $0x1bf0] sm:$0xff] %v5577_v29  ;;  %v8638_v28 = vld [vmem:[%s12243_s0 + $0x7f0] sm:$0xff]  }
 0x2f2   : > { %v4009_v32 = vpop.f32.mrf.mxu0  ;;  %v5579_v33 = vpop.f32.mrf.mxu1 }
 0x2f3   : > { %6738 = vst.msk [vmem:[%s9046_s14 + $0x858] sm:$0xff] %vm6471_vm1, %v4009_v32  ;;  %7366 = vst.msk [vmem:[%s9046_s14 + $0x1bf8] sm:$0xff] %vm6471_vm1, %v5579_v33 }
 0x2f4   : > { %v4013_v34 = vpop.f32.mrf.mxu0  ;;  %8193 = vmatmul.mubr.msk.bf16.gmra.mxu0 %vm2369_vm0, %v8625_v30  ;;  %v5583_v35 = vpop.f32.mrf.mxu1  ;;  %8350 = vmatmul.mubr.msk.bf16.gmra.mxu1 %vm2369_vm0, %v8626_v31 }
 0x2f5   : > { %6739 = vst [vmem:[%s9046_s14 + $0x860] sm:$0xff] %v4013_v34  ;;  %7367 = vst [vmem:[%s9046_s14 + $0x1c00] sm:$0xff] %v5583_v35  ;;  %4261 = vmatprep.mubr.bf16.mxu0 %v8764_v0  ;;  %5831 = vmatprep.mubr.bf16.mxu1 %v8764_v0 }
 0x2f6   : > { %v4015_v36 = vpop.f32.mrf.mxu0  ;;  %v5585_v37 = vpop.f32.mrf.mxu1 }
 0x2f7   : > { %6740 = vst.msk [vmem:[%s9046_s14 + $0x868] sm:$0xff] %vm6471_vm1, %v4015_v36  ;;  %7368 = vst.msk [vmem:[%s9046_s14 + $0x1c08] sm:$0xff] %vm6471_vm1, %v5585_v37  ;;  %v8639_v37 = vld [vmem:[%s12243_s0 + $0x310] sm:$0xff]  }
 0x2f8   : > { %v4017_v38 = vpop.f32.mrf.mxu0  ;;  %v5587_v39 = vpop.f32.mrf.mxu1 }
 0x2f9   : > { %6741 = vst [vmem:[%s9046_s14 + $0x870] sm:$0xff] %v4017_v38  ;;  %7369 = vst [vmem:[%s9046_s14 + $0x1c10] sm:$0xff] %v5587_v39  ;;  %v8640_v38 = vld [vmem:[%s12243_s0 + $0x7f8] sm:$0xff]  }
 0x2fa   : > { %v4019_v42 = vpop.f32.mrf.mxu0  ;;  %v5589_v43 = vpop.f32.mrf.mxu1 }
 0x2fb   : > { %6742 = vst.msk [vmem:[%s9046_s14 + $0x878] sm:$0xff] %vm6471_vm1, %v4019_v42  ;;  %7370 = vst.msk [vmem:[%s9046_s14 + $0x1c18] sm:$0xff] %vm6471_vm1, %v5589_v43 }
 0x2fc   : > { %v4023_v44 = vpop.f32.mrf.mxu0  ;;  %8194 = vmatmul.mubr.msk.bf16.gmra.mxu0 %vm2369_vm0, %v8627_v40  ;;  %v5593_v45 = vpop.f32.mrf.mxu1  ;;  %8351 = vmatmul.mubr.msk.bf16.gmra.mxu1 %vm2369_vm0, %v8628_v41 }
 0x2fd   : > { %6743 = vst [vmem:[%s9046_s14 + $0x880] sm:$0xff] %v4023_v44  ;;  %7371 = vst [vmem:[%s9046_s14 + $0x1c20] sm:$0xff] %v5593_v45  ;;  %4271 = vmatprep.mubr.bf16.mxu0 %v8764_v0  ;;  %5841 = vmatprep.mubr.bf16.mxu1 %v8764_v0 }
 0x2fe   : > { %v4025_v46 = vpop.f32.mrf.mxu0  ;;  %v5595_v47 = vpop.f32.mrf.mxu1 }
 0x2ff   : > { %6744 = vst.msk [vmem:[%s9046_s14 + $0x888] sm:$0xff] %vm6471_vm1, %v4025_v46  ;;  %7372 = vst.msk [vmem:[%s9046_s14 + $0x1c28] sm:$0xff] %vm6471_vm1, %v5595_v47  ;;  %v8641_v47 = vld [vmem:[%s12243_s0 + $0x318] sm:$0xff]  }
 0x300   : > { %v4027_v48 = vpop.f32.mrf.mxu0  ;;  %v5597_v49 = vpop.f32.mrf.mxu1 }
 0x301   : > { %6745 = vst [vmem:[%s9046_s14 + $0x890] sm:$0xff] %v4027_v48  ;;  %7373 = vst [vmem:[%s9046_s14 + $0x1c30] sm:$0xff] %v5597_v49  ;;  %v8642_v48 = vld [vmem:[%s12243_s0 + $0x800] sm:$0xff]  }
 0x302   : > { %v4029_v52 = vpop.f32.mrf.mxu0  ;;  %v5599_v53 = vpop.f32.mrf.mxu1 }
 0x303   : > { %6746 = vst.msk [vmem:[%s9046_s14 + $0x898] sm:$0xff] %vm6471_vm1, %v4029_v52  ;;  %7374 = vst.msk [vmem:[%s9046_s14 + $0x1c38] sm:$0xff] %vm6471_vm1, %v5599_v53 }
 0x304   : > { %v4033_v54 = vpop.f32.mrf.mxu0  ;;  %8195 = vmatmul.mubr.msk.bf16.gmra.mxu0 %vm2369_vm0, %v8629_v50  ;;  %v5603_v55 = vpop.f32.mrf.mxu1  ;;  %8352 = vmatmul.mubr.msk.bf16.gmra.mxu1 %vm2369_vm0, %v8630_v51 }
 0x305   : > { %6747 = vst [vmem:[%s9046_s14 + $0x8a0] sm:$0xff] %v4033_v54  ;;  %7375 = vst [vmem:[%s9046_s14 + $0x1c40] sm:$0xff] %v5603_v55  ;;  %4281 = vmatprep.mubr.bf16.mxu0 %v8764_v0  ;;  %5851 = vmatprep.mubr.bf16.mxu1 %v8764_v0 }
 0x306   : > { %v4035_v56 = vpop.f32.mrf.mxu0  ;;  %v5605_v57 = vpop.f32.mrf.mxu1 }
 0x307   : > { %6748 = vst.msk [vmem:[%s9046_s14 + $0x8a8] sm:$0xff] %vm6471_vm1, %v4035_v56  ;;  %7376 = vst.msk [vmem:[%s9046_s14 + $0x1c48] sm:$0xff] %vm6471_vm1, %v5605_v57  ;;  %v8643_v57 = vld [vmem:[%s12243_s0 + $0x320] sm:$0xff]  }
 0x308   : > { %v4037_v58 = vpop.f32.mrf.mxu0  ;;  %v5607_v59 = vpop.f32.mrf.mxu1 }
 0x309   : > { %6749 = vst [vmem:[%s9046_s14 + $0x8b0] sm:$0xff] %v4037_v58  ;;  %7377 = vst [vmem:[%s9046_s14 + $0x1c50] sm:$0xff] %v5607_v59  ;;  %v8644_v58 = vld [vmem:[%s12243_s0 + $0x808] sm:$0xff]  }
 0x30a   : > { %v4039_v62 = vpop.f32.mrf.mxu0  ;;  %v5609_v63 = vpop.f32.mrf.mxu1 }
 0x30b   : > { %6750 = vst.msk [vmem:[%s9046_s14 + $0x8b8] sm:$0xff] %vm6471_vm1, %v4039_v62  ;;  %7378 = vst.msk [vmem:[%s9046_s14 + $0x1c58] sm:$0xff] %vm6471_vm1, %v5609_v63 }
 0x30c   : > { %v4043_v1 = vpop.f32.mrf.mxu0  ;;  %8196 = vmatmul.mubr.msk.bf16.gmra.mxu0 %vm2369_vm0, %v8631_v60  ;;  %v5613_v2 = vpop.f32.mrf.mxu1  ;;  %8353 = vmatmul.mubr.msk.bf16.gmra.mxu1 %vm2369_vm0, %v8632_v61 }
 0x30d   : > { %6751 = vst [vmem:[%s9046_s14 + $0x8c0] sm:$0xff] %v4043_v1  ;;  %7379 = vst [vmem:[%s9046_s14 + $0x1c60] sm:$0xff] %v5613_v2  ;;  %4291 = vmatprep.mubr.bf16.mxu0 %v8764_v0  ;;  %5861 = vmatprep.mubr.bf16.mxu1 %v8764_v0 }
 0x30e   : > { %v4045_v3 = vpop.f32.mrf.mxu0  ;;  %v5615_v4 = vpop.f32.mrf.mxu1 }
 0x30f   : > { %6752 = vst.msk [vmem:[%s9046_s14 + $0x8c8] sm:$0xff] %vm6471_vm1, %v4045_v3  ;;  %7380 = vst.msk [vmem:[%s9046_s14 + $0x1c68] sm:$0xff] %vm6471_vm1, %v5615_v4  ;;  %v8645_v4 = vld [vmem:[%s12243_s0 + $0x328] sm:$0xff]  }
 0x310   : > { %v4047_v5 = vpop.f32.mrf.mxu0  ;;  %v5617_v6 = vpop.f32.mrf.mxu1 }
 0x311   : > { %6753 = vst [vmem:[%s9046_s14 + $0x8d0] sm:$0xff] %v4047_v5  ;;  %7381 = vst [vmem:[%s9046_s14 + $0x1c70] sm:$0xff] %v5617_v6  ;;  %v8646_v5 = vld [vmem:[%s12243_s0 + $0x810] sm:$0xff]  }
 0x312   : > { %v4049_v9 = vpop.f32.mrf.mxu0  ;;  %v5619_v10 = vpop.f32.mrf.mxu1 }
 0x313   : > { %6754 = vst.msk [vmem:[%s9046_s14 + $0x8d8] sm:$0xff] %vm6471_vm1, %v4049_v9  ;;  %7382 = vst.msk [vmem:[%s9046_s14 + $0x1c78] sm:$0xff] %vm6471_vm1, %v5619_v10 }
 0x314   : > { %v4053_v11 = vpop.f32.mrf.mxu0  ;;  %8197 = vmatmul.mubr.msk.bf16.gmra.mxu0 %vm2369_vm0, %v8633_v7  ;;  %v5623_v12 = vpop.f32.mrf.mxu1  ;;  %8354 = vmatmul.mubr.msk.bf16.gmra.mxu1 %vm2369_vm0, %v8634_v8 }
 0x315   : > { %6755 = vst [vmem:[%s9046_s14 + $0x8e0] sm:$0xff] %v4053_v11  ;;  %7383 = vst [vmem:[%s9046_s14 + $0x1c80] sm:$0xff] %v5623_v12  ;;  %4301 = vmatprep.mubr.bf16.mxu0 %v8764_v0  ;;  %5871 = vmatprep.mubr.bf16.mxu1 %v8764_v0 }
 0x316   : > { %v4055_v13 = vpop.f32.mrf.mxu0  ;;  %v5625_v14 = vpop.f32.mrf.mxu1 }
 0x317   : > { %6756 = vst.msk [vmem:[%s9046_s14 + $0x8e8] sm:$0xff] %vm6471_vm1, %v4055_v13  ;;  %7384 = vst.msk [vmem:[%s9046_s14 + $0x1c88] sm:$0xff] %vm6471_vm1, %v5625_v14  ;;  %v8647_v14 = vld [vmem:[%s12243_s0 + $0x330] sm:$0xff]  }
 0x318   : > { %v4057_v15 = vpop.f32.mrf.mxu0  ;;  %v5627_v16 = vpop.f32.mrf.mxu1 }
 0x319   : > { %6757 = vst [vmem:[%s9046_s14 + $0x8f0] sm:$0xff] %v4057_v15  ;;  %7385 = vst [vmem:[%s9046_s14 + $0x1c90] sm:$0xff] %v5627_v16  ;;  %v8648_v15 = vld [vmem:[%s12243_s0 + $0x818] sm:$0xff]  }
 0x31a   : > { %v4059_v19 = vpop.f32.mrf.mxu0  ;;  %v5629_v20 = vpop.f32.mrf.mxu1 }
 0x31b   : > { %6758 = vst.msk [vmem:[%s9046_s14 + $0x8f8] sm:$0xff] %vm6471_vm1, %v4059_v19  ;;  %7386 = vst.msk [vmem:[%s9046_s14 + $0x1c98] sm:$0xff] %vm6471_vm1, %v5629_v20 }
 0x31c   : > { %v4063_v21 = vpop.f32.mrf.mxu0  ;;  %8198 = vmatmul.mubr.msk.bf16.gmra.mxu0 %vm2369_vm0, %v8635_v17  ;;  %v5633_v22 = vpop.f32.mrf.mxu1  ;;  %8355 = vmatmul.mubr.msk.bf16.gmra.mxu1 %vm2369_vm0, %v8636_v18 }
 0x31d   : > { %6759 = vst [vmem:[%s9046_s14 + $0x900] sm:$0xff] %v4063_v21  ;;  %7387 = vst [vmem:[%s9046_s14 + $0x1ca0] sm:$0xff] %v5633_v22  ;;  %4311 = vmatprep.mubr.bf16.mxu0 %v8764_v0  ;;  %5881 = vmatprep.mubr.bf16.mxu1 %v8764_v0 }
 0x31e   : > { %v4065_v23 = vpop.f32.mrf.mxu0  ;;  %v5635_v24 = vpop.f32.mrf.mxu1 }
 0x31f   : > { %6760 = vst.msk [vmem:[%s9046_s14 + $0x908] sm:$0xff] %vm6471_vm1, %v4065_v23  ;;  %7388 = vst.msk [vmem:[%s9046_s14 + $0x1ca8] sm:$0xff] %vm6471_vm1, %v5635_v24  ;;  %v8649_v24 = vld [vmem:[%s12243_s0 + $0x338] sm:$0xff]  }
 0x320   : > { %v4067_v25 = vpop.f32.mrf.mxu0  ;;  %v5637_v26 = vpop.f32.mrf.mxu1 }
 0x321   : > { %6761 = vst [vmem:[%s9046_s14 + $0x910] sm:$0xff] %v4067_v25  ;;  %7389 = vst [vmem:[%s9046_s14 + $0x1cb0] sm:$0xff] %v5637_v26  ;;  %v8650_v25 = vld [vmem:[%s12243_s0 + $0x820] sm:$0xff]  }
 0x322   : > { %v4069_v29 = vpop.f32.mrf.mxu0  ;;  %v5639_v30 = vpop.f32.mrf.mxu1 }
 0x323   : > { %6762 = vst.msk [vmem:[%s9046_s14 + $0x918] sm:$0xff] %vm6471_vm1, %v4069_v29  ;;  %7390 = vst.msk [vmem:[%s9046_s14 + $0x1cb8] sm:$0xff] %vm6471_vm1, %v5639_v30 }
 0x324   : > { %v4073_v31 = vpop.f32.mrf.mxu0  ;;  %8199 = vmatmul.mubr.msk.bf16.gmra.mxu0 %vm2369_vm0, %v8637_v27  ;;  %v5643_v32 = vpop.f32.mrf.mxu1  ;;  %8356 = vmatmul.mubr.msk.bf16.gmra.mxu1 %vm2369_vm0, %v8638_v28 }
 0x325   : > { %6763 = vst [vmem:[%s9046_s14 + $0x920] sm:$0xff] %v4073_v31  ;;  %7391 = vst [vmem:[%s9046_s14 + $0x1cc0] sm:$0xff] %v5643_v32  ;;  %4321 = vmatprep.mubr.bf16.mxu0 %v8764_v0  ;;  %5891 = vmatprep.mubr.bf16.mxu1 %v8764_v0 }
 0x326   : > { %v4075_v33 = vpop.f32.mrf.mxu0  ;;  %v5645_v34 = vpop.f32.mrf.mxu1 }
 0x327   : > { %6764 = vst.msk [vmem:[%s9046_s14 + $0x928] sm:$0xff] %vm6471_vm1, %v4075_v33  ;;  %7392 = vst.msk [vmem:[%s9046_s14 + $0x1cc8] sm:$0xff] %vm6471_vm1, %v5645_v34  ;;  %v8651_v34 = vld [vmem:[%s12243_s0 + $0x340] sm:$0xff]  }
 0x328   : > { %v4077_v35 = vpop.f32.mrf.mxu0  ;;  %v5647_v36 = vpop.f32.mrf.mxu1 }
 0x329   : > { %6765 = vst [vmem:[%s9046_s14 + $0x930] sm:$0xff] %v4077_v35  ;;  %7393 = vst [vmem:[%s9046_s14 + $0x1cd0] sm:$0xff] %v5647_v36  ;;  %v8652_v35 = vld [vmem:[%s12243_s0 + $0x828] sm:$0xff]  }
 0x32a   : > { %v4079_v39 = vpop.f32.mrf.mxu0  ;;  %v5649_v40 = vpop.f32.mrf.mxu1 }
 0x32b   : > { %6766 = vst.msk [vmem:[%s9046_s14 + $0x938] sm:$0xff] %vm6471_vm1, %v4079_v39  ;;  %7394 = vst.msk [vmem:[%s9046_s14 + $0x1cd8] sm:$0xff] %vm6471_vm1, %v5649_v40 }
 0x32c   : > { %v4083_v41 = vpop.f32.mrf.mxu0  ;;  %8200 = vmatmul.mubr.msk.bf16.gmra.mxu0 %vm2369_vm0, %v8639_v37  ;;  %v5653_v42 = vpop.f32.mrf.mxu1  ;;  %8357 = vmatmul.mubr.msk.bf16.gmra.mxu1 %vm2369_vm0, %v8640_v38 }
 0x32d   : > { %6767 = vst [vmem:[%s9046_s14 + $0x940] sm:$0xff] %v4083_v41  ;;  %7395 = vst [vmem:[%s9046_s14 + $0x1ce0] sm:$0xff] %v5653_v42  ;;  %4331 = vmatprep.mubr.bf16.mxu0 %v8764_v0  ;;  %5901 = vmatprep.mubr.bf16.mxu1 %v8764_v0 }
 0x32e   : > { %v4085_v43 = vpop.f32.mrf.mxu0  ;;  %v5655_v44 = vpop.f32.mrf.mxu1 }
 0x32f   : > { %6768 = vst.msk [vmem:[%s9046_s14 + $0x948] sm:$0xff] %vm6471_vm1, %v4085_v43  ;;  %7396 = vst.msk [vmem:[%s9046_s14 + $0x1ce8] sm:$0xff] %vm6471_vm1, %v5655_v44  ;;  %v8653_v44 = vld [vmem:[%s12243_s0 + $0x348] sm:$0xff]  }
 0x330   : > { %v4087_v45 = vpop.f32.mrf.mxu0  ;;  %v5657_v46 = vpop.f32.mrf.mxu1 }
 0x331   : > { %6769 = vst [vmem:[%s9046_s14 + $0x950] sm:$0xff] %v4087_v45  ;;  %7397 = vst [vmem:[%s9046_s14 + $0x1cf0] sm:$0xff] %v5657_v46  ;;  %v8654_v45 = vld [vmem:[%s12243_s0 + $0x830] sm:$0xff]  }
 0x332   : > { %v4089_v49 = vpop.f32.mrf.mxu0  ;;  %v5659_v50 = vpop.f32.mrf.mxu1 }
 0x333   : > { %6770 = vst.msk [vmem:[%s9046_s14 + $0x958] sm:$0xff] %vm6471_vm1, %v4089_v49  ;;  %7398 = vst.msk [vmem:[%s9046_s14 + $0x1cf8] sm:$0xff] %vm6471_vm1, %v5659_v50 }
 0x334   : > { %v4093_v51 = vpop.f32.mrf.mxu0  ;;  %8201 = vmatmul.mubr.msk.bf16.gmra.mxu0 %vm2369_vm0, %v8641_v47  ;;  %v5663_v52 = vpop.f32.mrf.mxu1  ;;  %8358 = vmatmul.mubr.msk.bf16.gmra.mxu1 %vm2369_vm0, %v8642_v48 }
 0x335   : > { %6771 = vst [vmem:[%s9046_s14 + $0x960] sm:$0xff] %v4093_v51  ;;  %7399 = vst [vmem:[%s9046_s14 + $0x1d00] sm:$0xff] %v5663_v52  ;;  %4341 = vmatprep.mubr.bf16.mxu0 %v8764_v0  ;;  %5911 = vmatprep.mubr.bf16.mxu1 %v8764_v0 }
 0x336   : > { %v4095_v53 = vpop.f32.mrf.mxu0  ;;  %v5665_v54 = vpop.f32.mrf.mxu1 }
 0x337   : > { %6772 = vst.msk [vmem:[%s9046_s14 + $0x968] sm:$0xff] %vm6471_vm1, %v4095_v53  ;;  %7400 = vst.msk [vmem:[%s9046_s14 + $0x1d08] sm:$0xff] %vm6471_vm1, %v5665_v54  ;;  %v8655_v54 = vld [vmem:[%s12243_s0 + $0x350] sm:$0xff]  }
 0x338   : > { %v4097_v55 = vpop.f32.mrf.mxu0  ;;  %v5667_v56 = vpop.f32.mrf.mxu1 }
 0x339   : > { %6773 = vst [vmem:[%s9046_s14 + $0x970] sm:$0xff] %v4097_v55  ;;  %7401 = vst [vmem:[%s9046_s14 + $0x1d10] sm:$0xff] %v5667_v56  ;;  %v8656_v55 = vld [vmem:[%s12243_s0 + $0x838] sm:$0xff]  }
 0x33a   : > { %v4099_v59 = vpop.f32.mrf.mxu0  ;;  %v5669_v60 = vpop.f32.mrf.mxu1 }
 0x33b   : > { %6774 = vst.msk [vmem:[%s9046_s14 + $0x978] sm:$0xff] %vm6471_vm1, %v4099_v59  ;;  %7402 = vst.msk [vmem:[%s9046_s14 + $0x1d18] sm:$0xff] %vm6471_vm1, %v5669_v60 }
 0x33c   : > { %v4103_v61 = vpop.f32.mrf.mxu0  ;;  %8202 = vmatmul.mubr.msk.bf16.gmra.mxu0 %vm2369_vm0, %v8643_v57  ;;  %v5673_v62 = vpop.f32.mrf.mxu1  ;;  %8359 = vmatmul.mubr.msk.bf16.gmra.mxu1 %vm2369_vm0, %v8644_v58 }
 0x33d   : > { %6775 = vst [vmem:[%s9046_s14 + $0x980] sm:$0xff] %v4103_v61  ;;  %7403 = vst [vmem:[%s9046_s14 + $0x1d20] sm:$0xff] %v5673_v62  ;;  %4351 = vmatprep.mubr.bf16.mxu0 %v8764_v0  ;;  %5921 = vmatprep.mubr.bf16.mxu1 %v8764_v0 }
 0x33e   : > { %v4105_v63 = vpop.f32.mrf.mxu0  ;;  %v5675_v1 = vpop.f32.mrf.mxu1 }
 0x33f   : > { %6776 = vst.msk [vmem:[%s9046_s14 + $0x988] sm:$0xff] %vm6471_vm1, %v4105_v63  ;;  %7404 = vst.msk [vmem:[%s9046_s14 + $0x1d28] sm:$0xff] %vm6471_vm1, %v5675_v1  ;;  %v8657_v1 = vld [vmem:[%s12243_s0 + $0x358] sm:$0xff]  }
 0x340   : > { %v4107_v2 = vpop.f32.mrf.mxu0  ;;  %v5677_v3 = vpop.f32.mrf.mxu1 }
 0x341   : > { %6777 = vst [vmem:[%s9046_s14 + $0x990] sm:$0xff] %v4107_v2  ;;  %7405 = vst [vmem:[%s9046_s14 + $0x1d30] sm:$0xff] %v5677_v3  ;;  %v8658_v2 = vld [vmem:[%s12243_s0 + $0x840] sm:$0xff]  }
 0x342   : > { %v4109_v6 = vpop.f32.mrf.mxu0  ;;  %v5679_v7 = vpop.f32.mrf.mxu1 }
 0x343   : > { %6778 = vst.msk [vmem:[%s9046_s14 + $0x998] sm:$0xff] %vm6471_vm1, %v4109_v6  ;;  %7406 = vst.msk [vmem:[%s9046_s14 + $0x1d38] sm:$0xff] %vm6471_vm1, %v5679_v7 }
 0x344   : > { %v4113_v8 = vpop.f32.mrf.mxu0  ;;  %8203 = vmatmul.mubr.msk.bf16.gmra.mxu0 %vm2369_vm0, %v8645_v4  ;;  %v5683_v9 = vpop.f32.mrf.mxu1  ;;  %8360 = vmatmul.mubr.msk.bf16.gmra.mxu1 %vm2369_vm0, %v8646_v5 }
 0x345   : > { %6779 = vst [vmem:[%s9046_s14 + $0x9a0] sm:$0xff] %v4113_v8  ;;  %7407 = vst [vmem:[%s9046_s14 + $0x1d40] sm:$0xff] %v5683_v9  ;;  %4361 = vmatprep.mubr.bf16.mxu0 %v8764_v0  ;;  %5931 = vmatprep.mubr.bf16.mxu1 %v8764_v0 }
 0x346   : > { %v4115_v10 = vpop.f32.mrf.mxu0  ;;  %v5685_v11 = vpop.f32.mrf.mxu1 }
 0x347   : > { %6780 = vst.msk [vmem:[%s9046_s14 + $0x9a8] sm:$0xff] %vm6471_vm1, %v4115_v10  ;;  %7408 = vst.msk [vmem:[%s9046_s14 + $0x1d48] sm:$0xff] %vm6471_vm1, %v5685_v11  ;;  %v8659_v11 = vld [vmem:[%s12243_s0 + $0x360] sm:$0xff]  }
 0x348   : > { %v4117_v12 = vpop.f32.mrf.mxu0  ;;  %v5687_v13 = vpop.f32.mrf.mxu1 }
 0x349   : > { %6781 = vst [vmem:[%s9046_s14 + $0x9b0] sm:$0xff] %v4117_v12  ;;  %7409 = vst [vmem:[%s9046_s14 + $0x1d50] sm:$0xff] %v5687_v13  ;;  %v8660_v12 = vld [vmem:[%s12243_s0 + $0x848] sm:$0xff]  }
 0x34a   : > { %v4119_v16 = vpop.f32.mrf.mxu0  ;;  %v5689_v17 = vpop.f32.mrf.mxu1 }
 0x34b   : > { %6782 = vst.msk [vmem:[%s9046_s14 + $0x9b8] sm:$0xff] %vm6471_vm1, %v4119_v16  ;;  %7410 = vst.msk [vmem:[%s9046_s14 + $0x1d58] sm:$0xff] %vm6471_vm1, %v5689_v17 }
 0x34c   : > { %v4123_v18 = vpop.f32.mrf.mxu0  ;;  %8204 = vmatmul.mubr.msk.bf16.gmra.mxu0 %vm2369_vm0, %v8647_v14  ;;  %v5693_v19 = vpop.f32.mrf.mxu1  ;;  %8361 = vmatmul.mubr.msk.bf16.gmra.mxu1 %vm2369_vm0, %v8648_v15 }
 0x34d   : > { %6783 = vst [vmem:[%s9046_s14 + $0x9c0] sm:$0xff] %v4123_v18  ;;  %7411 = vst [vmem:[%s9046_s14 + $0x1d60] sm:$0xff] %v5693_v19  ;;  %4371 = vmatprep.mubr.bf16.mxu0 %v8764_v0  ;;  %5941 = vmatprep.mubr.bf16.mxu1 %v8764_v0 }
 0x34e   : > { %v4125_v20 = vpop.f32.mrf.mxu0  ;;  %v5695_v21 = vpop.f32.mrf.mxu1 }
 0x34f   : > { %6784 = vst.msk [vmem:[%s9046_s14 + $0x9c8] sm:$0xff] %vm6471_vm1, %v4125_v20  ;;  %7412 = vst.msk [vmem:[%s9046_s14 + $0x1d68] sm:$0xff] %vm6471_vm1, %v5695_v21  ;;  %v8661_v21 = vld [vmem:[%s12243_s0 + $0x368] sm:$0xff]  }
 0x350   : > { %v4127_v22 = vpop.f32.mrf.mxu0  ;;  %v5697_v23 = vpop.f32.mrf.mxu1 }
 0x351   : > { %6785 = vst [vmem:[%s9046_s14 + $0x9d0] sm:$0xff] %v4127_v22  ;;  %7413 = vst [vmem:[%s9046_s14 + $0x1d70] sm:$0xff] %v5697_v23  ;;  %v8662_v22 = vld [vmem:[%s12243_s0 + $0x850] sm:$0xff]  }
 0x352   : > { %v4129_v26 = vpop.f32.mrf.mxu0  ;;  %v5699_v27 = vpop.f32.mrf.mxu1 }
 0x353   : > { %6786 = vst.msk [vmem:[%s9046_s14 + $0x9d8] sm:$0xff] %vm6471_vm1, %v4129_v26  ;;  %7414 = vst.msk [vmem:[%s9046_s14 + $0x1d78] sm:$0xff] %vm6471_vm1, %v5699_v27 }
 0x354   : > { %v4133_v28 = vpop.f32.mrf.mxu0  ;;  %8205 = vmatmul.mubr.msk.bf16.gmra.mxu0 %vm2369_vm0, %v8649_v24  ;;  %v5703_v29 = vpop.f32.mrf.mxu1  ;;  %8362 = vmatmul.mubr.msk.bf16.gmra.mxu1 %vm2369_vm0, %v8650_v25 }
 0x355   : > { %6787 = vst [vmem:[%s9046_s14 + $0x9e0] sm:$0xff] %v4133_v28  ;;  %7415 = vst [vmem:[%s9046_s14 + $0x1d80] sm:$0xff] %v5703_v29  ;;  %4381 = vmatprep.mubr.bf16.mxu0 %v8764_v0  ;;  %5951 = vmatprep.mubr.bf16.mxu1 %v8764_v0 }
 0x356   : > { %v4135_v30 = vpop.f32.mrf.mxu0  ;;  %v5705_v31 = vpop.f32.mrf.mxu1 }
 0x357   : > { %6788 = vst.msk [vmem:[%s9046_s14 + $0x9e8] sm:$0xff] %vm6471_vm1, %v4135_v30  ;;  %7416 = vst.msk [vmem:[%s9046_s14 + $0x1d88] sm:$0xff] %vm6471_vm1, %v5705_v31  ;;  %v8663_v31 = vld [vmem:[%s12243_s0 + $0x370] sm:$0xff]  }
 0x358   : > { %v4137_v32 = vpop.f32.mrf.mxu0  ;;  %v5707_v33 = vpop.f32.mrf.mxu1 }
 0x359   : > { %6789 = vst [vmem:[%s9046_s14 + $0x9f0] sm:$0xff] %v4137_v32  ;;  %7417 = vst [vmem:[%s9046_s14 + $0x1d90] sm:$0xff] %v5707_v33  ;;  %v8664_v32 = vld [vmem:[%s12243_s0 + $0x858] sm:$0xff]  }
 0x35a   : > { %v4139_v36 = vpop.f32.mrf.mxu0  ;;  %v5709_v37 = vpop.f32.mrf.mxu1 }
 0x35b   : > { %6790 = vst.msk [vmem:[%s9046_s14 + $0x9f8] sm:$0xff] %vm6471_vm1, %v4139_v36  ;;  %7418 = vst.msk [vmem:[%s9046_s14 + $0x1d98] sm:$0xff] %vm6471_vm1, %v5709_v37 }
 0x35c   : > { %v4143_v38 = vpop.f32.mrf.mxu0  ;;  %8206 = vmatmul.mubr.msk.bf16.gmra.mxu0 %vm2369_vm0, %v8651_v34  ;;  %v5713_v39 = vpop.f32.mrf.mxu1  ;;  %8363 = vmatmul.mubr.msk.bf16.gmra.mxu1 %vm2369_vm0, %v8652_v35 }
 0x35d   : > { %6791 = vst [vmem:[%s9046_s14 + $0xa00] sm:$0xff] %v4143_v38  ;;  %7419 = vst [vmem:[%s9046_s14 + $0x1da0] sm:$0xff] %v5713_v39  ;;  %4391 = vmatprep.mubr.bf16.mxu0 %v8764_v0  ;;  %5961 = vmatprep.mubr.bf16.mxu1 %v8764_v0 }
 0x35e   : > { %v4145_v40 = vpop.f32.mrf.mxu0  ;;  %v5715_v41 = vpop.f32.mrf.mxu1 }
 0x35f   : > { %6792 = vst.msk [vmem:[%s9046_s14 + $0xa08] sm:$0xff] %vm6471_vm1, %v4145_v40  ;;  %7420 = vst.msk [vmem:[%s9046_s14 + $0x1da8] sm:$0xff] %vm6471_vm1, %v5715_v41  ;;  %v8665_v41 = vld [vmem:[%s12243_s0 + $0x378] sm:$0xff]  }
 0x360   : > { %v4147_v42 = vpop.f32.mrf.mxu0  ;;  %v5717_v43 = vpop.f32.mrf.mxu1 }
 0x361   : > { %6793 = vst [vmem:[%s9046_s14 + $0xa10] sm:$0xff] %v4147_v42  ;;  %7421 = vst [vmem:[%s9046_s14 + $0x1db0] sm:$0xff] %v5717_v43  ;;  %v8666_v42 = vld [vmem:[%s12243_s0 + $0x860] sm:$0xff]  }
 0x362   : > { %v4149_v46 = vpop.f32.mrf.mxu0  ;;  %v5719_v47 = vpop.f32.mrf.mxu1 }
 0x363   : > { %6794 = vst.msk [vmem:[%s9046_s14 + $0xa18] sm:$0xff] %vm6471_vm1, %v4149_v46  ;;  %7422 = vst.msk [vmem:[%s9046_s14 + $0x1db8] sm:$0xff] %vm6471_vm1, %v5719_v47 }
 0x364   : > { %v4153_v48 = vpop.f32.mrf.mxu0  ;;  %8207 = vmatmul.mubr.msk.bf16.gmra.mxu0 %vm2369_vm0, %v8653_v44  ;;  %v5723_v49 = vpop.f32.mrf.mxu1  ;;  %8364 = vmatmul.mubr.msk.bf16.gmra.mxu1 %vm2369_vm0, %v8654_v45 }
 0x365   : > { %6795 = vst [vmem:[%s9046_s14 + $0xa20] sm:$0xff] %v4153_v48  ;;  %7423 = vst [vmem:[%s9046_s14 + $0x1dc0] sm:$0xff] %v5723_v49  ;;  %4401 = vmatprep.mubr.bf16.mxu0 %v8764_v0  ;;  %5971 = vmatprep.mubr.bf16.mxu1 %v8764_v0 }
 0x366   : > { %v4155_v50 = vpop.f32.mrf.mxu0  ;;  %v5725_v51 = vpop.f32.mrf.mxu1 }
 0x367   : > { %6796 = vst.msk [vmem:[%s9046_s14 + $0xa28] sm:$0xff] %vm6471_vm1, %v4155_v50  ;;  %7424 = vst.msk [vmem:[%s9046_s14 + $0x1dc8] sm:$0xff] %vm6471_vm1, %v5725_v51  ;;  %v8667_v51 = vld [vmem:[%s12243_s0 + $0x380] sm:$0xff]  }
 0x368   : > { %v4157_v52 = vpop.f32.mrf.mxu0  ;;  %v5727_v53 = vpop.f32.mrf.mxu1 }
 0x369   : > { %6797 = vst [vmem:[%s9046_s14 + $0xa30] sm:$0xff] %v4157_v52  ;;  %7425 = vst [vmem:[%s9046_s14 + $0x1dd0] sm:$0xff] %v5727_v53  ;;  %v8668_v52 = vld [vmem:[%s12243_s0 + $0x868] sm:$0xff]  }
 0x36a   : > { %v4159_v56 = vpop.f32.mrf.mxu0  ;;  %v5729_v57 = vpop.f32.mrf.mxu1 }
 0x36b   : > { %6798 = vst.msk [vmem:[%s9046_s14 + $0xa38] sm:$0xff] %vm6471_vm1, %v4159_v56  ;;  %7426 = vst.msk [vmem:[%s9046_s14 + $0x1dd8] sm:$0xff] %vm6471_vm1, %v5729_v57 }
 0x36c   : > { %v4163_v58 = vpop.f32.mrf.mxu0  ;;  %8208 = vmatmul.mubr.msk.bf16.gmra.mxu0 %vm2369_vm0, %v8655_v54  ;;  %v5733_v59 = vpop.f32.mrf.mxu1  ;;  %8365 = vmatmul.mubr.msk.bf16.gmra.mxu1 %vm2369_vm0, %v8656_v55 }
 0x36d   : > { %6799 = vst [vmem:[%s9046_s14 + $0xa40] sm:$0xff] %v4163_v58  ;;  %7427 = vst [vmem:[%s9046_s14 + $0x1de0] sm:$0xff] %v5733_v59  ;;  %4411 = vmatprep.mubr.bf16.mxu0 %v8764_v0  ;;  %5981 = vmatprep.mubr.bf16.mxu1 %v8764_v0 }
 0x36e   : > { %v4165_v60 = vpop.f32.mrf.mxu0  ;;  %v5735_v61 = vpop.f32.mrf.mxu1 }
 0x36f   : > { %6800 = vst.msk [vmem:[%s9046_s14 + $0xa48] sm:$0xff] %vm6471_vm1, %v4165_v60  ;;  %7428 = vst.msk [vmem:[%s9046_s14 + $0x1de8] sm:$0xff] %vm6471_vm1, %v5735_v61  ;;  %v8669_v61 = vld [vmem:[%s12243_s0 + $0x388] sm:$0xff]  }
 0x370   : > { %v4167_v62 = vpop.f32.mrf.mxu0  ;;  %v5737_v63 = vpop.f32.mrf.mxu1 }
 0x371   : > { %6801 = vst [vmem:[%s9046_s14 + $0xa50] sm:$0xff] %v4167_v62  ;;  %7429 = vst [vmem:[%s9046_s14 + $0x1df0] sm:$0xff] %v5737_v63  ;;  %v8670_v62 = vld [vmem:[%s12243_s0 + $0x870] sm:$0xff]  }
 0x372   : > { %v4169_v3 = vpop.f32.mrf.mxu0  ;;  %v5739_v4 = vpop.f32.mrf.mxu1 }
 0x373   : > { %6802 = vst.msk [vmem:[%s9046_s14 + $0xa58] sm:$0xff] %vm6471_vm1, %v4169_v3  ;;  %7430 = vst.msk [vmem:[%s9046_s14 + $0x1df8] sm:$0xff] %vm6471_vm1, %v5739_v4 }
 0x374   : > { %v4173_v5 = vpop.f32.mrf.mxu0  ;;  %8209 = vmatmul.mubr.msk.bf16.gmra.mxu0 %vm2369_vm0, %v8657_v1  ;;  %v5743_v6 = vpop.f32.mrf.mxu1  ;;  %8366 = vmatmul.mubr.msk.bf16.gmra.mxu1 %vm2369_vm0, %v8658_v2 }
 0x375   : > { %6803 = vst [vmem:[%s9046_s14 + $0xa60] sm:$0xff] %v4173_v5  ;;  %7431 = vst [vmem:[%s9046_s14 + $0x1e00] sm:$0xff] %v5743_v6  ;;  %4421 = vmatprep.mubr.bf16.mxu0 %v8764_v0  ;;  %5991 = vmatprep.mubr.bf16.mxu1 %v8764_v0 }
 0x376   : > { %v4175_v7 = vpop.f32.mrf.mxu0  ;;  %v5745_v8 = vpop.f32.mrf.mxu1 }
 0x377   : > { %6804 = vst.msk [vmem:[%s9046_s14 + $0xa68] sm:$0xff] %vm6471_vm1, %v4175_v7  ;;  %7432 = vst.msk [vmem:[%s9046_s14 + $0x1e08] sm:$0xff] %vm6471_vm1, %v5745_v8  ;;  %v8671_v8 = vld [vmem:[%s12243_s0 + $0x390] sm:$0xff]  }
 0x378   : > { %v4177_v9 = vpop.f32.mrf.mxu0  ;;  %v5747_v10 = vpop.f32.mrf.mxu1 }
 0x379   : > { %6805 = vst [vmem:[%s9046_s14 + $0xa70] sm:$0xff] %v4177_v9  ;;  %7433 = vst [vmem:[%s9046_s14 + $0x1e10] sm:$0xff] %v5747_v10  ;;  %v8672_v9 = vld [vmem:[%s12243_s0 + $0x878] sm:$0xff]  }
 0x37a   : > { %v4179_v13 = vpop.f32.mrf.mxu0  ;;  %v5749_v14 = vpop.f32.mrf.mxu1 }
 0x37b   : > { %6806 = vst.msk [vmem:[%s9046_s14 + $0xa78] sm:$0xff] %vm6471_vm1, %v4179_v13  ;;  %7434 = vst.msk [vmem:[%s9046_s14 + $0x1e18] sm:$0xff] %vm6471_vm1, %v5749_v14 }
 0x37c   : > { %v4183_v15 = vpop.f32.mrf.mxu0  ;;  %8210 = vmatmul.mubr.msk.bf16.gmra.mxu0 %vm2369_vm0, %v8659_v11  ;;  %v5753_v16 = vpop.f32.mrf.mxu1  ;;  %8367 = vmatmul.mubr.msk.bf16.gmra.mxu1 %vm2369_vm0, %v8660_v12 }
 0x37d   : > { %6807 = vst [vmem:[%s9046_s14 + $0xa80] sm:$0xff] %v4183_v15  ;;  %7435 = vst [vmem:[%s9046_s14 + $0x1e20] sm:$0xff] %v5753_v16  ;;  %4431 = vmatprep.mubr.bf16.mxu0 %v8764_v0  ;;  %6001 = vmatprep.mubr.bf16.mxu1 %v8764_v0 }
 0x37e   : > { %v4185_v17 = vpop.f32.mrf.mxu0  ;;  %v5755_v18 = vpop.f32.mrf.mxu1 }
 0x37f   : > { %6808 = vst.msk [vmem:[%s9046_s14 + $0xa88] sm:$0xff] %vm6471_vm1, %v4185_v17  ;;  %7436 = vst.msk [vmem:[%s9046_s14 + $0x1e28] sm:$0xff] %vm6471_vm1, %v5755_v18  ;;  %v8673_v18 = vld [vmem:[%s12243_s0 + $0x398] sm:$0xff]  }
 0x380   : > { %v4187_v19 = vpop.f32.mrf.mxu0  ;;  %v5757_v20 = vpop.f32.mrf.mxu1 }
 0x381   : > { %6809 = vst [vmem:[%s9046_s14 + $0xa90] sm:$0xff] %v4187_v19  ;;  %7437 = vst [vmem:[%s9046_s14 + $0x1e30] sm:$0xff] %v5757_v20  ;;  %v8674_v19 = vld [vmem:[%s12243_s0 + $0x880] sm:$0xff]  }
 0x382   : > { %v4189_v23 = vpop.f32.mrf.mxu0  ;;  %v5759_v24 = vpop.f32.mrf.mxu1 }
 0x383   : > { %6810 = vst.msk [vmem:[%s9046_s14 + $0xa98] sm:$0xff] %vm6471_vm1, %v4189_v23  ;;  %7438 = vst.msk [vmem:[%s9046_s14 + $0x1e38] sm:$0xff] %vm6471_vm1, %v5759_v24 }
 0x384   : > { %v4193_v25 = vpop.f32.mrf.mxu0  ;;  %8211 = vmatmul.mubr.msk.bf16.gmra.mxu0 %vm2369_vm0, %v8661_v21  ;;  %v5763_v26 = vpop.f32.mrf.mxu1  ;;  %8368 = vmatmul.mubr.msk.bf16.gmra.mxu1 %vm2369_vm0, %v8662_v22 }
 0x385   : > { %6811 = vst [vmem:[%s9046_s14 + $0xaa0] sm:$0xff] %v4193_v25  ;;  %7439 = vst [vmem:[%s9046_s14 + $0x1e40] sm:$0xff] %v5763_v26  ;;  %4441 = vmatprep.mubr.bf16.mxu0 %v8764_v0  ;;  %6011 = vmatprep.mubr.bf16.mxu1 %v8764_v0 }
 0x386   : > { %v4195_v27 = vpop.f32.mrf.mxu0  ;;  %v5765_v28 = vpop.f32.mrf.mxu1 }
 0x387   : > { %6812 = vst.msk [vmem:[%s9046_s14 + $0xaa8] sm:$0xff] %vm6471_vm1, %v4195_v27  ;;  %7440 = vst.msk [vmem:[%s9046_s14 + $0x1e48] sm:$0xff] %vm6471_vm1, %v5765_v28  ;;  %v8675_v28 = vld [vmem:[%s12243_s0 + $0x3a0] sm:$0xff]  }
 0x388   : > { %v4197_v29 = vpop.f32.mrf.mxu0  ;;  %v5767_v30 = vpop.f32.mrf.mxu1 }
 0x389   : > { %6813 = vst [vmem:[%s9046_s14 + $0xab0] sm:$0xff] %v4197_v29  ;;  %7441 = vst [vmem:[%s9046_s14 + $0x1e50] sm:$0xff] %v5767_v30  ;;  %v8676_v29 = vld [vmem:[%s12243_s0 + $0x888] sm:$0xff]  }
 0x38a   : > { %v4199_v33 = vpop.f32.mrf.mxu0  ;;  %v5769_v34 = vpop.f32.mrf.mxu1 }
 0x38b   : > { %6814 = vst.msk [vmem:[%s9046_s14 + $0xab8] sm:$0xff] %vm6471_vm1, %v4199_v33  ;;  %7442 = vst.msk [vmem:[%s9046_s14 + $0x1e58] sm:$0xff] %vm6471_vm1, %v5769_v34 }
 0x38c   : > { %v4203_v35 = vpop.f32.mrf.mxu0  ;;  %8212 = vmatmul.mubr.msk.bf16.gmra.mxu0 %vm2369_vm0, %v8663_v31  ;;  %v5773_v36 = vpop.f32.mrf.mxu1  ;;  %8369 = vmatmul.mubr.msk.bf16.gmra.mxu1 %vm2369_vm0, %v8664_v32 }
 0x38d   : > { %6815 = vst [vmem:[%s9046_s14 + $0xac0] sm:$0xff] %v4203_v35  ;;  %7443 = vst [vmem:[%s9046_s14 + $0x1e60] sm:$0xff] %v5773_v36  ;;  %4451 = vmatprep.mubr.bf16.mxu0 %v8764_v0  ;;  %6021 = vmatprep.mubr.bf16.mxu1 %v8764_v0 }
 0x38e   : > { %v4205_v37 = vpop.f32.mrf.mxu0  ;;  %v5775_v38 = vpop.f32.mrf.mxu1 }
 0x38f   : > { %6816 = vst.msk [vmem:[%s9046_s14 + $0xac8] sm:$0xff] %vm6471_vm1, %v4205_v37  ;;  %7444 = vst.msk [vmem:[%s9046_s14 + $0x1e68] sm:$0xff] %vm6471_vm1, %v5775_v38  ;;  %v8677_v38 = vld [vmem:[%s12243_s0 + $0x3a8] sm:$0xff]  }
 0x390   : > { %v4207_v39 = vpop.f32.mrf.mxu0  ;;  %v5777_v40 = vpop.f32.mrf.mxu1 }
 0x391   : > { %6817 = vst [vmem:[%s9046_s14 + $0xad0] sm:$0xff] %v4207_v39  ;;  %7445 = vst [vmem:[%s9046_s14 + $0x1e70] sm:$0xff] %v5777_v40  ;;  %v8678_v39 = vld [vmem:[%s12243_s0 + $0x890] sm:$0xff]  }
 0x392   : > { %v4209_v43 = vpop.f32.mrf.mxu0  ;;  %v5779_v44 = vpop.f32.mrf.mxu1 }
 0x393   : > { %6818 = vst.msk [vmem:[%s9046_s14 + $0xad8] sm:$0xff] %vm6471_vm1, %v4209_v43  ;;  %7446 = vst.msk [vmem:[%s9046_s14 + $0x1e78] sm:$0xff] %vm6471_vm1, %v5779_v44 }
 0x394   : > { %v4213_v45 = vpop.f32.mrf.mxu0  ;;  %8213 = vmatmul.mubr.msk.bf16.gmra.mxu0 %vm2369_vm0, %v8665_v41  ;;  %v5783_v46 = vpop.f32.mrf.mxu1  ;;  %8370 = vmatmul.mubr.msk.bf16.gmra.mxu1 %vm2369_vm0, %v8666_v42 }
 0x395   : > { %6819 = vst [vmem:[%s9046_s14 + $0xae0] sm:$0xff] %v4213_v45  ;;  %7447 = vst [vmem:[%s9046_s14 + $0x1e80] sm:$0xff] %v5783_v46  ;;  %4461 = vmatprep.mubr.bf16.mxu0 %v8764_v0  ;;  %6031 = vmatprep.mubr.bf16.mxu1 %v8764_v0 }
 0x396   : > { %v4215_v47 = vpop.f32.mrf.mxu0  ;;  %v5785_v48 = vpop.f32.mrf.mxu1 }
 0x397   : > { %6820 = vst.msk [vmem:[%s9046_s14 + $0xae8] sm:$0xff] %vm6471_vm1, %v4215_v47  ;;  %7448 = vst.msk [vmem:[%s9046_s14 + $0x1e88] sm:$0xff] %vm6471_vm1, %v5785_v48  ;;  %v8679_v48 = vld [vmem:[%s12243_s0 + $0x3b0] sm:$0xff]  }
 0x398   : > { %v4217_v49 = vpop.f32.mrf.mxu0  ;;  %v5787_v50 = vpop.f32.mrf.mxu1 }
 0x399   : > { %6821 = vst [vmem:[%s9046_s14 + $0xaf0] sm:$0xff] %v4217_v49  ;;  %7449 = vst [vmem:[%s9046_s14 + $0x1e90] sm:$0xff] %v5787_v50  ;;  %v8680_v49 = vld [vmem:[%s12243_s0 + $0x898] sm:$0xff]  }
 0x39a   : > { %v4219_v53 = vpop.f32.mrf.mxu0  ;;  %v5789_v54 = vpop.f32.mrf.mxu1 }
 0x39b   : > { %6822 = vst.msk [vmem:[%s9046_s14 + $0xaf8] sm:$0xff] %vm6471_vm1, %v4219_v53  ;;  %7450 = vst.msk [vmem:[%s9046_s14 + $0x1e98] sm:$0xff] %vm6471_vm1, %v5789_v54 }
 0x39c   : > { %v4223_v55 = vpop.f32.mrf.mxu0  ;;  %8214 = vmatmul.mubr.msk.bf16.gmra.mxu0 %vm2369_vm0, %v8667_v51  ;;  %v5793_v56 = vpop.f32.mrf.mxu1  ;;  %8371 = vmatmul.mubr.msk.bf16.gmra.mxu1 %vm2369_vm0, %v8668_v52 }
 0x39d   : > { %6823 = vst [vmem:[%s9046_s14 + $0xb00] sm:$0xff] %v4223_v55  ;;  %7451 = vst [vmem:[%s9046_s14 + $0x1ea0] sm:$0xff] %v5793_v56  ;;  %4471 = vmatprep.mubr.bf16.mxu0 %v8764_v0  ;;  %6041 = vmatprep.mubr.bf16.mxu1 %v8764_v0 }
 0x39e   : > { %v4225_v57 = vpop.f32.mrf.mxu0  ;;  %v5795_v58 = vpop.f32.mrf.mxu1 }
 0x39f   : > { %6824 = vst.msk [vmem:[%s9046_s14 + $0xb08] sm:$0xff] %vm6471_vm1, %v4225_v57  ;;  %7452 = vst.msk [vmem:[%s9046_s14 + $0x1ea8] sm:$0xff] %vm6471_vm1, %v5795_v58  ;;  %v8681_v58 = vld [vmem:[%s12243_s0 + $0x3b8] sm:$0xff]  }
 0x3a0   : > { %v4227_v59 = vpop.f32.mrf.mxu0  ;;  %v5797_v60 = vpop.f32.mrf.mxu1 }
 0x3a1   : > { %6825 = vst [vmem:[%s9046_s14 + $0xb10] sm:$0xff] %v4227_v59  ;;  %7453 = vst [vmem:[%s9046_s14 + $0x1eb0] sm:$0xff] %v5797_v60  ;;  %v8682_v59 = vld [vmem:[%s12243_s0 + $0x8a0] sm:$0xff]  }
 0x3a2   : > { %v4229_v63 = vpop.f32.mrf.mxu0  ;;  %v5799_v1 = vpop.f32.mrf.mxu1 }
 0x3a3   : > { %6826 = vst.msk [vmem:[%s9046_s14 + $0xb18] sm:$0xff] %vm6471_vm1, %v4229_v63  ;;  %7454 = vst.msk [vmem:[%s9046_s14 + $0x1eb8] sm:$0xff] %vm6471_vm1, %v5799_v1 }
 0x3a4   : > { %v4233_v2 = vpop.f32.mrf.mxu0  ;;  %8215 = vmatmul.mubr.msk.bf16.gmra.mxu0 %vm2369_vm0, %v8669_v61  ;;  %v5803_v3 = vpop.f32.mrf.mxu1  ;;  %8372 = vmatmul.mubr.msk.bf16.gmra.mxu1 %vm2369_vm0, %v8670_v62 }
 0x3a5   : > { %6827 = vst [vmem:[%s9046_s14 + $0xb20] sm:$0xff] %v4233_v2  ;;  %7455 = vst [vmem:[%s9046_s14 + $0x1ec0] sm:$0xff] %v5803_v3  ;;  %4481 = vmatprep.mubr.bf16.mxu0 %v8764_v0  ;;  %6051 = vmatprep.mubr.bf16.mxu1 %v8764_v0 }
 0x3a6   : > { %v4235_v4 = vpop.f32.mrf.mxu0  ;;  %v5805_v5 = vpop.f32.mrf.mxu1 }
 0x3a7   : > { %6828 = vst.msk [vmem:[%s9046_s14 + $0xb28] sm:$0xff] %vm6471_vm1, %v4235_v4  ;;  %7456 = vst.msk [vmem:[%s9046_s14 + $0x1ec8] sm:$0xff] %vm6471_vm1, %v5805_v5  ;;  %v8683_v5 = vld [vmem:[%s12243_s0 + $0x3c0] sm:$0xff]  }
 0x3a8   : > { %v4237_v6 = vpop.f32.mrf.mxu0  ;;  %v5807_v7 = vpop.f32.mrf.mxu1 }
 0x3a9   : > { %6829 = vst [vmem:[%s9046_s14 + $0xb30] sm:$0xff] %v4237_v6  ;;  %7457 = vst [vmem:[%s9046_s14 + $0x1ed0] sm:$0xff] %v5807_v7  ;;  %v8684_v6 = vld [vmem:[%s12243_s0 + $0x8a8] sm:$0xff]  }
 0x3aa   : > { %v4239_v10 = vpop.f32.mrf.mxu0  ;;  %v5809_v11 = vpop.f32.mrf.mxu1 }
 0x3ab   : > { %6830 = vst.msk [vmem:[%s9046_s14 + $0xb38] sm:$0xff] %vm6471_vm1, %v4239_v10  ;;  %7458 = vst.msk [vmem:[%s9046_s14 + $0x1ed8] sm:$0xff] %vm6471_vm1, %v5809_v11 }
 0x3ac   : > { %v4243_v12 = vpop.f32.mrf.mxu0  ;;  %8216 = vmatmul.mubr.msk.bf16.gmra.mxu0 %vm2369_vm0, %v8671_v8  ;;  %v5813_v13 = vpop.f32.mrf.mxu1  ;;  %8373 = vmatmul.mubr.msk.bf16.gmra.mxu1 %vm2369_vm0, %v8672_v9 }
 0x3ad   : > { %6831 = vst [vmem:[%s9046_s14 + $0xb40] sm:$0xff] %v4243_v12  ;;  %7459 = vst [vmem:[%s9046_s14 + $0x1ee0] sm:$0xff] %v5813_v13  ;;  %4491 = vmatprep.mubr.bf16.mxu0 %v8764_v0  ;;  %6061 = vmatprep.mubr.bf16.mxu1 %v8764_v0 }
 0x3ae   : > { %v4245_v14 = vpop.f32.mrf.mxu0  ;;  %v5815_v15 = vpop.f32.mrf.mxu1 }
 0x3af   : > { %6832 = vst.msk [vmem:[%s9046_s14 + $0xb48] sm:$0xff] %vm6471_vm1, %v4245_v14  ;;  %7460 = vst.msk [vmem:[%s9046_s14 + $0x1ee8] sm:$0xff] %vm6471_vm1, %v5815_v15  ;;  %v8685_v15 = vld [vmem:[%s12243_s0 + $0x3c8] sm:$0xff]  }
 0x3b0   : > { %v4247_v16 = vpop.f32.mrf.mxu0  ;;  %v5817_v17 = vpop.f32.mrf.mxu1 }
 0x3b1   : > { %6833 = vst [vmem:[%s9046_s14 + $0xb50] sm:$0xff] %v4247_v16  ;;  %7461 = vst [vmem:[%s9046_s14 + $0x1ef0] sm:$0xff] %v5817_v17  ;;  %v8686_v16 = vld [vmem:[%s12243_s0 + $0x8b0] sm:$0xff]  }
 0x3b2   : > { %v4249_v20 = vpop.f32.mrf.mxu0  ;;  %v5819_v21 = vpop.f32.mrf.mxu1 }
 0x3b3   : > { %6834 = vst.msk [vmem:[%s9046_s14 + $0xb58] sm:$0xff] %vm6471_vm1, %v4249_v20  ;;  %7462 = vst.msk [vmem:[%s9046_s14 + $0x1ef8] sm:$0xff] %vm6471_vm1, %v5819_v21 }
 0x3b4   : > { %v4253_v22 = vpop.f32.mrf.mxu0  ;;  %8217 = vmatmul.mubr.msk.bf16.gmra.mxu0 %vm2369_vm0, %v8673_v18  ;;  %v5823_v23 = vpop.f32.mrf.mxu1  ;;  %8374 = vmatmul.mubr.msk.bf16.gmra.mxu1 %vm2369_vm0, %v8674_v19 }
 0x3b5   : > { %6835 = vst [vmem:[%s9046_s14 + $0xb60] sm:$0xff] %v4253_v22  ;;  %7463 = vst [vmem:[%s9046_s14 + $0x1f00] sm:$0xff] %v5823_v23  ;;  %4501 = vmatprep.mubr.bf16.mxu0 %v8764_v0  ;;  %6071 = vmatprep.mubr.bf16.mxu1 %v8764_v0 }
 0x3b6   : > { %v4255_v24 = vpop.f32.mrf.mxu0  ;;  %v5825_v25 = vpop.f32.mrf.mxu1 }
 0x3b7   : > { %6836 = vst.msk [vmem:[%s9046_s14 + $0xb68] sm:$0xff] %vm6471_vm1, %v4255_v24  ;;  %7464 = vst.msk [vmem:[%s9046_s14 + $0x1f08] sm:$0xff] %vm6471_vm1, %v5825_v25  ;;  %v8687_v25 = vld [vmem:[%s12243_s0 + $0x3d0] sm:$0xff]  }
 0x3b8   : > { %v4257_v26 = vpop.f32.mrf.mxu0  ;;  %v5827_v27 = vpop.f32.mrf.mxu1 }
 0x3b9   : > { %6837 = vst [vmem:[%s9046_s14 + $0xb70] sm:$0xff] %v4257_v26  ;;  %7465 = vst [vmem:[%s9046_s14 + $0x1f10] sm:$0xff] %v5827_v27  ;;  %v8688_v26 = vld [vmem:[%s12243_s0 + $0x8b8] sm:$0xff]  }
 0x3ba   : > { %v4259_v30 = vpop.f32.mrf.mxu0  ;;  %v5829_v31 = vpop.f32.mrf.mxu1 }
 0x3bb   : > { %6838 = vst.msk [vmem:[%s9046_s14 + $0xb78] sm:$0xff] %vm6471_vm1, %v4259_v30  ;;  %7466 = vst.msk [vmem:[%s9046_s14 + $0x1f18] sm:$0xff] %vm6471_vm1, %v5829_v31 }
 0x3bc   : > { %v4263_v32 = vpop.f32.mrf.mxu0  ;;  %8218 = vmatmul.mubr.msk.bf16.gmra.mxu0 %vm2369_vm0, %v8675_v28  ;;  %v5833_v33 = vpop.f32.mrf.mxu1  ;;  %8375 = vmatmul.mubr.msk.bf16.gmra.mxu1 %vm2369_vm0, %v8676_v29 }
 0x3bd   : > { %6839 = vst [vmem:[%s9046_s14 + $0xb80] sm:$0xff] %v4263_v32  ;;  %7467 = vst [vmem:[%s9046_s14 + $0x1f20] sm:$0xff] %v5833_v33  ;;  %4511 = vmatprep.mubr.bf16.mxu0 %v8764_v0  ;;  %6081 = vmatprep.mubr.bf16.mxu1 %v8764_v0 }
 0x3be   : > { %v4265_v34 = vpop.f32.mrf.mxu0  ;;  %v5835_v35 = vpop.f32.mrf.mxu1 }
 0x3bf   : > { %6840 = vst.msk [vmem:[%s9046_s14 + $0xb88] sm:$0xff] %vm6471_vm1, %v4265_v34  ;;  %7468 = vst.msk [vmem:[%s9046_s14 + $0x1f28] sm:$0xff] %vm6471_vm1, %v5835_v35  ;;  %v8689_v35 = vld [vmem:[%s12243_s0 + $0x3d8] sm:$0xff]  }
 0x3c0   : > { %v4267_v36 = vpop.f32.mrf.mxu0  ;;  %v5837_v37 = vpop.f32.mrf.mxu1 }
 0x3c1   : > { %6841 = vst [vmem:[%s9046_s14 + $0xb90] sm:$0xff] %v4267_v36  ;;  %7469 = vst [vmem:[%s9046_s14 + $0x1f30] sm:$0xff] %v5837_v37  ;;  %v8690_v36 = vld [vmem:[%s12243_s0 + $0x8c0] sm:$0xff]  }
 0x3c2   : > { %v4269_v40 = vpop.f32.mrf.mxu0  ;;  %v5839_v41 = vpop.f32.mrf.mxu1 }
 0x3c3   : > { %6842 = vst.msk [vmem:[%s9046_s14 + $0xb98] sm:$0xff] %vm6471_vm1, %v4269_v40  ;;  %7470 = vst.msk [vmem:[%s9046_s14 + $0x1f38] sm:$0xff] %vm6471_vm1, %v5839_v41 }
 0x3c4   : > { %v4273_v42 = vpop.f32.mrf.mxu0  ;;  %8219 = vmatmul.mubr.msk.bf16.gmra.mxu0 %vm2369_vm0, %v8677_v38  ;;  %v5843_v43 = vpop.f32.mrf.mxu1  ;;  %8376 = vmatmul.mubr.msk.bf16.gmra.mxu1 %vm2369_vm0, %v8678_v39 }
 0x3c5   : > { %6843 = vst [vmem:[%s9046_s14 + $0xba0] sm:$0xff] %v4273_v42  ;;  %7471 = vst [vmem:[%s9046_s14 + $0x1f40] sm:$0xff] %v5843_v43  ;;  %4521 = vmatprep.mubr.bf16.mxu0 %v8764_v0  ;;  %6091 = vmatprep.mubr.bf16.mxu1 %v8764_v0 }
 0x3c6   : > { %v4275_v44 = vpop.f32.mrf.mxu0  ;;  %v5845_v45 = vpop.f32.mrf.mxu1 }
 0x3c7   : > { %6844 = vst.msk [vmem:[%s9046_s14 + $0xba8] sm:$0xff] %vm6471_vm1, %v4275_v44  ;;  %7472 = vst.msk [vmem:[%s9046_s14 + $0x1f48] sm:$0xff] %vm6471_vm1, %v5845_v45  ;;  %v8691_v45 = vld [vmem:[%s12243_s0 + $0x3e0] sm:$0xff]  }
 0x3c8   : > { %v4277_v46 = vpop.f32.mrf.mxu0  ;;  %v5847_v47 = vpop.f32.mrf.mxu1 }
 0x3c9   : > { %6845 = vst [vmem:[%s9046_s14 + $0xbb0] sm:$0xff] %v4277_v46  ;;  %7473 = vst [vmem:[%s9046_s14 + $0x1f50] sm:$0xff] %v5847_v47  ;;  %v8692_v46 = vld [vmem:[%s12243_s0 + $0x8c8] sm:$0xff]  }
 0x3ca   : > { %v4279_v50 = vpop.f32.mrf.mxu0  ;;  %v5849_v51 = vpop.f32.mrf.mxu1 }
 0x3cb   : > { %6846 = vst.msk [vmem:[%s9046_s14 + $0xbb8] sm:$0xff] %vm6471_vm1, %v4279_v50  ;;  %7474 = vst.msk [vmem:[%s9046_s14 + $0x1f58] sm:$0xff] %vm6471_vm1, %v5849_v51 }
 0x3cc   : > { %v4283_v52 = vpop.f32.mrf.mxu0  ;;  %8220 = vmatmul.mubr.msk.bf16.gmra.mxu0 %vm2369_vm0, %v8679_v48  ;;  %v5853_v53 = vpop.f32.mrf.mxu1  ;;  %8377 = vmatmul.mubr.msk.bf16.gmra.mxu1 %vm2369_vm0, %v8680_v49 }
 0x3cd   : > { %6847 = vst [vmem:[%s9046_s14 + $0xbc0] sm:$0xff] %v4283_v52  ;;  %7475 = vst [vmem:[%s9046_s14 + $0x1f60] sm:$0xff] %v5853_v53  ;;  %4531 = vmatprep.mubr.bf16.mxu0 %v8764_v0  ;;  %6101 = vmatprep.mubr.bf16.mxu1 %v8764_v0 }
 0x3ce   : > { %v4285_v54 = vpop.f32.mrf.mxu0  ;;  %v5855_v55 = vpop.f32.mrf.mxu1 }
 0x3cf   : > { %6848 = vst.msk [vmem:[%s9046_s14 + $0xbc8] sm:$0xff] %vm6471_vm1, %v4285_v54  ;;  %7476 = vst.msk [vmem:[%s9046_s14 + $0x1f68] sm:$0xff] %vm6471_vm1, %v5855_v55  ;;  %v8693_v55 = vld [vmem:[%s12243_s0 + $0x3e8] sm:$0xff]  }
 0x3d0   : > { %v4287_v56 = vpop.f32.mrf.mxu0  ;;  %v5857_v57 = vpop.f32.mrf.mxu1 }
 0x3d1   : > { %6849 = vst [vmem:[%s9046_s14 + $0xbd0] sm:$0xff] %v4287_v56  ;;  %7477 = vst [vmem:[%s9046_s14 + $0x1f70] sm:$0xff] %v5857_v57  ;;  %v8694_v56 = vld [vmem:[%s12243_s0 + $0x8d0] sm:$0xff]  }
 0x3d2   : > { %v4289_v60 = vpop.f32.mrf.mxu0  ;;  %v5859_v61 = vpop.f32.mrf.mxu1 }
 0x3d3   : > { %6850 = vst.msk [vmem:[%s9046_s14 + $0xbd8] sm:$0xff] %vm6471_vm1, %v4289_v60  ;;  %7478 = vst.msk [vmem:[%s9046_s14 + $0x1f78] sm:$0xff] %vm6471_vm1, %v5859_v61 }
 0x3d4   : > { %v4293_v62 = vpop.f32.mrf.mxu0  ;;  %8221 = vmatmul.mubr.msk.bf16.gmra.mxu0 %vm2369_vm0, %v8681_v58  ;;  %v5863_v63 = vpop.f32.mrf.mxu1  ;;  %8378 = vmatmul.mubr.msk.bf16.gmra.mxu1 %vm2369_vm0, %v8682_v59 }
 0x3d5   : > { %6851 = vst [vmem:[%s9046_s14 + $0xbe0] sm:$0xff] %v4293_v62  ;;  %7479 = vst [vmem:[%s9046_s14 + $0x1f80] sm:$0xff] %v5863_v63  ;;  %4541 = vmatprep.mubr.bf16.mxu0 %v8764_v0  ;;  %6111 = vmatprep.mubr.bf16.mxu1 %v8764_v0 }
 0x3d6   : > { %v4295_v1 = vpop.f32.mrf.mxu0  ;;  %v5865_v2 = vpop.f32.mrf.mxu1 }
 0x3d7   : > { %6852 = vst.msk [vmem:[%s9046_s14 + $0xbe8] sm:$0xff] %vm6471_vm1, %v4295_v1  ;;  %7480 = vst.msk [vmem:[%s9046_s14 + $0x1f88] sm:$0xff] %vm6471_vm1, %v5865_v2  ;;  %v8695_v2 = vld [vmem:[%s12243_s0 + $0x3f0] sm:$0xff]  }
 0x3d8   : > { %v4297_v3 = vpop.f32.mrf.mxu0  ;;  %v5867_v4 = vpop.f32.mrf.mxu1 }
 0x3d9   : > { %6853 = vst [vmem:[%s9046_s14 + $0xbf0] sm:$0xff] %v4297_v3  ;;  %7481 = vst [vmem:[%s9046_s14 + $0x1f90] sm:$0xff] %v5867_v4  ;;  %v8696_v3 = vld [vmem:[%s12243_s0 + $0x8d8] sm:$0xff]  }
 0x3da   : > { %v4299_v7 = vpop.f32.mrf.mxu0  ;;  %v5869_v8 = vpop.f32.mrf.mxu1 }
 0x3db   : > { %6854 = vst.msk [vmem:[%s9046_s14 + $0xbf8] sm:$0xff] %vm6471_vm1, %v4299_v7  ;;  %7482 = vst.msk [vmem:[%s9046_s14 + $0x1f98] sm:$0xff] %vm6471_vm1, %v5869_v8 }
 0x3dc   : > { %v4303_v9 = vpop.f32.mrf.mxu0  ;;  %8222 = vmatmul.mubr.msk.bf16.gmra.mxu0 %vm2369_vm0, %v8683_v5  ;;  %v5873_v10 = vpop.f32.mrf.mxu1  ;;  %8379 = vmatmul.mubr.msk.bf16.gmra.mxu1 %vm2369_vm0, %v8684_v6 }
 0x3dd   : > { %6855 = vst [vmem:[%s9046_s14 + $0xc00] sm:$0xff] %v4303_v9  ;;  %7483 = vst [vmem:[%s9046_s14 + $0x1fa0] sm:$0xff] %v5873_v10  ;;  %4551 = vmatprep.mubr.bf16.mxu0 %v8764_v0  ;;  %6121 = vmatprep.mubr.bf16.mxu1 %v8764_v0 }
 0x3de   : > { %v4305_v11 = vpop.f32.mrf.mxu0  ;;  %v5875_v12 = vpop.f32.mrf.mxu1 }
 0x3df   : > { %6856 = vst.msk [vmem:[%s9046_s14 + $0xc08] sm:$0xff] %vm6471_vm1, %v4305_v11  ;;  %7484 = vst.msk [vmem:[%s9046_s14 + $0x1fa8] sm:$0xff] %vm6471_vm1, %v5875_v12  ;;  %v8697_v12 = vld [vmem:[%s12243_s0 + $0x3f8] sm:$0xff]  }
 0x3e0   : > { %v4307_v13 = vpop.f32.mrf.mxu0  ;;  %v5877_v14 = vpop.f32.mrf.mxu1 }
 0x3e1   : > { %6857 = vst [vmem:[%s9046_s14 + $0xc10] sm:$0xff] %v4307_v13  ;;  %7485 = vst [vmem:[%s9046_s14 + $0x1fb0] sm:$0xff] %v5877_v14  ;;  %v8698_v13 = vld [vmem:[%s12243_s0 + $0x8e0] sm:$0xff]  }
 0x3e2   : > { %v4309_v17 = vpop.f32.mrf.mxu0  ;;  %v5879_v18 = vpop.f32.mrf.mxu1 }
 0x3e3   : > { %6858 = vst.msk [vmem:[%s9046_s14 + $0xc18] sm:$0xff] %vm6471_vm1, %v4309_v17  ;;  %7486 = vst.msk [vmem:[%s9046_s14 + $0x1fb8] sm:$0xff] %vm6471_vm1, %v5879_v18 }
 0x3e4   : > { %v4313_v19 = vpop.f32.mrf.mxu0  ;;  %8223 = vmatmul.mubr.msk.bf16.gmra.mxu0 %vm2369_vm0, %v8685_v15  ;;  %v5883_v20 = vpop.f32.mrf.mxu1  ;;  %8380 = vmatmul.mubr.msk.bf16.gmra.mxu1 %vm2369_vm0, %v8686_v16 }
 0x3e5   : > { %6859 = vst [vmem:[%s9046_s14 + $0xc20] sm:$0xff] %v4313_v19  ;;  %7487 = vst [vmem:[%s9046_s14 + $0x1fc0] sm:$0xff] %v5883_v20  ;;  %4561 = vmatprep.mubr.bf16.mxu0 %v8764_v0  ;;  %6131 = vmatprep.mubr.bf16.mxu1 %v8764_v0 }
 0x3e6   : > { %v4315_v21 = vpop.f32.mrf.mxu0  ;;  %v5885_v22 = vpop.f32.mrf.mxu1 }
 0x3e7   : > { %6860 = vst.msk [vmem:[%s9046_s14 + $0xc28] sm:$0xff] %vm6471_vm1, %v4315_v21  ;;  %7488 = vst.msk [vmem:[%s9046_s14 + $0x1fc8] sm:$0xff] %vm6471_vm1, %v5885_v22  ;;  %v8699_v22 = vld [vmem:[%s12243_s0 + $0x400] sm:$0xff]  }
 0x3e8   : > { %v4317_v23 = vpop.f32.mrf.mxu0  ;;  %v5887_v24 = vpop.f32.mrf.mxu1 }
 0x3e9   : > { %6861 = vst [vmem:[%s9046_s14 + $0xc30] sm:$0xff] %v4317_v23  ;;  %7489 = vst [vmem:[%s9046_s14 + $0x1fd0] sm:$0xff] %v5887_v24  ;;  %v8700_v23 = vld [vmem:[%s12243_s0 + $0x8e8] sm:$0xff]  }
 0x3ea   : > { %v4319_v27 = vpop.f32.mrf.mxu0  ;;  %v5889_v28 = vpop.f32.mrf.mxu1 }
 0x3eb   : > { %6862 = vst.msk [vmem:[%s9046_s14 + $0xc38] sm:$0xff] %vm6471_vm1, %v4319_v27  ;;  %7490 = vst.msk [vmem:[%s9046_s14 + $0x1fd8] sm:$0xff] %vm6471_vm1, %v5889_v28 }
 0x3ec   : > { %v4323_v29 = vpop.f32.mrf.mxu0  ;;  %8224 = vmatmul.mubr.msk.bf16.gmra.mxu0 %vm2369_vm0, %v8687_v25  ;;  %v5893_v30 = vpop.f32.mrf.mxu1  ;;  %8381 = vmatmul.mubr.msk.bf16.gmra.mxu1 %vm2369_vm0, %v8688_v26 }
 0x3ed   : > { %6863 = vst [vmem:[%s9046_s14 + $0xc40] sm:$0xff] %v4323_v29  ;;  %7491 = vst [vmem:[%s9046_s14 + $0x1fe0] sm:$0xff] %v5893_v30  ;;  %4571 = vmatprep.mubr.bf16.mxu0 %v8764_v0  ;;  %6141 = vmatprep.mubr.bf16.mxu1 %v8764_v0 }
 0x3ee   : > { %v4325_v31 = vpop.f32.mrf.mxu0  ;;  %v5895_v32 = vpop.f32.mrf.mxu1 }
 0x3ef   : > { %6864 = vst.msk [vmem:[%s9046_s14 + $0xc48] sm:$0xff] %vm6471_vm1, %v4325_v31  ;;  %7492 = vst.msk [vmem:[%s9046_s14 + $0x1fe8] sm:$0xff] %vm6471_vm1, %v5895_v32  ;;  %v8701_v32 = vld [vmem:[%s12243_s0 + $0x408] sm:$0xff]  }
 0x3f0   : > { %v4327_v33 = vpop.f32.mrf.mxu0  ;;  %v5897_v34 = vpop.f32.mrf.mxu1 }
 0x3f1   : > { %6865 = vst [vmem:[%s9046_s14 + $0xc50] sm:$0xff] %v4327_v33  ;;  %7493 = vst [vmem:[%s9046_s14 + $0x1ff0] sm:$0xff] %v5897_v34  ;;  %v8702_v33 = vld [vmem:[%s12243_s0 + $0x8f0] sm:$0xff]  }
 0x3f2   : > { %v4329_v37 = vpop.f32.mrf.mxu0  ;;  %v5899_v38 = vpop.f32.mrf.mxu1 }
 0x3f3   : > { %6866 = vst.msk [vmem:[%s9046_s14 + $0xc58] sm:$0xff] %vm6471_vm1, %v4329_v37  ;;  %7494 = vst.msk [vmem:[%s9046_s14 + $0x1ff8] sm:$0xff] %vm6471_vm1, %v5899_v38 }
 0x3f4   : > { %v4333_v39 = vpop.f32.mrf.mxu0  ;;  %8225 = vmatmul.mubr.msk.bf16.gmra.mxu0 %vm2369_vm0, %v8689_v35  ;;  %v5903_v40 = vpop.f32.mrf.mxu1  ;;  %8382 = vmatmul.mubr.msk.bf16.gmra.mxu1 %vm2369_vm0, %v8690_v36 }
 0x3f5   : > { %6867 = vst [vmem:[%s9046_s14 + $0xc60] sm:$0xff] %v4333_v39  ;;  %7495 = vst [vmem:[%s9046_s14 + $0x2000] sm:$0xff] %v5903_v40  ;;  %4581 = vmatprep.mubr.bf16.mxu0 %v8764_v0  ;;  %6151 = vmatprep.mubr.bf16.mxu1 %v8764_v0 }
 0x3f6   : > { %v4335_v41 = vpop.f32.mrf.mxu0  ;;  %v5905_v42 = vpop.f32.mrf.mxu1 }
 0x3f7   : > { %6868 = vst.msk [vmem:[%s9046_s14 + $0xc68] sm:$0xff] %vm6471_vm1, %v4335_v41  ;;  %7496 = vst.msk [vmem:[%s9046_s14 + $0x2008] sm:$0xff] %vm6471_vm1, %v5905_v42  ;;  %v8703_v42 = vld [vmem:[%s12243_s0 + $0x410] sm:$0xff]  }
 0x3f8   : > { %v4337_v43 = vpop.f32.mrf.mxu0  ;;  %v5907_v44 = vpop.f32.mrf.mxu1 }
 0x3f9   : > { %6869 = vst [vmem:[%s9046_s14 + $0xc70] sm:$0xff] %v4337_v43  ;;  %7497 = vst [vmem:[%s9046_s14 + $0x2010] sm:$0xff] %v5907_v44  ;;  %v8704_v43 = vld [vmem:[%s12243_s0 + $0x8f8] sm:$0xff]  }
 0x3fa   : > { %v4339_v47 = vpop.f32.mrf.mxu0  ;;  %v5909_v48 = vpop.f32.mrf.mxu1 }
 0x3fb   : > { %6870 = vst.msk [vmem:[%s9046_s14 + $0xc78] sm:$0xff] %vm6471_vm1, %v4339_v47  ;;  %7498 = vst.msk [vmem:[%s9046_s14 + $0x2018] sm:$0xff] %vm6471_vm1, %v5909_v48 }
 0x3fc   : > { %v4343_v49 = vpop.f32.mrf.mxu0  ;;  %8226 = vmatmul.mubr.msk.bf16.gmra.mxu0 %vm2369_vm0, %v8691_v45  ;;  %v5913_v50 = vpop.f32.mrf.mxu1  ;;  %8383 = vmatmul.mubr.msk.bf16.gmra.mxu1 %vm2369_vm0, %v8692_v46 }
 0x3fd   : > { %6871 = vst [vmem:[%s9046_s14 + $0xc80] sm:$0xff] %v4343_v49  ;;  %7499 = vst [vmem:[%s9046_s14 + $0x2020] sm:$0xff] %v5913_v50  ;;  %4591 = vmatprep.mubr.bf16.mxu0 %v8764_v0  ;;  %6161 = vmatprep.mubr.bf16.mxu1 %v8764_v0 }
 0x3fe   : > { %v4345_v51 = vpop.f32.mrf.mxu0  ;;  %v5915_v52 = vpop.f32.mrf.mxu1 }
 0x3ff   : > { %6872 = vst.msk [vmem:[%s9046_s14 + $0xc88] sm:$0xff] %vm6471_vm1, %v4345_v51  ;;  %7500 = vst.msk [vmem:[%s9046_s14 + $0x2028] sm:$0xff] %vm6471_vm1, %v5915_v52  ;;  %v8705_v52 = vld [vmem:[%s12243_s0 + $0x418] sm:$0xff]  }
 0x400   : > { %v4347_v53 = vpop.f32.mrf.mxu0  ;;  %v5917_v54 = vpop.f32.mrf.mxu1 }
 0x401   : > { %6873 = vst [vmem:[%s9046_s14 + $0xc90] sm:$0xff] %v4347_v53  ;;  %7501 = vst [vmem:[%s9046_s14 + $0x2030] sm:$0xff] %v5917_v54  ;;  %v8706_v53 = vld [vmem:[%s12243_s0 + $0x900] sm:$0xff]  }
 0x402   : > { %v4349_v57 = vpop.f32.mrf.mxu0  ;;  %v5919_v58 = vpop.f32.mrf.mxu1 }
 0x403   : > { %6874 = vst.msk [vmem:[%s9046_s14 + $0xc98] sm:$0xff] %vm6471_vm1, %v4349_v57  ;;  %7502 = vst.msk [vmem:[%s9046_s14 + $0x2038] sm:$0xff] %vm6471_vm1, %v5919_v58 }
 0x404   : > { %v4353_v59 = vpop.f32.mrf.mxu0  ;;  %8227 = vmatmul.mubr.msk.bf16.gmra.mxu0 %vm2369_vm0, %v8693_v55  ;;  %v5923_v60 = vpop.f32.mrf.mxu1  ;;  %8384 = vmatmul.mubr.msk.bf16.gmra.mxu1 %vm2369_vm0, %v8694_v56 }
 0x405   : > { %6875 = vst [vmem:[%s9046_s14 + $0xca0] sm:$0xff] %v4353_v59  ;;  %7503 = vst [vmem:[%s9046_s14 + $0x2040] sm:$0xff] %v5923_v60  ;;  %4601 = vmatprep.mubr.bf16.mxu0 %v8764_v0  ;;  %6171 = vmatprep.mubr.bf16.mxu1 %v8764_v0 }
 0x406   : > { %v4355_v61 = vpop.f32.mrf.mxu0  ;;  %v5925_v62 = vpop.f32.mrf.mxu1 }
 0x407   : > { %6876 = vst.msk [vmem:[%s9046_s14 + $0xca8] sm:$0xff] %vm6471_vm1, %v4355_v61  ;;  %7504 = vst.msk [vmem:[%s9046_s14 + $0x2048] sm:$0xff] %vm6471_vm1, %v5925_v62  ;;  %v8707_v62 = vld [vmem:[%s12243_s0 + $0x420] sm:$0xff]  }
 0x408   : > { %v4357_v63 = vpop.f32.mrf.mxu0  ;;  %v5927_v1 = vpop.f32.mrf.mxu1 }
 0x409   : > { %6877 = vst [vmem:[%s9046_s14 + $0xcb0] sm:$0xff] %v4357_v63  ;;  %7505 = vst [vmem:[%s9046_s14 + $0x2050] sm:$0xff] %v5927_v1  ;;  %v8708_v63 = vld [vmem:[%s12243_s0 + $0x908] sm:$0xff]  }
 0x40a   : > { %v4359_v4 = vpop.f32.mrf.mxu0  ;;  %v5929_v5 = vpop.f32.mrf.mxu1 }
 0x40b   : > { %6878 = vst.msk [vmem:[%s9046_s14 + $0xcb8] sm:$0xff] %vm6471_vm1, %v4359_v4  ;;  %7506 = vst.msk [vmem:[%s9046_s14 + $0x2058] sm:$0xff] %vm6471_vm1, %v5929_v5 }
 0x40c   : > { %v4363_v6 = vpop.f32.mrf.mxu0  ;;  %8228 = vmatmul.mubr.msk.bf16.gmra.mxu0 %vm2369_vm0, %v8695_v2  ;;  %v5933_v7 = vpop.f32.mrf.mxu1  ;;  %8385 = vmatmul.mubr.msk.bf16.gmra.mxu1 %vm2369_vm0, %v8696_v3 }
 0x40d   : > { %6879 = vst [vmem:[%s9046_s14 + $0xcc0] sm:$0xff] %v4363_v6  ;;  %7507 = vst [vmem:[%s9046_s14 + $0x2060] sm:$0xff] %v5933_v7  ;;  %4611 = vmatprep.mubr.bf16.mxu0 %v8764_v0  ;;  %6181 = vmatprep.mubr.bf16.mxu1 %v8764_v0 }
 0x40e   : > { %v4365_v8 = vpop.f32.mrf.mxu0  ;;  %v5935_v9 = vpop.f32.mrf.mxu1 }
 0x40f   : > { %6880 = vst.msk [vmem:[%s9046_s14 + $0xcc8] sm:$0xff] %vm6471_vm1, %v4365_v8  ;;  %7508 = vst.msk [vmem:[%s9046_s14 + $0x2068] sm:$0xff] %vm6471_vm1, %v5935_v9  ;;  %v8709_v9 = vld [vmem:[%s12243_s0 + $0x428] sm:$0xff]  }
 0x410   : > { %v4367_v10 = vpop.f32.mrf.mxu0  ;;  %v5937_v11 = vpop.f32.mrf.mxu1 }
 0x411   : > { %6881 = vst [vmem:[%s9046_s14 + $0xcd0] sm:$0xff] %v4367_v10  ;;  %7509 = vst [vmem:[%s9046_s14 + $0x2070] sm:$0xff] %v5937_v11  ;;  %v8710_v10 = vld [vmem:[%s12243_s0 + $0x910] sm:$0xff]  }
 0x412   : > { %v4369_v14 = vpop.f32.mrf.mxu0  ;;  %v5939_v15 = vpop.f32.mrf.mxu1 }
 0x413   : > { %6882 = vst.msk [vmem:[%s9046_s14 + $0xcd8] sm:$0xff] %vm6471_vm1, %v4369_v14  ;;  %7510 = vst.msk [vmem:[%s9046_s14 + $0x2078] sm:$0xff] %vm6471_vm1, %v5939_v15 }
 0x414   : > { %v4373_v16 = vpop.f32.mrf.mxu0  ;;  %8229 = vmatmul.mubr.msk.bf16.gmra.mxu0 %vm2369_vm0, %v8697_v12  ;;  %v5943_v17 = vpop.f32.mrf.mxu1  ;;  %8386 = vmatmul.mubr.msk.bf16.gmra.mxu1 %vm2369_vm0, %v8698_v13 }
 0x415   : > { %6883 = vst [vmem:[%s9046_s14 + $0xce0] sm:$0xff] %v4373_v16  ;;  %7511 = vst [vmem:[%s9046_s14 + $0x2080] sm:$0xff] %v5943_v17  ;;  %4621 = vmatprep.mubr.bf16.mxu0 %v8764_v0  ;;  %6191 = vmatprep.mubr.bf16.mxu1 %v8764_v0 }
 0x416   : > { %v4375_v18 = vpop.f32.mrf.mxu0  ;;  %v5945_v19 = vpop.f32.mrf.mxu1 }
 0x417   : > { %6884 = vst.msk [vmem:[%s9046_s14 + $0xce8] sm:$0xff] %vm6471_vm1, %v4375_v18  ;;  %7512 = vst.msk [vmem:[%s9046_s14 + $0x2088] sm:$0xff] %vm6471_vm1, %v5945_v19  ;;  %v8711_v19 = vld [vmem:[%s12243_s0 + $0x430] sm:$0xff]  }
 0x418   : > { %v4377_v20 = vpop.f32.mrf.mxu0  ;;  %v5947_v21 = vpop.f32.mrf.mxu1 }
 0x419   : > { %6885 = vst [vmem:[%s9046_s14 + $0xcf0] sm:$0xff] %v4377_v20  ;;  %7513 = vst [vmem:[%s9046_s14 + $0x2090] sm:$0xff] %v5947_v21  ;;  %v8712_v20 = vld [vmem:[%s12243_s0 + $0x918] sm:$0xff]  }
 0x41a   : > { %v4379_v24 = vpop.f32.mrf.mxu0  ;;  %v5949_v25 = vpop.f32.mrf.mxu1 }
 0x41b   : > { %6886 = vst.msk [vmem:[%s9046_s14 + $0xcf8] sm:$0xff] %vm6471_vm1, %v4379_v24  ;;  %7514 = vst.msk [vmem:[%s9046_s14 + $0x2098] sm:$0xff] %vm6471_vm1, %v5949_v25 }
 0x41c   : > { %v4383_v26 = vpop.f32.mrf.mxu0  ;;  %8230 = vmatmul.mubr.msk.bf16.gmra.mxu0 %vm2369_vm0, %v8699_v22  ;;  %v5953_v27 = vpop.f32.mrf.mxu1  ;;  %8387 = vmatmul.mubr.msk.bf16.gmra.mxu1 %vm2369_vm0, %v8700_v23 }
 0x41d   : > { %6887 = vst [vmem:[%s9046_s14 + $0xd00] sm:$0xff] %v4383_v26  ;;  %7515 = vst [vmem:[%s9046_s14 + $0x20a0] sm:$0xff] %v5953_v27  ;;  %4631 = vmatprep.mubr.bf16.mxu0 %v8764_v0  ;;  %6201 = vmatprep.mubr.bf16.mxu1 %v8764_v0 }
 0x41e   : > { %v4385_v28 = vpop.f32.mrf.mxu0  ;;  %v5955_v29 = vpop.f32.mrf.mxu1 }
 0x41f   : > { %6888 = vst.msk [vmem:[%s9046_s14 + $0xd08] sm:$0xff] %vm6471_vm1, %v4385_v28  ;;  %7516 = vst.msk [vmem:[%s9046_s14 + $0x20a8] sm:$0xff] %vm6471_vm1, %v5955_v29  ;;  %v8713_v29 = vld [vmem:[%s12243_s0 + $0x438] sm:$0xff]  }
 0x420   : > { %v4387_v30 = vpop.f32.mrf.mxu0  ;;  %v5957_v31 = vpop.f32.mrf.mxu1 }
 0x421   : > { %6889 = vst [vmem:[%s9046_s14 + $0xd10] sm:$0xff] %v4387_v30  ;;  %7517 = vst [vmem:[%s9046_s14 + $0x20b0] sm:$0xff] %v5957_v31  ;;  %v8714_v30 = vld [vmem:[%s12243_s0 + $0x920] sm:$0xff]  }
 0x422   : > { %v4389_v34 = vpop.f32.mrf.mxu0  ;;  %v5959_v35 = vpop.f32.mrf.mxu1 }
 0x423   : > { %6890 = vst.msk [vmem:[%s9046_s14 + $0xd18] sm:$0xff] %vm6471_vm1, %v4389_v34  ;;  %7518 = vst.msk [vmem:[%s9046_s14 + $0x20b8] sm:$0xff] %vm6471_vm1, %v5959_v35 }
 0x424   : > { %v4393_v36 = vpop.f32.mrf.mxu0  ;;  %8231 = vmatmul.mubr.msk.bf16.gmra.mxu0 %vm2369_vm0, %v8701_v32  ;;  %v5963_v37 = vpop.f32.mrf.mxu1  ;;  %8388 = vmatmul.mubr.msk.bf16.gmra.mxu1 %vm2369_vm0, %v8702_v33 }
 0x425   : > { %6891 = vst [vmem:[%s9046_s14 + $0xd20] sm:$0xff] %v4393_v36  ;;  %7519 = vst [vmem:[%s9046_s14 + $0x20c0] sm:$0xff] %v5963_v37  ;;  %4641 = vmatprep.mubr.bf16.mxu0 %v8764_v0  ;;  %6211 = vmatprep.mubr.bf16.mxu1 %v8764_v0 }
 0x426   : > { %v4395_v38 = vpop.f32.mrf.mxu0  ;;  %v5965_v39 = vpop.f32.mrf.mxu1 }
 0x427   : > { %6892 = vst.msk [vmem:[%s9046_s14 + $0xd28] sm:$0xff] %vm6471_vm1, %v4395_v38  ;;  %7520 = vst.msk [vmem:[%s9046_s14 + $0x20c8] sm:$0xff] %vm6471_vm1, %v5965_v39  ;;  %v8715_v39 = vld [vmem:[%s12243_s0 + $0x440] sm:$0xff]  }
 0x428   : > { %v4397_v40 = vpop.f32.mrf.mxu0  ;;  %v5967_v41 = vpop.f32.mrf.mxu1 }
 0x429   : > { %6893 = vst [vmem:[%s9046_s14 + $0xd30] sm:$0xff] %v4397_v40  ;;  %7521 = vst [vmem:[%s9046_s14 + $0x20d0] sm:$0xff] %v5967_v41  ;;  %v8716_v40 = vld [vmem:[%s12243_s0 + $0x928] sm:$0xff]  }
 0x42a   : > { %v4399_v44 = vpop.f32.mrf.mxu0  ;;  %v5969_v45 = vpop.f32.mrf.mxu1 }
 0x42b   : > { %6894 = vst.msk [vmem:[%s9046_s14 + $0xd38] sm:$0xff] %vm6471_vm1, %v4399_v44  ;;  %7522 = vst.msk [vmem:[%s9046_s14 + $0x20d8] sm:$0xff] %vm6471_vm1, %v5969_v45 }
 0x42c   : > { %v4403_v46 = vpop.f32.mrf.mxu0  ;;  %8232 = vmatmul.mubr.msk.bf16.gmra.mxu0 %vm2369_vm0, %v8703_v42  ;;  %v5973_v47 = vpop.f32.mrf.mxu1  ;;  %8389 = vmatmul.mubr.msk.bf16.gmra.mxu1 %vm2369_vm0, %v8704_v43 }
 0x42d   : > { %6895 = vst [vmem:[%s9046_s14 + $0xd40] sm:$0xff] %v4403_v46  ;;  %7523 = vst [vmem:[%s9046_s14 + $0x20e0] sm:$0xff] %v5973_v47  ;;  %4651 = vmatprep.mubr.bf16.mxu0 %v8764_v0  ;;  %6221 = vmatprep.mubr.bf16.mxu1 %v8764_v0 }
 0x42e   : > { %v4405_v48 = vpop.f32.mrf.mxu0  ;;  %v5975_v49 = vpop.f32.mrf.mxu1 }
 0x42f   : > { %6896 = vst.msk [vmem:[%s9046_s14 + $0xd48] sm:$0xff] %vm6471_vm1, %v4405_v48  ;;  %7524 = vst.msk [vmem:[%s9046_s14 + $0x20e8] sm:$0xff] %vm6471_vm1, %v5975_v49  ;;  %v8717_v49 = vld [vmem:[%s12243_s0 + $0x448] sm:$0xff]  }
 0x430   : > { %v4407_v50 = vpop.f32.mrf.mxu0  ;;  %v5977_v51 = vpop.f32.mrf.mxu1 }
 0x431   : > { %6897 = vst [vmem:[%s9046_s14 + $0xd50] sm:$0xff] %v4407_v50  ;;  %7525 = vst [vmem:[%s9046_s14 + $0x20f0] sm:$0xff] %v5977_v51  ;;  %v8718_v50 = vld [vmem:[%s12243_s0 + $0x930] sm:$0xff]  }
 0x432   : > { %v4409_v54 = vpop.f32.mrf.mxu0  ;;  %v5979_v55 = vpop.f32.mrf.mxu1 }
 0x433   : > { %6898 = vst.msk [vmem:[%s9046_s14 + $0xd58] sm:$0xff] %vm6471_vm1, %v4409_v54  ;;  %7526 = vst.msk [vmem:[%s9046_s14 + $0x20f8] sm:$0xff] %vm6471_vm1, %v5979_v55 }
 0x434   : > { %v4413_v56 = vpop.f32.mrf.mxu0  ;;  %8233 = vmatmul.mubr.msk.bf16.gmra.mxu0 %vm2369_vm0, %v8705_v52  ;;  %v5983_v57 = vpop.f32.mrf.mxu1  ;;  %8390 = vmatmul.mubr.msk.bf16.gmra.mxu1 %vm2369_vm0, %v8706_v53 }
 0x435   : > { %6899 = vst [vmem:[%s9046_s14 + $0xd60] sm:$0xff] %v4413_v56  ;;  %7527 = vst [vmem:[%s9046_s14 + $0x2100] sm:$0xff] %v5983_v57  ;;  %4661 = vmatprep.mubr.bf16.mxu0 %v8764_v0  ;;  %6231 = vmatprep.mubr.bf16.mxu1 %v8764_v0 }
 0x436   : > { %v4415_v58 = vpop.f32.mrf.mxu0  ;;  %v5985_v59 = vpop.f32.mrf.mxu1 }
 0x437   : > { %6900 = vst.msk [vmem:[%s9046_s14 + $0xd68] sm:$0xff] %vm6471_vm1, %v4415_v58  ;;  %7528 = vst.msk [vmem:[%s9046_s14 + $0x2108] sm:$0xff] %vm6471_vm1, %v5985_v59  ;;  %v8719_v59 = vld [vmem:[%s12243_s0 + $0x450] sm:$0xff]  }
 0x438   : > { %v4417_v60 = vpop.f32.mrf.mxu0  ;;  %v5987_v61 = vpop.f32.mrf.mxu1 }
 0x439   : > { %6901 = vst [vmem:[%s9046_s14 + $0xd70] sm:$0xff] %v4417_v60  ;;  %7529 = vst [vmem:[%s9046_s14 + $0x2110] sm:$0xff] %v5987_v61  ;;  %v8720_v60 = vld [vmem:[%s12243_s0 + $0x938] sm:$0xff]  }
 0x43a   : > { %v4419_v1 = vpop.f32.mrf.mxu0  ;;  %v5989_v2 = vpop.f32.mrf.mxu1 }
 0x43b   : > { %6902 = vst.msk [vmem:[%s9046_s14 + $0xd78] sm:$0xff] %vm6471_vm1, %v4419_v1  ;;  %7530 = vst.msk [vmem:[%s9046_s14 + $0x2118] sm:$0xff] %vm6471_vm1, %v5989_v2 }
 0x43c   : > { %v4423_v3 = vpop.f32.mrf.mxu0  ;;  %8234 = vmatmul.mubr.msk.bf16.gmra.mxu0 %vm2369_vm0, %v8707_v62  ;;  %v5993_v4 = vpop.f32.mrf.mxu1  ;;  %8391 = vmatmul.mubr.msk.bf16.gmra.mxu1 %vm2369_vm0, %v8708_v63 }
 0x43d   : > { %6903 = vst [vmem:[%s9046_s14 + $0xd80] sm:$0xff] %v4423_v3  ;;  %7531 = vst [vmem:[%s9046_s14 + $0x2120] sm:$0xff] %v5993_v4  ;;  %4671 = vmatprep.mubr.bf16.mxu0 %v8764_v0  ;;  %6241 = vmatprep.mubr.bf16.mxu1 %v8764_v0 }
 0x43e   : > { %v4425_v5 = vpop.f32.mrf.mxu0  ;;  %v5995_v6 = vpop.f32.mrf.mxu1 }
 0x43f   : > { %6904 = vst.msk [vmem:[%s9046_s14 + $0xd88] sm:$0xff] %vm6471_vm1, %v4425_v5  ;;  %7532 = vst.msk [vmem:[%s9046_s14 + $0x2128] sm:$0xff] %vm6471_vm1, %v5995_v6  ;;  %v8721_v6 = vld [vmem:[%s12243_s0 + $0x458] sm:$0xff]  }
 0x440   : > { %v4427_v7 = vpop.f32.mrf.mxu0  ;;  %v5997_v8 = vpop.f32.mrf.mxu1 }
 0x441   : > { %6905 = vst [vmem:[%s9046_s14 + $0xd90] sm:$0xff] %v4427_v7  ;;  %7533 = vst [vmem:[%s9046_s14 + $0x2130] sm:$0xff] %v5997_v8  ;;  %v8722_v7 = vld [vmem:[%s12243_s0 + $0x940] sm:$0xff]  }
 0x442   : > { %v4429_v11 = vpop.f32.mrf.mxu0  ;;  %v5999_v12 = vpop.f32.mrf.mxu1 }
 0x443   : > { %6906 = vst.msk [vmem:[%s9046_s14 + $0xd98] sm:$0xff] %vm6471_vm1, %v4429_v11  ;;  %7534 = vst.msk [vmem:[%s9046_s14 + $0x2138] sm:$0xff] %vm6471_vm1, %v5999_v12 }
 0x444   : > { %v4433_v13 = vpop.f32.mrf.mxu0  ;;  %8235 = vmatmul.mubr.msk.bf16.gmra.mxu0 %vm2369_vm0, %v8709_v9  ;;  %v6003_v14 = vpop.f32.mrf.mxu1  ;;  %8392 = vmatmul.mubr.msk.bf16.gmra.mxu1 %vm2369_vm0, %v8710_v10 }
 0x445   : > { %6907 = vst [vmem:[%s9046_s14 + $0xda0] sm:$0xff] %v4433_v13  ;;  %7535 = vst [vmem:[%s9046_s14 + $0x2140] sm:$0xff] %v6003_v14  ;;  %4681 = vmatprep.mubr.bf16.mxu0 %v8764_v0  ;;  %6251 = vmatprep.mubr.bf16.mxu1 %v8764_v0 }
 0x446   : > { %v4435_v15 = vpop.f32.mrf.mxu0  ;;  %v6005_v16 = vpop.f32.mrf.mxu1 }
 0x447   : > { %6908 = vst.msk [vmem:[%s9046_s14 + $0xda8] sm:$0xff] %vm6471_vm1, %v4435_v15  ;;  %7536 = vst.msk [vmem:[%s9046_s14 + $0x2148] sm:$0xff] %vm6471_vm1, %v6005_v16  ;;  %v8723_v16 = vld [vmem:[%s12243_s0 + $0x460] sm:$0xff]  }
 0x448   : > { %v4437_v17 = vpop.f32.mrf.mxu0  ;;  %v6007_v18 = vpop.f32.mrf.mxu1 }
 0x449   : > { %6909 = vst [vmem:[%s9046_s14 + $0xdb0] sm:$0xff] %v4437_v17  ;;  %7537 = vst [vmem:[%s9046_s14 + $0x2150] sm:$0xff] %v6007_v18  ;;  %v8724_v17 = vld [vmem:[%s12243_s0 + $0x948] sm:$0xff]  }
 0x44a   : > { %v4439_v21 = vpop.f32.mrf.mxu0  ;;  %v6009_v22 = vpop.f32.mrf.mxu1 }
 0x44b   : > { %6910 = vst.msk [vmem:[%s9046_s14 + $0xdb8] sm:$0xff] %vm6471_vm1, %v4439_v21  ;;  %7538 = vst.msk [vmem:[%s9046_s14 + $0x2158] sm:$0xff] %vm6471_vm1, %v6009_v22 }
 0x44c   : > { %v4443_v23 = vpop.f32.mrf.mxu0  ;;  %8236 = vmatmul.mubr.msk.bf16.gmra.mxu0 %vm2369_vm0, %v8711_v19  ;;  %v6013_v24 = vpop.f32.mrf.mxu1  ;;  %8393 = vmatmul.mubr.msk.bf16.gmra.mxu1 %vm2369_vm0, %v8712_v20 }
 0x44d   : > { %6911 = vst [vmem:[%s9046_s14 + $0xdc0] sm:$0xff] %v4443_v23  ;;  %7539 = vst [vmem:[%s9046_s14 + $0x2160] sm:$0xff] %v6013_v24  ;;  %4691 = vmatprep.mubr.bf16.mxu0 %v8764_v0  ;;  %6261 = vmatprep.mubr.bf16.mxu1 %v8764_v0 }
 0x44e   : > { %v4445_v25 = vpop.f32.mrf.mxu0  ;;  %v6015_v26 = vpop.f32.mrf.mxu1 }
 0x44f   : > { %6912 = vst.msk [vmem:[%s9046_s14 + $0xdc8] sm:$0xff] %vm6471_vm1, %v4445_v25  ;;  %7540 = vst.msk [vmem:[%s9046_s14 + $0x2168] sm:$0xff] %vm6471_vm1, %v6015_v26  ;;  %v8725_v26 = vld [vmem:[%s12243_s0 + $0x468] sm:$0xff]  }
 0x450   : > { %v4447_v27 = vpop.f32.mrf.mxu0  ;;  %v6017_v28 = vpop.f32.mrf.mxu1 }
 0x451   : > { %6913 = vst [vmem:[%s9046_s14 + $0xdd0] sm:$0xff] %v4447_v27  ;;  %7541 = vst [vmem:[%s9046_s14 + $0x2170] sm:$0xff] %v6017_v28  ;;  %v8726_v27 = vld [vmem:[%s12243_s0 + $0x950] sm:$0xff]  }
 0x452   : > { %v4449_v31 = vpop.f32.mrf.mxu0  ;;  %v6019_v32 = vpop.f32.mrf.mxu1 }
 0x453   : > { %6914 = vst.msk [vmem:[%s9046_s14 + $0xdd8] sm:$0xff] %vm6471_vm1, %v4449_v31  ;;  %7542 = vst.msk [vmem:[%s9046_s14 + $0x2178] sm:$0xff] %vm6471_vm1, %v6019_v32 }
 0x454   : > { %v4453_v33 = vpop.f32.mrf.mxu0  ;;  %8237 = vmatmul.mubr.msk.bf16.gmra.mxu0 %vm2369_vm0, %v8713_v29  ;;  %v6023_v34 = vpop.f32.mrf.mxu1  ;;  %8394 = vmatmul.mubr.msk.bf16.gmra.mxu1 %vm2369_vm0, %v8714_v30 }
 0x455   : > { %6915 = vst [vmem:[%s9046_s14 + $0xde0] sm:$0xff] %v4453_v33  ;;  %7543 = vst [vmem:[%s9046_s14 + $0x2180] sm:$0xff] %v6023_v34  ;;  %4701 = vmatprep.mubr.bf16.mxu0 %v8764_v0  ;;  %6271 = vmatprep.mubr.bf16.mxu1 %v8764_v0 }
 0x456   : > { %v4455_v35 = vpop.f32.mrf.mxu0  ;;  %v6025_v36 = vpop.f32.mrf.mxu1 }
 0x457   : > { %6916 = vst.msk [vmem:[%s9046_s14 + $0xde8] sm:$0xff] %vm6471_vm1, %v4455_v35  ;;  %7544 = vst.msk [vmem:[%s9046_s14 + $0x2188] sm:$0xff] %vm6471_vm1, %v6025_v36  ;;  %v8727_v36 = vld [vmem:[%s12243_s0 + $0x470] sm:$0xff]  }
 0x458   : > { %v4457_v37 = vpop.f32.mrf.mxu0  ;;  %v6027_v38 = vpop.f32.mrf.mxu1 }
 0x459   : > { %6917 = vst [vmem:[%s9046_s14 + $0xdf0] sm:$0xff] %v4457_v37  ;;  %7545 = vst [vmem:[%s9046_s14 + $0x2190] sm:$0xff] %v6027_v38  ;;  %v8728_v37 = vld [vmem:[%s12243_s0 + $0x958] sm:$0xff]  }
 0x45a   : > { %v4459_v41 = vpop.f32.mrf.mxu0  ;;  %v6029_v42 = vpop.f32.mrf.mxu1 }
 0x45b   : > { %6918 = vst.msk [vmem:[%s9046_s14 + $0xdf8] sm:$0xff] %vm6471_vm1, %v4459_v41  ;;  %7546 = vst.msk [vmem:[%s9046_s14 + $0x2198] sm:$0xff] %vm6471_vm1, %v6029_v42 }
 0x45c   : > { %v4463_v43 = vpop.f32.mrf.mxu0  ;;  %8238 = vmatmul.mubr.msk.bf16.gmra.mxu0 %vm2369_vm0, %v8715_v39  ;;  %v6033_v44 = vpop.f32.mrf.mxu1  ;;  %8395 = vmatmul.mubr.msk.bf16.gmra.mxu1 %vm2369_vm0, %v8716_v40 }
 0x45d   : > { %6919 = vst [vmem:[%s9046_s14 + $0xe00] sm:$0xff] %v4463_v43  ;;  %7547 = vst [vmem:[%s9046_s14 + $0x21a0] sm:$0xff] %v6033_v44  ;;  %4711 = vmatprep.mubr.bf16.mxu0 %v8764_v0  ;;  %6281 = vmatprep.mubr.bf16.mxu1 %v8764_v0 }
 0x45e   : > { %v4465_v45 = vpop.f32.mrf.mxu0  ;;  %v6035_v46 = vpop.f32.mrf.mxu1 }
 0x45f   : > { %6920 = vst.msk [vmem:[%s9046_s14 + $0xe08] sm:$0xff] %vm6471_vm1, %v4465_v45  ;;  %7548 = vst.msk [vmem:[%s9046_s14 + $0x21a8] sm:$0xff] %vm6471_vm1, %v6035_v46  ;;  %v8729_v46 = vld [vmem:[%s12243_s0 + $0x478] sm:$0xff]  }
 0x460   : > { %v4467_v47 = vpop.f32.mrf.mxu0  ;;  %v6037_v48 = vpop.f32.mrf.mxu1 }
 0x461   : > { %6921 = vst [vmem:[%s9046_s14 + $0xe10] sm:$0xff] %v4467_v47  ;;  %7549 = vst [vmem:[%s9046_s14 + $0x21b0] sm:$0xff] %v6037_v48  ;;  %v8730_v47 = vld [vmem:[%s12243_s0 + $0x960] sm:$0xff]  }
 0x462   : > { %v4469_v51 = vpop.f32.mrf.mxu0  ;;  %v6039_v52 = vpop.f32.mrf.mxu1 }
 0x463   : > { %6922 = vst.msk [vmem:[%s9046_s14 + $0xe18] sm:$0xff] %vm6471_vm1, %v4469_v51  ;;  %7550 = vst.msk [vmem:[%s9046_s14 + $0x21b8] sm:$0xff] %vm6471_vm1, %v6039_v52 }
 0x464   : > { %v4473_v53 = vpop.f32.mrf.mxu0  ;;  %8239 = vmatmul.mubr.msk.bf16.gmra.mxu0 %vm2369_vm0, %v8717_v49  ;;  %v6043_v54 = vpop.f32.mrf.mxu1  ;;  %8396 = vmatmul.mubr.msk.bf16.gmra.mxu1 %vm2369_vm0, %v8718_v50 }
 0x465   : > { %6923 = vst [vmem:[%s9046_s14 + $0xe20] sm:$0xff] %v4473_v53  ;;  %7551 = vst [vmem:[%s9046_s14 + $0x21c0] sm:$0xff] %v6043_v54  ;;  %4721 = vmatprep.mubr.bf16.mxu0 %v8764_v0  ;;  %6291 = vmatprep.mubr.bf16.mxu1 %v8764_v0 }
 0x466   : > { %v4475_v55 = vpop.f32.mrf.mxu0  ;;  %v6045_v56 = vpop.f32.mrf.mxu1 }
 0x467   : > { %6924 = vst.msk [vmem:[%s9046_s14 + $0xe28] sm:$0xff] %vm6471_vm1, %v4475_v55  ;;  %7552 = vst.msk [vmem:[%s9046_s14 + $0x21c8] sm:$0xff] %vm6471_vm1, %v6045_v56  ;;  %v8731_v56 = vld [vmem:[%s12243_s0 + $0x480] sm:$0xff]  }
 0x468   : > { %v4477_v57 = vpop.f32.mrf.mxu0  ;;  %v6047_v58 = vpop.f32.mrf.mxu1 }
 0x469   : > { %6925 = vst [vmem:[%s9046_s14 + $0xe30] sm:$0xff] %v4477_v57  ;;  %7553 = vst [vmem:[%s9046_s14 + $0x21d0] sm:$0xff] %v6047_v58  ;;  %v8732_v57 = vld [vmem:[%s12243_s0 + $0x968] sm:$0xff]  }
 0x46a   : > { %v4479_v61 = vpop.f32.mrf.mxu0  ;;  %v6049_v62 = vpop.f32.mrf.mxu1 }
 0x46b   : > { %6926 = vst.msk [vmem:[%s9046_s14 + $0xe38] sm:$0xff] %vm6471_vm1, %v4479_v61  ;;  %7554 = vst.msk [vmem:[%s9046_s14 + $0x21d8] sm:$0xff] %vm6471_vm1, %v6049_v62 }
 0x46c   : > { %v4483_v63 = vpop.f32.mrf.mxu0  ;;  %8240 = vmatmul.mubr.msk.bf16.gmra.mxu0 %vm2369_vm0, %v8719_v59  ;;  %v6053_v1 = vpop.f32.mrf.mxu1  ;;  %8397 = vmatmul.mubr.msk.bf16.gmra.mxu1 %vm2369_vm0, %v8720_v60 }
 0x46d   : > { %6927 = vst [vmem:[%s9046_s14 + $0xe40] sm:$0xff] %v4483_v63  ;;  %7555 = vst [vmem:[%s9046_s14 + $0x21e0] sm:$0xff] %v6053_v1  ;;  %4731 = vmatprep.mubr.bf16.mxu0 %v8764_v0  ;;  %6301 = vmatprep.mubr.bf16.mxu1 %v8764_v0 }
 0x46e   : > { %v4485_v2 = vpop.f32.mrf.mxu0  ;;  %v6055_v3 = vpop.f32.mrf.mxu1 }
 0x46f   : > { %6928 = vst.msk [vmem:[%s9046_s14 + $0xe48] sm:$0xff] %vm6471_vm1, %v4485_v2  ;;  %7556 = vst.msk [vmem:[%s9046_s14 + $0x21e8] sm:$0xff] %vm6471_vm1, %v6055_v3  ;;  %v8733_v3 = vld [vmem:[%s12243_s0 + $0x488] sm:$0xff]  }
 0x470   : > { %v4487_v4 = vpop.f32.mrf.mxu0  ;;  %v6057_v5 = vpop.f32.mrf.mxu1 }
 0x471   : > { %6929 = vst [vmem:[%s9046_s14 + $0xe50] sm:$0xff] %v4487_v4  ;;  %7557 = vst [vmem:[%s9046_s14 + $0x21f0] sm:$0xff] %v6057_v5  ;;  %v8734_v4 = vld [vmem:[%s12243_s0 + $0x970] sm:$0xff]  }
 0x472   : > { %v4489_v8 = vpop.f32.mrf.mxu0  ;;  %v6059_v9 = vpop.f32.mrf.mxu1 }
 0x473   : > { %6930 = vst.msk [vmem:[%s9046_s14 + $0xe58] sm:$0xff] %vm6471_vm1, %v4489_v8  ;;  %7558 = vst.msk [vmem:[%s9046_s14 + $0x21f8] sm:$0xff] %vm6471_vm1, %v6059_v9 }
 0x474   : > { %v4493_v10 = vpop.f32.mrf.mxu0  ;;  %8241 = vmatmul.mubr.msk.bf16.gmra.mxu0 %vm2369_vm0, %v8721_v6  ;;  %v6063_v11 = vpop.f32.mrf.mxu1  ;;  %8398 = vmatmul.mubr.msk.bf16.gmra.mxu1 %vm2369_vm0, %v8722_v7 }
 0x475   : > { %6931 = vst [vmem:[%s9046_s14 + $0xe60] sm:$0xff] %v4493_v10  ;;  %7559 = vst [vmem:[%s9046_s14 + $0x2200] sm:$0xff] %v6063_v11  ;;  %4741 = vmatprep.mubr.bf16.mxu0 %v8764_v0  ;;  %6311 = vmatprep.mubr.bf16.mxu1 %v8764_v0 }
 0x476   : > { %v4495_v12 = vpop.f32.mrf.mxu0  ;;  %v6065_v13 = vpop.f32.mrf.mxu1 }
 0x477   : > { %6932 = vst.msk [vmem:[%s9046_s14 + $0xe68] sm:$0xff] %vm6471_vm1, %v4495_v12  ;;  %7560 = vst.msk [vmem:[%s9046_s14 + $0x2208] sm:$0xff] %vm6471_vm1, %v6065_v13  ;;  %v8735_v13 = vld [vmem:[%s12243_s0 + $0x490] sm:$0xff]  }
 0x478   : > { %v4497_v14 = vpop.f32.mrf.mxu0  ;;  %v6067_v15 = vpop.f32.mrf.mxu1 }
 0x479   : > { %6933 = vst [vmem:[%s9046_s14 + $0xe70] sm:$0xff] %v4497_v14  ;;  %7561 = vst [vmem:[%s9046_s14 + $0x2210] sm:$0xff] %v6067_v15  ;;  %v8736_v14 = vld [vmem:[%s12243_s0 + $0x978] sm:$0xff]  }
 0x47a   : > { %v4499_v18 = vpop.f32.mrf.mxu0  ;;  %v6069_v19 = vpop.f32.mrf.mxu1 }
 0x47b   : > { %6934 = vst.msk [vmem:[%s9046_s14 + $0xe78] sm:$0xff] %vm6471_vm1, %v4499_v18  ;;  %7562 = vst.msk [vmem:[%s9046_s14 + $0x2218] sm:$0xff] %vm6471_vm1, %v6069_v19 }
 0x47c   : > { %v4503_v20 = vpop.f32.mrf.mxu0  ;;  %8242 = vmatmul.mubr.msk.bf16.gmra.mxu0 %vm2369_vm0, %v8723_v16  ;;  %v6073_v21 = vpop.f32.mrf.mxu1  ;;  %8399 = vmatmul.mubr.msk.bf16.gmra.mxu1 %vm2369_vm0, %v8724_v17 }
 0x47d   : > { %6935 = vst [vmem:[%s9046_s14 + $0xe80] sm:$0xff] %v4503_v20  ;;  %7563 = vst [vmem:[%s9046_s14 + $0x2220] sm:$0xff] %v6073_v21  ;;  %4751 = vmatprep.mubr.bf16.mxu0 %v8764_v0  ;;  %6321 = vmatprep.mubr.bf16.mxu1 %v8764_v0 }
 0x47e   : > { %v4505_v22 = vpop.f32.mrf.mxu0  ;;  %v6075_v23 = vpop.f32.mrf.mxu1 }
 0x47f   : > { %6936 = vst.msk [vmem:[%s9046_s14 + $0xe88] sm:$0xff] %vm6471_vm1, %v4505_v22  ;;  %7564 = vst.msk [vmem:[%s9046_s14 + $0x2228] sm:$0xff] %vm6471_vm1, %v6075_v23  ;;  %v8737_v23 = vld [vmem:[%s12243_s0 + $0x498] sm:$0xff]  }
 0x480   : > { %v4507_v24 = vpop.f32.mrf.mxu0  ;;  %v6077_v25 = vpop.f32.mrf.mxu1 }
 0x481   : > { %6937 = vst [vmem:[%s9046_s14 + $0xe90] sm:$0xff] %v4507_v24  ;;  %7565 = vst [vmem:[%s9046_s14 + $0x2230] sm:$0xff] %v6077_v25  ;;  %v8738_v24 = vld [vmem:[%s12243_s0 + $0x980] sm:$0xff]  }
 0x482   : > { %v4509_v28 = vpop.f32.mrf.mxu0  ;;  %v6079_v29 = vpop.f32.mrf.mxu1 }
 0x483   : > { %6938 = vst.msk [vmem:[%s9046_s14 + $0xe98] sm:$0xff] %vm6471_vm1, %v4509_v28  ;;  %7566 = vst.msk [vmem:[%s9046_s14 + $0x2238] sm:$0xff] %vm6471_vm1, %v6079_v29 }
 0x484   : > { %v4513_v30 = vpop.f32.mrf.mxu0  ;;  %8243 = vmatmul.mubr.msk.bf16.gmra.mxu0 %vm2369_vm0, %v8725_v26  ;;  %v6083_v31 = vpop.f32.mrf.mxu1  ;;  %8400 = vmatmul.mubr.msk.bf16.gmra.mxu1 %vm2369_vm0, %v8726_v27 }
 0x485   : > { %6939 = vst [vmem:[%s9046_s14 + $0xea0] sm:$0xff] %v4513_v30  ;;  %7567 = vst [vmem:[%s9046_s14 + $0x2240] sm:$0xff] %v6083_v31  ;;  %4761 = vmatprep.mubr.bf16.mxu0 %v8764_v0  ;;  %6331 = vmatprep.mubr.bf16.mxu1 %v8764_v0 }
 0x486   : > { %v4515_v32 = vpop.f32.mrf.mxu0  ;;  %v6085_v33 = vpop.f32.mrf.mxu1 }
 0x487   : > { %6940 = vst.msk [vmem:[%s9046_s14 + $0xea8] sm:$0xff] %vm6471_vm1, %v4515_v32  ;;  %7568 = vst.msk [vmem:[%s9046_s14 + $0x2248] sm:$0xff] %vm6471_vm1, %v6085_v33  ;;  %v8739_v33 = vld [vmem:[%s12243_s0 + $0x4a0] sm:$0xff]  }
 0x488   : > { %v4517_v34 = vpop.f32.mrf.mxu0  ;;  %v6087_v35 = vpop.f32.mrf.mxu1 }
 0x489   : > { %6941 = vst [vmem:[%s9046_s14 + $0xeb0] sm:$0xff] %v4517_v34  ;;  %7569 = vst [vmem:[%s9046_s14 + $0x2250] sm:$0xff] %v6087_v35  ;;  %v8740_v34 = vld [vmem:[%s12243_s0 + $0x988] sm:$0xff]  }
 0x48a   : > { %v4519_v38 = vpop.f32.mrf.mxu0  ;;  %v6089_v39 = vpop.f32.mrf.mxu1 }
 0x48b   : > { %6942 = vst.msk [vmem:[%s9046_s14 + $0xeb8] sm:$0xff] %vm6471_vm1, %v4519_v38  ;;  %7570 = vst.msk [vmem:[%s9046_s14 + $0x2258] sm:$0xff] %vm6471_vm1, %v6089_v39 }
 0x48c   : > { %v4523_v40 = vpop.f32.mrf.mxu0  ;;  %8244 = vmatmul.mubr.msk.bf16.gmra.mxu0 %vm2369_vm0, %v8727_v36  ;;  %v6093_v41 = vpop.f32.mrf.mxu1  ;;  %8401 = vmatmul.mubr.msk.bf16.gmra.mxu1 %vm2369_vm0, %v8728_v37 }
 0x48d   : > { %6943 = vst [vmem:[%s9046_s14 + $0xec0] sm:$0xff] %v4523_v40  ;;  %7571 = vst [vmem:[%s9046_s14 + $0x2260] sm:$0xff] %v6093_v41  ;;  %4771 = vmatprep.mubr.bf16.mxu0 %v8764_v0  ;;  %6341 = vmatprep.mubr.bf16.mxu1 %v8764_v0 }
 0x48e   : > { %v4525_v42 = vpop.f32.mrf.mxu0  ;;  %v6095_v43 = vpop.f32.mrf.mxu1 }
 0x48f   : > { %6944 = vst.msk [vmem:[%s9046_s14 + $0xec8] sm:$0xff] %vm6471_vm1, %v4525_v42  ;;  %7572 = vst.msk [vmem:[%s9046_s14 + $0x2268] sm:$0xff] %vm6471_vm1, %v6095_v43  ;;  %v8741_v43 = vld [vmem:[%s12243_s0 + $0x4a8] sm:$0xff]  }
 0x490   : > { %v4527_v44 = vpop.f32.mrf.mxu0  ;;  %v6097_v45 = vpop.f32.mrf.mxu1 }
 0x491   : > { %6945 = vst [vmem:[%s9046_s14 + $0xed0] sm:$0xff] %v4527_v44  ;;  %7573 = vst [vmem:[%s9046_s14 + $0x2270] sm:$0xff] %v6097_v45  ;;  %v8742_v44 = vld [vmem:[%s12243_s0 + $0x990] sm:$0xff]  }
 0x492   : > { %v4529_v48 = vpop.f32.mrf.mxu0  ;;  %v6099_v49 = vpop.f32.mrf.mxu1 }
 0x493   : > { %6946 = vst.msk [vmem:[%s9046_s14 + $0xed8] sm:$0xff] %vm6471_vm1, %v4529_v48  ;;  %7574 = vst.msk [vmem:[%s9046_s14 + $0x2278] sm:$0xff] %vm6471_vm1, %v6099_v49 }
 0x494   : > { %v4533_v50 = vpop.f32.mrf.mxu0  ;;  %8245 = vmatmul.mubr.msk.bf16.gmra.mxu0 %vm2369_vm0, %v8729_v46  ;;  %v6103_v51 = vpop.f32.mrf.mxu1  ;;  %8402 = vmatmul.mubr.msk.bf16.gmra.mxu1 %vm2369_vm0, %v8730_v47 }
 0x495   : > { %6947 = vst [vmem:[%s9046_s14 + $0xee0] sm:$0xff] %v4533_v50  ;;  %7575 = vst [vmem:[%s9046_s14 + $0x2280] sm:$0xff] %v6103_v51  ;;  %4781 = vmatprep.mubr.bf16.mxu0 %v8764_v0  ;;  %6351 = vmatprep.mubr.bf16.mxu1 %v8764_v0 }
 0x496   : > { %v4535_v52 = vpop.f32.mrf.mxu0  ;;  %v6105_v53 = vpop.f32.mrf.mxu1 }
 0x497   : > { %6948 = vst.msk [vmem:[%s9046_s14 + $0xee8] sm:$0xff] %vm6471_vm1, %v4535_v52  ;;  %7576 = vst.msk [vmem:[%s9046_s14 + $0x2288] sm:$0xff] %vm6471_vm1, %v6105_v53  ;;  %v8743_v53 = vld [vmem:[%s12243_s0 + $0x4b0] sm:$0xff]  }
 0x498   : > { %v4537_v54 = vpop.f32.mrf.mxu0  ;;  %v6107_v55 = vpop.f32.mrf.mxu1 }
 0x499   : > { %6949 = vst [vmem:[%s9046_s14 + $0xef0] sm:$0xff] %v4537_v54  ;;  %7577 = vst [vmem:[%s9046_s14 + $0x2290] sm:$0xff] %v6107_v55  ;;  %v8744_v54 = vld [vmem:[%s12243_s0 + $0x998] sm:$0xff]  }
 0x49a   : > { %v4539_v58 = vpop.f32.mrf.mxu0  ;;  %v6109_v59 = vpop.f32.mrf.mxu1 }
 0x49b   : > { %6950 = vst.msk [vmem:[%s9046_s14 + $0xef8] sm:$0xff] %vm6471_vm1, %v4539_v58  ;;  %7578 = vst.msk [vmem:[%s9046_s14 + $0x2298] sm:$0xff] %vm6471_vm1, %v6109_v59 }
 0x49c   : > { %v4543_v60 = vpop.f32.mrf.mxu0  ;;  %8246 = vmatmul.mubr.msk.bf16.gmra.mxu0 %vm2369_vm0, %v8731_v56  ;;  %v6113_v61 = vpop.f32.mrf.mxu1  ;;  %8403 = vmatmul.mubr.msk.bf16.gmra.mxu1 %vm2369_vm0, %v8732_v57 }
 0x49d   : > { %6951 = vst [vmem:[%s9046_s14 + $0xf00] sm:$0xff] %v4543_v60  ;;  %7579 = vst [vmem:[%s9046_s14 + $0x22a0] sm:$0xff] %v6113_v61  ;;  %4791 = vmatprep.mubr.bf16.mxu0 %v8764_v0  ;;  %6361 = vmatprep.mubr.bf16.mxu1 %v8764_v0 }
 0x49e   : > { %v4545_v62 = vpop.f32.mrf.mxu0  ;;  %v6115_v63 = vpop.f32.mrf.mxu1 }
 0x49f   : > { %6952 = vst.msk [vmem:[%s9046_s14 + $0xf08] sm:$0xff] %vm6471_vm1, %v4545_v62  ;;  %7580 = vst.msk [vmem:[%s9046_s14 + $0x22a8] sm:$0xff] %vm6471_vm1, %v6115_v63  ;;  %v8745_v63 = vld [vmem:[%s12243_s0 + $0x4b8] sm:$0xff]  }
 0x4a0   : > { %v4547_v1 = vpop.f32.mrf.mxu0  ;;  %v6117_v2 = vpop.f32.mrf.mxu1 }
 0x4a1   : > { %6953 = vst [vmem:[%s9046_s14 + $0xf10] sm:$0xff] %v4547_v1  ;;  %7581 = vst [vmem:[%s9046_s14 + $0x22b0] sm:$0xff] %v6117_v2  ;;  %v8746_v1 = vld [vmem:[%s12243_s0 + $0x9a0] sm:$0xff]  }
 0x4a2   : > { %v4549_v5 = vpop.f32.mrf.mxu0  ;;  %v6119_v6 = vpop.f32.mrf.mxu1 }
 0x4a3   : > { %6954 = vst.msk [vmem:[%s9046_s14 + $0xf18] sm:$0xff] %vm6471_vm1, %v4549_v5  ;;  %7582 = vst.msk [vmem:[%s9046_s14 + $0x22b8] sm:$0xff] %vm6471_vm1, %v6119_v6 }
 0x4a4   : > { %v4553_v7 = vpop.f32.mrf.mxu0  ;;  %8247 = vmatmul.mubr.msk.bf16.gmra.mxu0 %vm2369_vm0, %v8733_v3  ;;  %v6123_v8 = vpop.f32.mrf.mxu1  ;;  %8404 = vmatmul.mubr.msk.bf16.gmra.mxu1 %vm2369_vm0, %v8734_v4 }
 0x4a5   : > { %6955 = vst [vmem:[%s9046_s14 + $0xf20] sm:$0xff] %v4553_v7  ;;  %7583 = vst [vmem:[%s9046_s14 + $0x22c0] sm:$0xff] %v6123_v8  ;;  %4801 = vmatprep.mubr.bf16.mxu0 %v8764_v0  ;;  %6371 = vmatprep.mubr.bf16.mxu1 %v8764_v0 }
 0x4a6   : > { %v4555_v9 = vpop.f32.mrf.mxu0  ;;  %v6125_v10 = vpop.f32.mrf.mxu1 }
 0x4a7   : > { %6956 = vst.msk [vmem:[%s9046_s14 + $0xf28] sm:$0xff] %vm6471_vm1, %v4555_v9  ;;  %7584 = vst.msk [vmem:[%s9046_s14 + $0x22c8] sm:$0xff] %vm6471_vm1, %v6125_v10  ;;  %v8747_v10 = vld [vmem:[%s12243_s0 + $0x4c0] sm:$0xff]  }
 0x4a8   : > { %v4557_v11 = vpop.f32.mrf.mxu0  ;;  %v6127_v12 = vpop.f32.mrf.mxu1 }
 0x4a9   : > { %6957 = vst [vmem:[%s9046_s14 + $0xf30] sm:$0xff] %v4557_v11  ;;  %7585 = vst [vmem:[%s9046_s14 + $0x22d0] sm:$0xff] %v6127_v12  ;;  %v8748_v11 = vld [vmem:[%s12243_s0 + $0x9a8] sm:$0xff]  }
 0x4aa   : > { %v4559_v15 = vpop.f32.mrf.mxu0  ;;  %v6129_v16 = vpop.f32.mrf.mxu1 }
 0x4ab   : > { %6958 = vst.msk [vmem:[%s9046_s14 + $0xf38] sm:$0xff] %vm6471_vm1, %v4559_v15  ;;  %7586 = vst.msk [vmem:[%s9046_s14 + $0x22d8] sm:$0xff] %vm6471_vm1, %v6129_v16 }
 0x4ac   : > { %v4563_v17 = vpop.f32.mrf.mxu0  ;;  %8248 = vmatmul.mubr.msk.bf16.gmra.mxu0 %vm2369_vm0, %v8735_v13  ;;  %v6133_v18 = vpop.f32.mrf.mxu1  ;;  %8405 = vmatmul.mubr.msk.bf16.gmra.mxu1 %vm2369_vm0, %v8736_v14 }
 0x4ad   : > { %6959 = vst [vmem:[%s9046_s14 + $0xf40] sm:$0xff] %v4563_v17  ;;  %7587 = vst [vmem:[%s9046_s14 + $0x22e0] sm:$0xff] %v6133_v18  ;;  %4811 = vmatprep.mubr.bf16.mxu0 %v8764_v0  ;;  %6381 = vmatprep.mubr.bf16.mxu1 %v8764_v0 }
 0x4ae   : > { %v4565_v19 = vpop.f32.mrf.mxu0  ;;  %v6135_v20 = vpop.f32.mrf.mxu1 }
 0x4af   : > { %6960 = vst.msk [vmem:[%s9046_s14 + $0xf48] sm:$0xff] %vm6471_vm1, %v4565_v19  ;;  %7588 = vst.msk [vmem:[%s9046_s14 + $0x22e8] sm:$0xff] %vm6471_vm1, %v6135_v20  ;;  %v8749_v20 = vld [vmem:[%s12243_s0 + $0x4c8] sm:$0xff]  }
 0x4b0   : > { %v4567_v21 = vpop.f32.mrf.mxu0  ;;  %v6137_v22 = vpop.f32.mrf.mxu1 }
 0x4b1   : > { %6961 = vst [vmem:[%s9046_s14 + $0xf50] sm:$0xff] %v4567_v21  ;;  %7589 = vst [vmem:[%s9046_s14 + $0x22f0] sm:$0xff] %v6137_v22  ;;  %v8750_v21 = vld [vmem:[%s12243_s0 + $0x9b0] sm:$0xff]  }
 0x4b2   : > { %v4569_v25 = vpop.f32.mrf.mxu0  ;;  %v6139_v26 = vpop.f32.mrf.mxu1 }
 0x4b3   : > { %6962 = vst.msk [vmem:[%s9046_s14 + $0xf58] sm:$0xff] %vm6471_vm1, %v4569_v25  ;;  %7590 = vst.msk [vmem:[%s9046_s14 + $0x22f8] sm:$0xff] %vm6471_vm1, %v6139_v26 }
 0x4b4   : > { %v4573_v27 = vpop.f32.mrf.mxu0  ;;  %8249 = vmatmul.mubr.msk.bf16.gmra.mxu0 %vm2369_vm0, %v8737_v23  ;;  %v6143_v28 = vpop.f32.mrf.mxu1  ;;  %8406 = vmatmul.mubr.msk.bf16.gmra.mxu1 %vm2369_vm0, %v8738_v24 }
 0x4b5   : > { %6963 = vst [vmem:[%s9046_s14 + $0xf60] sm:$0xff] %v4573_v27  ;;  %7591 = vst [vmem:[%s9046_s14 + $0x2300] sm:$0xff] %v6143_v28  ;;  %4821 = vmatprep.mubr.bf16.mxu0 %v8764_v0  ;;  %6391 = vmatprep.mubr.bf16.mxu1 %v8764_v0 }
 0x4b6   : > { %v4575_v29 = vpop.f32.mrf.mxu0  ;;  %v6145_v30 = vpop.f32.mrf.mxu1 }
 0x4b7   : > { %6964 = vst.msk [vmem:[%s9046_s14 + $0xf68] sm:$0xff] %vm6471_vm1, %v4575_v29  ;;  %7592 = vst.msk [vmem:[%s9046_s14 + $0x2308] sm:$0xff] %vm6471_vm1, %v6145_v30  ;;  %v8751_v30 = vld [vmem:[%s12243_s0 + $0x4d0] sm:$0xff]  }
 0x4b8   : > { %v4577_v31 = vpop.f32.mrf.mxu0  ;;  %v6147_v32 = vpop.f32.mrf.mxu1 }
 0x4b9   : > { %6965 = vst [vmem:[%s9046_s14 + $0xf70] sm:$0xff] %v4577_v31  ;;  %7593 = vst [vmem:[%s9046_s14 + $0x2310] sm:$0xff] %v6147_v32  ;;  %v8752_v31 = vld [vmem:[%s12243_s0 + $0x9b8] sm:$0xff]  }
 0x4ba   : > { %v4579_v35 = vpop.f32.mrf.mxu0  ;;  %v6149_v36 = vpop.f32.mrf.mxu1 }
 0x4bb   : > { %6966 = vst.msk [vmem:[%s9046_s14 + $0xf78] sm:$0xff] %vm6471_vm1, %v4579_v35  ;;  %7594 = vst.msk [vmem:[%s9046_s14 + $0x2318] sm:$0xff] %vm6471_vm1, %v6149_v36 }
 0x4bc   : > { %v4583_v37 = vpop.f32.mrf.mxu0  ;;  %8250 = vmatmul.mubr.msk.bf16.gmra.mxu0 %vm2369_vm0, %v8739_v33  ;;  %v6153_v38 = vpop.f32.mrf.mxu1  ;;  %8407 = vmatmul.mubr.msk.bf16.gmra.mxu1 %vm2369_vm0, %v8740_v34 }
 0x4bd   : > { %6967 = vst [vmem:[%s9046_s14 + $0xf80] sm:$0xff] %v4583_v37  ;;  %7595 = vst [vmem:[%s9046_s14 + $0x2320] sm:$0xff] %v6153_v38  ;;  %4831 = vmatprep.mubr.bf16.mxu0 %v8764_v0  ;;  %6401 = vmatprep.mubr.bf16.mxu1 %v8764_v0 }
 0x4be   : > { %v4585_v39 = vpop.f32.mrf.mxu0  ;;  %v6155_v40 = vpop.f32.mrf.mxu1 }
 0x4bf   : > { %6968 = vst.msk [vmem:[%s9046_s14 + $0xf88] sm:$0xff] %vm6471_vm1, %v4585_v39  ;;  %7596 = vst.msk [vmem:[%s9046_s14 + $0x2328] sm:$0xff] %vm6471_vm1, %v6155_v40  ;;  %v8753_v40 = vld [vmem:[%s12243_s0 + $0x4d8] sm:$0xff]  }
 0x4c0   : > { %v4587_v41 = vpop.f32.mrf.mxu0  ;;  %v6157_v42 = vpop.f32.mrf.mxu1 }
 0x4c1   : > { %6969 = vst [vmem:[%s9046_s14 + $0xf90] sm:$0xff] %v4587_v41  ;;  %7597 = vst [vmem:[%s9046_s14 + $0x2330] sm:$0xff] %v6157_v42  ;;  %v8754_v41 = vld [vmem:[%s12243_s0 + $0x9c0] ss:$0 sps:$4 sm:$0xff]  }
 0x4c2   : > { %v4589_v45 = vpop.f32.mrf.mxu0  ;;  %v6159_v46 = vpop.f32.mrf.mxu1 }
 0x4c3   : > { %6970 = vst.msk [vmem:[%s9046_s14 + $0xf98] sm:$0xff] %vm6471_vm1, %v4589_v45  ;;  %7598 = vst.msk [vmem:[%s9046_s14 + $0x2338] sm:$0xff] %vm6471_vm1, %v6159_v46 }
 0x4c4   : > { %v4593_v47 = vpop.f32.mrf.mxu0  ;;  %8251 = vmatmul.mubr.msk.bf16.gmra.mxu0 %vm2369_vm0, %v8741_v43  ;;  %v6163_v48 = vpop.f32.mrf.mxu1  ;;  %8408 = vmatmul.mubr.msk.bf16.gmra.mxu1 %vm2369_vm0, %v8742_v44 }
 0x4c5   : > { %6971 = vst [vmem:[%s9046_s14 + $0xfa0] sm:$0xff] %v4593_v47  ;;  %7599 = vst [vmem:[%s9046_s14 + $0x2340] sm:$0xff] %v6163_v48  ;;  %4841 = vmatprep.mubr.bf16.mxu0 %v8764_v0  ;;  %6411 = vmatprep.mubr.bf16.mxu1 %v8764_v0 }
 0x4c6   : > { %v4595_v49 = vpop.f32.mrf.mxu0  ;;  %v6165_v50 = vpop.f32.mrf.mxu1 }
 0x4c7   : > { %6972 = vst.msk [vmem:[%s9046_s14 + $0xfa8] sm:$0xff] %vm6471_vm1, %v4595_v49  ;;  %7600 = vst.msk [vmem:[%s9046_s14 + $0x2348] sm:$0xff] %vm6471_vm1, %v6165_v50  ;;  %v8755_v50 = vld [vmem:[%s12243_s0 + $0x4e0] sm:$0xff]  }
 0x4c8   : > { %v4597_v51 = vpop.f32.mrf.mxu0  ;;  %v6167_v52 = vpop.f32.mrf.mxu1 }
 0x4c9   : > { %6973 = vst [vmem:[%s9046_s14 + $0xfb0] sm:$0xff] %v4597_v51  ;;  %7601 = vst [vmem:[%s9046_s14 + $0x2350] sm:$0xff] %v6167_v52 }
 0x4ca   : > { %v4599_v55 = vpop.f32.mrf.mxu0  ;;  %v6169_v56 = vpop.f32.mrf.mxu1 }
 0x4cb   : > { %6974 = vst.msk [vmem:[%s9046_s14 + $0xfb8] sm:$0xff] %vm6471_vm1, %v4599_v55  ;;  %7602 = vst.msk [vmem:[%s9046_s14 + $0x2358] sm:$0xff] %vm6471_vm1, %v6169_v56 }
 0x4cc   : > { %v4603_v57 = vpop.f32.mrf.mxu0  ;;  %8252 = vmatmul.mubr.msk.bf16.gmra.mxu0 %vm2369_vm0, %v8743_v53  ;;  %v6173_v58 = vpop.f32.mrf.mxu1  ;;  %8409 = vmatmul.mubr.msk.bf16.gmra.mxu1 %vm2369_vm0, %v8744_v54 }
 0x4cd   : > { %6975 = vst [vmem:[%s9046_s14 + $0xfc0] sm:$0xff] %v4603_v57  ;;  %7603 = vst [vmem:[%s9046_s14 + $0x2360] sm:$0xff] %v6173_v58  ;;  %4851 = vmatprep.mubr.bf16.mxu0 %v8764_v0  ;;  %6421 = vmatprep.mubr.bf16.mxu1 %v8764_v0 }
 0x4ce   : > { %v4605_v59 = vpop.f32.mrf.mxu0  ;;  %v6175_v60 = vpop.f32.mrf.mxu1 }
 0x4cf   : > { %6976 = vst.msk [vmem:[%s9046_s14 + $0xfc8] sm:$0xff] %vm6471_vm1, %v4605_v59  ;;  %7604 = vst.msk [vmem:[%s9046_s14 + $0x2368] sm:$0xff] %vm6471_vm1, %v6175_v60 }
 0x4d0   : > { %v4607_v61 = vpop.f32.mrf.mxu0  ;;  %v6177_v62 = vpop.f32.mrf.mxu1 }
 0x4d1   : > { %6977 = vst [vmem:[%s9046_s14 + $0xfd0] sm:$0xff] %v4607_v61  ;;  %7605 = vst [vmem:[%s9046_s14 + $0x2370] sm:$0xff] %v6177_v62 }
 0x4d2   : > { %v4609_v2 = vpop.f32.mrf.mxu0  ;;  %v6179_v3 = vpop.f32.mrf.mxu1 }
 0x4d3   : > { %6978 = vst.msk [vmem:[%s9046_s14 + $0xfd8] sm:$0xff] %vm6471_vm1, %v4609_v2  ;;  %7606 = vst.msk [vmem:[%s9046_s14 + $0x2378] sm:$0xff] %vm6471_vm1, %v6179_v3 }
 0x4d4   : > { %v4613_v4 = vpop.f32.mrf.mxu0  ;;  %8253 = vmatmul.mubr.msk.bf16.gmra.mxu0 %vm2369_vm0, %v8745_v63  ;;  %v6183_v5 = vpop.f32.mrf.mxu1  ;;  %8410 = vmatmul.mubr.msk.bf16.gmra.mxu1 %vm2369_vm0, %v8746_v1 }
 0x4d5   : > { %6979 = vst [vmem:[%s9046_s14 + $0xfe0] sm:$0xff] %v4613_v4  ;;  %7607 = vst [vmem:[%s9046_s14 + $0x2380] sm:$0xff] %v6183_v5  ;;  %4861 = vmatprep.mubr.bf16.mxu0 %v8764_v0  ;;  %6431 = vmatprep.mubr.bf16.mxu1 %v8764_v0 }
 0x4d6   : > { %v4615_v6 = vpop.f32.mrf.mxu0  ;;  %v6185_v7 = vpop.f32.mrf.mxu1 }
 0x4d7   : > { %6980 = vst.msk [vmem:[%s9046_s14 + $0xfe8] sm:$0xff] %vm6471_vm1, %v4615_v6  ;;  %7608 = vst.msk [vmem:[%s9046_s14 + $0x2388] sm:$0xff] %vm6471_vm1, %v6185_v7 }
 0x4d8   : > { %v4617_v8 = vpop.f32.mrf.mxu0  ;;  %v6187_v9 = vpop.f32.mrf.mxu1 }
 0x4d9   : > { %6981 = vst [vmem:[%s9046_s14 + $0xff0] sm:$0xff] %v4617_v8  ;;  %7609 = vst [vmem:[%s9046_s14 + $0x2390] sm:$0xff] %v6187_v9 }
 0x4da   : > { %v4619_v12 = vpop.f32.mrf.mxu0  ;;  %v6189_v13 = vpop.f32.mrf.mxu1 }
 0x4db   : > { %6982 = vst.msk [vmem:[%s9046_s14 + $0xff8] sm:$0xff] %vm6471_vm1, %v4619_v12  ;;  %7610 = vst.msk [vmem:[%s9046_s14 + $0x2398] sm:$0xff] %vm6471_vm1, %v6189_v13 }
 0x4dc   : > { %v4623_v14 = vpop.f32.mrf.mxu0  ;;  %8254 = vmatmul.mubr.msk.bf16.gmra.mxu0 %vm2369_vm0, %v8747_v10  ;;  %v6193_v15 = vpop.f32.mrf.mxu1  ;;  %8411 = vmatmul.mubr.msk.bf16.gmra.mxu1 %vm2369_vm0, %v8748_v11 }
 0x4dd   : > { %6983 = vst [vmem:[%s9046_s14 + $0x1000] sm:$0xff] %v4623_v14  ;;  %7611 = vst [vmem:[%s9046_s14 + $0x23a0] sm:$0xff] %v6193_v15  ;;  %4871 = vmatprep.mubr.bf16.mxu0 %v8764_v0  ;;  %6441 = vmatprep.mubr.bf16.mxu1 %v8764_v0 }
 0x4de   : > { %v4625_v16 = vpop.f32.mrf.mxu0  ;;  %v6195_v17 = vpop.f32.mrf.mxu1 }
 0x4df   : > { %6984 = vst.msk [vmem:[%s9046_s14 + $0x1008] sm:$0xff] %vm6471_vm1, %v4625_v16  ;;  %7612 = vst.msk [vmem:[%s9046_s14 + $0x23a8] sm:$0xff] %vm6471_vm1, %v6195_v17 }
 0x4e0   : > { %v4627_v18 = vpop.f32.mrf.mxu0  ;;  %v6197_v19 = vpop.f32.mrf.mxu1 }
 0x4e1   : > { %6985 = vst [vmem:[%s9046_s14 + $0x1010] sm:$0xff] %v4627_v18  ;;  %7613 = vst [vmem:[%s9046_s14 + $0x23b0] sm:$0xff] %v6197_v19 }
 0x4e2   : > { %v4629_v22 = vpop.f32.mrf.mxu0  ;;  %v6199_v23 = vpop.f32.mrf.mxu1 }
 0x4e3   : > { %6986 = vst.msk [vmem:[%s9046_s14 + $0x1018] sm:$0xff] %vm6471_vm1, %v4629_v22  ;;  %7614 = vst.msk [vmem:[%s9046_s14 + $0x23b8] sm:$0xff] %vm6471_vm1, %v6199_v23 }
 0x4e4   : > { %v4633_v24 = vpop.f32.mrf.mxu0  ;;  %8255 = vmatmul.mubr.msk.bf16.gmra.mxu0 %vm2369_vm0, %v8749_v20  ;;  %v6203_v25 = vpop.f32.mrf.mxu1  ;;  %8412 = vmatmul.mubr.msk.bf16.gmra.mxu1 %vm2369_vm0, %v8750_v21 }
 0x4e5   : > { %6987 = vst [vmem:[%s9046_s14 + $0x1020] sm:$0xff] %v4633_v24  ;;  %7615 = vst [vmem:[%s9046_s14 + $0x23c0] sm:$0xff] %v6203_v25  ;;  %4881 = vmatprep.mubr.bf16.mxu0 %v8764_v0  ;;  %6451 = vmatprep.mubr.bf16.mxu1 %v8764_v0 }
 0x4e6   : > { %v4635_v26 = vpop.f32.mrf.mxu0  ;;  %v6205_v27 = vpop.f32.mrf.mxu1 }
 0x4e7   : > { %6988 = vst.msk [vmem:[%s9046_s14 + $0x1028] sm:$0xff] %vm6471_vm1, %v4635_v26  ;;  %7616 = vst.msk [vmem:[%s9046_s14 + $0x23c8] sm:$0xff] %vm6471_vm1, %v6205_v27 }
 0x4e8   : > { %v4637_v28 = vpop.f32.mrf.mxu0  ;;  %v6207_v29 = vpop.f32.mrf.mxu1 }
 0x4e9   : > { %6989 = vst [vmem:[%s9046_s14 + $0x1030] sm:$0xff] %v4637_v28  ;;  %7617 = vst [vmem:[%s9046_s14 + $0x23d0] sm:$0xff] %v6207_v29 }
 0x4ea   : > { %v4639_v32 = vpop.f32.mrf.mxu0  ;;  %v6209_v33 = vpop.f32.mrf.mxu1 }
 0x4eb   : > { %6990 = vst.msk [vmem:[%s9046_s14 + $0x1038] sm:$0xff] %vm6471_vm1, %v4639_v32  ;;  %7618 = vst.msk [vmem:[%s9046_s14 + $0x23d8] sm:$0xff] %vm6471_vm1, %v6209_v33 }
 0x4ec   : > { %v4643_v34 = vpop.f32.mrf.mxu0  ;;  %8256 = vmatmul.mubr.msk.bf16.gmra.mxu0 %vm2369_vm0, %v8751_v30  ;;  %v6213_v35 = vpop.f32.mrf.mxu1  ;;  %8413 = vmatmul.mubr.msk.bf16.gmra.mxu1 %vm2369_vm0, %v8752_v31 }
 0x4ed   : > { %6991 = vst [vmem:[%s9046_s14 + $0x1040] sm:$0xff] %v4643_v34  ;;  %7619 = vst [vmem:[%s9046_s14 + $0x23e0] sm:$0xff] %v6213_v35  ;;  %4891 = vmatprep.mubr.bf16.mxu0 %v8764_v0  ;;  %6461 = vmatprep.mubr.bf16.mxu1 %v8764_v0 }
 0x4ee   : > { %v4645_v36 = vpop.f32.mrf.mxu0  ;;  %v6215_v37 = vpop.f32.mrf.mxu1 }
 0x4ef   : > { %6992 = vst.msk [vmem:[%s9046_s14 + $0x1048] sm:$0xff] %vm6471_vm1, %v4645_v36  ;;  %7620 = vst.msk [vmem:[%s9046_s14 + $0x23e8] sm:$0xff] %vm6471_vm1, %v6215_v37 }
 0x4f0   : > { %v4647_v38 = vpop.f32.mrf.mxu0  ;;  %v6217_v39 = vpop.f32.mrf.mxu1 }
 0x4f1   : > { %6993 = vst [vmem:[%s9046_s14 + $0x1050] sm:$0xff] %v4647_v38  ;;  %7621 = vst [vmem:[%s9046_s14 + $0x23f0] sm:$0xff] %v6217_v39 }
 0x4f2   : > { %v4649_v42 = vpop.f32.mrf.mxu0  ;;  %v6219_v43 = vpop.f32.mrf.mxu1 }
 0x4f3   : > { %6994 = vst.msk [vmem:[%s9046_s14 + $0x1058] sm:$0xff] %vm6471_vm1, %v4649_v42  ;;  %7622 = vst.msk [vmem:[%s9046_s14 + $0x23f8] sm:$0xff] %vm6471_vm1, %v6219_v43 }
 0x4f4   : > { %v4653_v44 = vpop.f32.mrf.mxu0  ;;  %8257 = vmatmul.mubr.msk.bf16.gmra.mxu0 %vm2369_vm0, %v8753_v40  ;;  %v6223_v45 = vpop.f32.mrf.mxu1  ;;  %8414 = vmatmul.mubr.msk.bf16.gmra.mxu1 %vm2369_vm0, %v8754_v41 }
 0x4f5   : > { %6995 = vst [vmem:[%s9046_s14 + $0x1060] sm:$0xff] %v4653_v44  ;;  %7623 = vst [vmem:[%s9046_s14 + $0x2400] sm:$0xff] %v6223_v45  ;;  %4901 = vmatprep.mubr.bf16.mxu0 %v8764_v0 }
 0x4f6   : > { %v4655_v46 = vpop.f32.mrf.mxu0  ;;  %v6225_v47 = vpop.f32.mrf.mxu1 }
 0x4f7   : > { %6996 = vst.msk [vmem:[%s9046_s14 + $0x1068] sm:$0xff] %vm6471_vm1, %v4655_v46  ;;  %7624 = vst.msk [vmem:[%s9046_s14 + $0x2408] sm:$0xff] %vm6471_vm1, %v6225_v47 }
 0x4f8   : > { %v4657_v48 = vpop.f32.mrf.mxu0  ;;  %v6227_v49 = vpop.f32.mrf.mxu1 }
 0x4f9   : > { %6997 = vst [vmem:[%s9046_s14 + $0x1070] sm:$0xff] %v4657_v48  ;;  %7625 = vst [vmem:[%s9046_s14 + $0x2410] sm:$0xff] %v6227_v49 }
 0x4fa   : > { %v4659_v0 = vpop.f32.mrf.mxu0  ;;  %v6229_v51 = vpop.f32.mrf.mxu1 }
 0x4fb   : > { %6998 = vst.msk [vmem:[%s9046_s14 + $0x1078] sm:$0xff] %vm6471_vm1, %v4659_v0  ;;  %7626 = vst.msk [vmem:[%s9046_s14 + $0x2418] sm:$0xff] %vm6471_vm1, %v6229_v51 }
 0x4fc   : > { %v4663_v52 = vpop.f32.mrf.mxu0  ;;  %8258 = vmatmul.mubr.msk.bf16.gmra.mxu0 %vm2369_vm0, %v8755_v50  ;;  %v6233_v53 = vpop.f32.mrf.mxu1 }
 0x4fd   : > { %6999 = vst [vmem:[%s9046_s14 + $0x1080] sm:$0xff] %v4663_v52  ;;  %7627 = vst [vmem:[%s9046_s14 + $0x2420] sm:$0xff] %v6233_v53 }
 0x4fe   : > { %v4665_v54 = vpop.f32.mrf.mxu0  ;;  %v6235_v55 = vpop.f32.mrf.mxu1 }
 0x4ff   : > { %7000 = vst.msk [vmem:[%s9046_s14 + $0x1088] sm:$0xff] %vm6471_vm1, %v4665_v54  ;;  %7628 = vst.msk [vmem:[%s9046_s14 + $0x2428] sm:$0xff] %vm6471_vm1, %v6235_v55 }
 0x500   : > { %v4667_v56 = vpop.f32.mrf.mxu0  ;;  %v6237_v57 = vpop.f32.mrf.mxu1 }
 0x501   : > { %7001 = vst [vmem:[%s9046_s14 + $0x1090] sm:$0xff] %v4667_v56  ;;  %7629 = vst [vmem:[%s9046_s14 + $0x2430] sm:$0xff] %v6237_v57 }
 0x502   : > { %v4669_v58 = vpop.f32.mrf.mxu0  ;;  %v6239_v59 = vpop.f32.mrf.mxu1 }
 0x503   : > { %7002 = vst.msk [vmem:[%s9046_s14 + $0x1098] sm:$0xff] %vm6471_vm1, %v4669_v58  ;;  %7630 = vst.msk [vmem:[%s9046_s14 + $0x2438] sm:$0xff] %vm6471_vm1, %v6239_v59 }
 0x504   : > { %v4673_v60 = vpop.f32.mrf.mxu0  ;;  %v6243_v61 = vpop.f32.mrf.mxu1 }
 0x505   : > { %7003 = vst [vmem:[%s9046_s14 + $0x10a0] sm:$0xff] %v4673_v60  ;;  %7631 = vst [vmem:[%s9046_s14 + $0x2440] sm:$0xff] %v6243_v61 }
 0x506   : > { %v4675_v62 = vpop.f32.mrf.mxu0  ;;  %v6245_v63 = vpop.f32.mrf.mxu1 }
 0x507   : > { %7004 = vst.msk [vmem:[%s9046_s14 + $0x10a8] sm:$0xff] %vm6471_vm1, %v4675_v62  ;;  %7632 = vst.msk [vmem:[%s9046_s14 + $0x2448] sm:$0xff] %vm6471_vm1, %v6245_v63 }
 0x508   : > { %v4677_v1 = vpop.f32.mrf.mxu0  ;;  %v6247_v2 = vpop.f32.mrf.mxu1 }
 0x509   : > { %7005 = vst [vmem:[%s9046_s14 + $0x10b0] sm:$0xff] %v4677_v1  ;;  %7633 = vst [vmem:[%s9046_s14 + $0x2450] sm:$0xff] %v6247_v2 }
 0x50a   : > { %v4679_v3 = vpop.f32.mrf.mxu0  ;;  %v6249_v4 = vpop.f32.mrf.mxu1 }
 0x50b   : > { %7006 = vst.msk [vmem:[%s9046_s14 + $0x10b8] sm:$0xff] %vm6471_vm1, %v4679_v3  ;;  %7634 = vst.msk [vmem:[%s9046_s14 + $0x2458] sm:$0xff] %vm6471_vm1, %v6249_v4 }
 0x50c   : > { %v4683_v5 = vpop.f32.mrf.mxu0  ;;  %v6253_v6 = vpop.f32.mrf.mxu1 }
 0x50d   : > { %7007 = vst [vmem:[%s9046_s14 + $0x10c0] sm:$0xff] %v4683_v5  ;;  %7635 = vst [vmem:[%s9046_s14 + $0x2460] sm:$0xff] %v6253_v6 }
 0x50e   : > { %v4685_v7 = vpop.f32.mrf.mxu0  ;;  %v6255_v8 = vpop.f32.mrf.mxu1 }
 0x50f   : > { %7008 = vst.msk [vmem:[%s9046_s14 + $0x10c8] sm:$0xff] %vm6471_vm1, %v4685_v7  ;;  %7636 = vst.msk [vmem:[%s9046_s14 + $0x2468] sm:$0xff] %vm6471_vm1, %v6255_v8 }
 0x510   : > { %v4687_v9 = vpop.f32.mrf.mxu0  ;;  %v6257_v10 = vpop.f32.mrf.mxu1 }
 0x511   : > { %7009 = vst [vmem:[%s9046_s14 + $0x10d0] sm:$0xff] %v4687_v9  ;;  %7637 = vst [vmem:[%s9046_s14 + $0x2470] sm:$0xff] %v6257_v10 }
 0x512   : > { %v4689_v11 = vpop.f32.mrf.mxu0  ;;  %v6259_v12 = vpop.f32.mrf.mxu1 }
 0x513   : > { %7010 = vst.msk [vmem:[%s9046_s14 + $0x10d8] sm:$0xff] %vm6471_vm1, %v4689_v11  ;;  %7638 = vst.msk [vmem:[%s9046_s14 + $0x2478] sm:$0xff] %vm6471_vm1, %v6259_v12 }
 0x514   : > { %v4693_v13 = vpop.f32.mrf.mxu0  ;;  %v6263_v14 = vpop.f32.mrf.mxu1 }
 0x515   : > { %7011 = vst [vmem:[%s9046_s14 + $0x10e0] sm:$0xff] %v4693_v13  ;;  %7639 = vst [vmem:[%s9046_s14 + $0x2480] sm:$0xff] %v6263_v14 }
 0x516   : > { %v4695_v15 = vpop.f32.mrf.mxu0  ;;  %v6265_v16 = vpop.f32.mrf.mxu1 }
 0x517   : > { %7012 = vst.msk [vmem:[%s9046_s14 + $0x10e8] sm:$0xff] %vm6471_vm1, %v4695_v15  ;;  %7640 = vst.msk [vmem:[%s9046_s14 + $0x2488] sm:$0xff] %vm6471_vm1, %v6265_v16 }
 0x518   : > { %v4697_v17 = vpop.f32.mrf.mxu0  ;;  %v6267_v18 = vpop.f32.mrf.mxu1 }
 0x519   : > { %7013 = vst [vmem:[%s9046_s14 + $0x10f0] sm:$0xff] %v4697_v17  ;;  %7641 = vst [vmem:[%s9046_s14 + $0x2490] sm:$0xff] %v6267_v18 }
 0x51a   : > { %v4699_v19 = vpop.f32.mrf.mxu0  ;;  %v6269_v20 = vpop.f32.mrf.mxu1 }
 0x51b   : > { %7014 = vst.msk [vmem:[%s9046_s14 + $0x10f8] sm:$0xff] %vm6471_vm1, %v4699_v19  ;;  %7642 = vst.msk [vmem:[%s9046_s14 + $0x2498] sm:$0xff] %vm6471_vm1, %v6269_v20 }
 0x51c   : > { %v4703_v21 = vpop.f32.mrf.mxu0  ;;  %v6273_v22 = vpop.f32.mrf.mxu1 }
 0x51d   : > { %7015 = vst [vmem:[%s9046_s14 + $0x1100] sm:$0xff] %v4703_v21  ;;  %7643 = vst [vmem:[%s9046_s14 + $0x24a0] sm:$0xff] %v6273_v22 }
 0x51e   : > { %v4705_v23 = vpop.f32.mrf.mxu0  ;;  %v6275_v24 = vpop.f32.mrf.mxu1 }
 0x51f   : > { %7016 = vst.msk [vmem:[%s9046_s14 + $0x1108] sm:$0xff] %vm6471_vm1, %v4705_v23  ;;  %7644 = vst.msk [vmem:[%s9046_s14 + $0x24a8] sm:$0xff] %vm6471_vm1, %v6275_v24 }
 0x520   : > { %v4707_v25 = vpop.f32.mrf.mxu0  ;;  %v6277_v26 = vpop.f32.mrf.mxu1 }
 0x521   : > { %7017 = vst [vmem:[%s9046_s14 + $0x1110] sm:$0xff] %v4707_v25  ;;  %7645 = vst [vmem:[%s9046_s14 + $0x24b0] sm:$0xff] %v6277_v26 }
 0x522   : > { %v4709_v27 = vpop.f32.mrf.mxu0  ;;  %v6279_v28 = vpop.f32.mrf.mxu1 }
 0x523   : > { %7018 = vst.msk [vmem:[%s9046_s14 + $0x1118] sm:$0xff] %vm6471_vm1, %v4709_v27  ;;  %7646 = vst.msk [vmem:[%s9046_s14 + $0x24b8] sm:$0xff] %vm6471_vm1, %v6279_v28 }
 0x524   : > { %v4713_v29 = vpop.f32.mrf.mxu0  ;;  %v6283_v30 = vpop.f32.mrf.mxu1 }
 0x525   : > { %7019 = vst [vmem:[%s9046_s14 + $0x1120] sm:$0xff] %v4713_v29  ;;  %7647 = vst [vmem:[%s9046_s14 + $0x24c0] sm:$0xff] %v6283_v30 }
 0x526   : > { %v4715_v31 = vpop.f32.mrf.mxu0  ;;  %v6285_v32 = vpop.f32.mrf.mxu1 }
 0x527   : > { %7020 = vst.msk [vmem:[%s9046_s14 + $0x1128] sm:$0xff] %vm6471_vm1, %v4715_v31  ;;  %7648 = vst.msk [vmem:[%s9046_s14 + $0x24c8] sm:$0xff] %vm6471_vm1, %v6285_v32 }
 0x528   : > { %v4717_v33 = vpop.f32.mrf.mxu0  ;;  %v6287_v34 = vpop.f32.mrf.mxu1 }
 0x529   : > { %7021 = vst [vmem:[%s9046_s14 + $0x1130] sm:$0xff] %v4717_v33  ;;  %7649 = vst [vmem:[%s9046_s14 + $0x24d0] sm:$0xff] %v6287_v34 }
 0x52a   : > { %v4719_v35 = vpop.f32.mrf.mxu0  ;;  %v6289_v36 = vpop.f32.mrf.mxu1 }
 0x52b   : > { %7022 = vst.msk [vmem:[%s9046_s14 + $0x1138] sm:$0xff] %vm6471_vm1, %v4719_v35  ;;  %7650 = vst.msk [vmem:[%s9046_s14 + $0x24d8] sm:$0xff] %vm6471_vm1, %v6289_v36 }
 0x52c   : > { %v4723_v37 = vpop.f32.mrf.mxu0  ;;  %v6293_v38 = vpop.f32.mrf.mxu1 }
 0x52d   : > { %7023 = vst [vmem:[%s9046_s14 + $0x1140] sm:$0xff] %v4723_v37  ;;  %7651 = vst [vmem:[%s9046_s14 + $0x24e0] sm:$0xff] %v6293_v38 }
 0x52e   : > { %v4725_v39 = vpop.f32.mrf.mxu0  ;;  %v6295_v40 = vpop.f32.mrf.mxu1 }
 0x52f   : > { %7024 = vst.msk [vmem:[%s9046_s14 + $0x1148] sm:$0xff] %vm6471_vm1, %v4725_v39  ;;  %7652 = vst.msk [vmem:[%s9046_s14 + $0x24e8] sm:$0xff] %vm6471_vm1, %v6295_v40 }
 0x530   : > { %v4727_v41 = vpop.f32.mrf.mxu0  ;;  %v6297_v42 = vpop.f32.mrf.mxu1 }
 0x531   : > { %7025 = vst [vmem:[%s9046_s14 + $0x1150] sm:$0xff] %v4727_v41  ;;  %7653 = vst [vmem:[%s9046_s14 + $0x24f0] sm:$0xff] %v6297_v42 }
 0x532   : > { %v4729_v43 = vpop.f32.mrf.mxu0  ;;  %v6299_v44 = vpop.f32.mrf.mxu1 }
 0x533   : > { %7026 = vst.msk [vmem:[%s9046_s14 + $0x1158] sm:$0xff] %vm6471_vm1, %v4729_v43  ;;  %7654 = vst.msk [vmem:[%s9046_s14 + $0x24f8] sm:$0xff] %vm6471_vm1, %v6299_v44 }
 0x534   : > { %v4733_v45 = vpop.f32.mrf.mxu0  ;;  %v6303_v46 = vpop.f32.mrf.mxu1 }
 0x535   : > { %7027 = vst [vmem:[%s9046_s14 + $0x1160] sm:$0xff] %v4733_v45  ;;  %7655 = vst [vmem:[%s9046_s14 + $0x2500] sm:$0xff] %v6303_v46 }
 0x536   : > { %v4735_v47 = vpop.f32.mrf.mxu0  ;;  %v6305_v48 = vpop.f32.mrf.mxu1 }
 0x537   : > { %7028 = vst.msk [vmem:[%s9046_s14 + $0x1168] sm:$0xff] %vm6471_vm1, %v4735_v47  ;;  %7656 = vst.msk [vmem:[%s9046_s14 + $0x2508] sm:$0xff] %vm6471_vm1, %v6305_v48 }
 0x538   : > { %v4737_v49 = vpop.f32.mrf.mxu0  ;;  %v6307_v50 = vpop.f32.mrf.mxu1 }
 0x539   : > { %7029 = vst [vmem:[%s9046_s14 + $0x1170] sm:$0xff] %v4737_v49  ;;  %7657 = vst [vmem:[%s9046_s14 + $0x2510] sm:$0xff] %v6307_v50 }
 0x53a   : > { %v4739_v0 = vpop.f32.mrf.mxu0  ;;  %v6309_v51 = vpop.f32.mrf.mxu1 }
 0x53b   : > { %7030 = vst.msk [vmem:[%s9046_s14 + $0x1178] sm:$0xff] %vm6471_vm1, %v4739_v0  ;;  %7658 = vst.msk [vmem:[%s9046_s14 + $0x2518] sm:$0xff] %vm6471_vm1, %v6309_v51 }
 0x53c   : > { %v4743_v52 = vpop.f32.mrf.mxu0  ;;  %v6313_v53 = vpop.f32.mrf.mxu1 }
 0x53d   : > { %7031 = vst [vmem:[%s9046_s14 + $0x1180] sm:$0xff] %v4743_v52  ;;  %7659 = vst [vmem:[%s9046_s14 + $0x2520] sm:$0xff] %v6313_v53 }
 0x53e   : > { %v4745_v54 = vpop.f32.mrf.mxu0  ;;  %v6315_v55 = vpop.f32.mrf.mxu1 }
 0x53f   : > { %7032 = vst.msk [vmem:[%s9046_s14 + $0x1188] sm:$0xff] %vm6471_vm1, %v4745_v54  ;;  %7660 = vst.msk [vmem:[%s9046_s14 + $0x2528] sm:$0xff] %vm6471_vm1, %v6315_v55 }
 0x540   : > { %v4747_v56 = vpop.f32.mrf.mxu0  ;;  %v6317_v57 = vpop.f32.mrf.mxu1 }
 0x541   : > { %7033 = vst [vmem:[%s9046_s14 + $0x1190] sm:$0xff] %v4747_v56  ;;  %7661 = vst [vmem:[%s9046_s14 + $0x2530] sm:$0xff] %v6317_v57 }
 0x542   : > { %v4749_v58 = vpop.f32.mrf.mxu0  ;;  %v6319_v59 = vpop.f32.mrf.mxu1 }
 0x543   : > { %7034 = vst.msk [vmem:[%s9046_s14 + $0x1198] sm:$0xff] %vm6471_vm1, %v4749_v58  ;;  %7662 = vst.msk [vmem:[%s9046_s14 + $0x2538] sm:$0xff] %vm6471_vm1, %v6319_v59 }
 0x544   : > { %v4753_v60 = vpop.f32.mrf.mxu0  ;;  %v6323_v61 = vpop.f32.mrf.mxu1 }
 0x545   : > { %7035 = vst [vmem:[%s9046_s14 + $0x11a0] sm:$0xff] %v4753_v60  ;;  %7663 = vst [vmem:[%s9046_s14 + $0x2540] sm:$0xff] %v6323_v61 }
 0x546   : > { %v4755_v62 = vpop.f32.mrf.mxu0  ;;  %v6325_v63 = vpop.f32.mrf.mxu1 }
 0x547   : > { %7036 = vst.msk [vmem:[%s9046_s14 + $0x11a8] sm:$0xff] %vm6471_vm1, %v4755_v62  ;;  %7664 = vst.msk [vmem:[%s9046_s14 + $0x2548] sm:$0xff] %vm6471_vm1, %v6325_v63 }
 0x548   : > { %v4757_v1 = vpop.f32.mrf.mxu0  ;;  %v6327_v2 = vpop.f32.mrf.mxu1 }
 0x549   : > { %7037 = vst [vmem:[%s9046_s14 + $0x11b0] sm:$0xff] %v4757_v1  ;;  %7665 = vst [vmem:[%s9046_s14 + $0x2550] sm:$0xff] %v6327_v2 }
 0x54a   : > { %v4759_v3 = vpop.f32.mrf.mxu0  ;;  %v6329_v4 = vpop.f32.mrf.mxu1 }
 0x54b   : > { %7038 = vst.msk [vmem:[%s9046_s14 + $0x11b8] sm:$0xff] %vm6471_vm1, %v4759_v3  ;;  %7666 = vst.msk [vmem:[%s9046_s14 + $0x2558] sm:$0xff] %vm6471_vm1, %v6329_v4 }
 0x54c   : > { %v4763_v5 = vpop.f32.mrf.mxu0  ;;  %v6333_v6 = vpop.f32.mrf.mxu1 }
 0x54d   : > { %7039 = vst [vmem:[%s9046_s14 + $0x11c0] sm:$0xff] %v4763_v5  ;;  %7667 = vst [vmem:[%s9046_s14 + $0x2560] sm:$0xff] %v6333_v6 }
 0x54e   : > { %v4765_v7 = vpop.f32.mrf.mxu0  ;;  %v6335_v8 = vpop.f32.mrf.mxu1 }
 0x54f   : > { %7040 = vst.msk [vmem:[%s9046_s14 + $0x11c8] sm:$0xff] %vm6471_vm1, %v4765_v7  ;;  %7668 = vst.msk [vmem:[%s9046_s14 + $0x2568] sm:$0xff] %vm6471_vm1, %v6335_v8 }
 0x550   : > { %v4767_v9 = vpop.f32.mrf.mxu0  ;;  %v6337_v10 = vpop.f32.mrf.mxu1 }
 0x551   : > { %7041 = vst [vmem:[%s9046_s14 + $0x11d0] sm:$0xff] %v4767_v9  ;;  %7669 = vst [vmem:[%s9046_s14 + $0x2570] sm:$0xff] %v6337_v10 }
 0x552   : > { %v4769_v11 = vpop.f32.mrf.mxu0  ;;  %v6339_v12 = vpop.f32.mrf.mxu1 }
 0x553   : > { %7042 = vst.msk [vmem:[%s9046_s14 + $0x11d8] sm:$0xff] %vm6471_vm1, %v4769_v11  ;;  %7670 = vst.msk [vmem:[%s9046_s14 + $0x2578] sm:$0xff] %vm6471_vm1, %v6339_v12 }
 0x554   : > { %v4773_v13 = vpop.f32.mrf.mxu0  ;;  %v6343_v14 = vpop.f32.mrf.mxu1 }
 0x555   : > { %7043 = vst [vmem:[%s9046_s14 + $0x11e0] sm:$0xff] %v4773_v13  ;;  %7671 = vst [vmem:[%s9046_s14 + $0x2580] sm:$0xff] %v6343_v14 }
 0x556   : > { %v4775_v15 = vpop.f32.mrf.mxu0  ;;  %v6345_v16 = vpop.f32.mrf.mxu1 }
 0x557   : > { %7044 = vst.msk [vmem:[%s9046_s14 + $0x11e8] sm:$0xff] %vm6471_vm1, %v4775_v15  ;;  %7672 = vst.msk [vmem:[%s9046_s14 + $0x2588] sm:$0xff] %vm6471_vm1, %v6345_v16 }
 0x558   : > { %v4777_v17 = vpop.f32.mrf.mxu0  ;;  %v6347_v18 = vpop.f32.mrf.mxu1 }
 0x559   : > { %7045 = vst [vmem:[%s9046_s14 + $0x11f0] sm:$0xff] %v4777_v17  ;;  %7673 = vst [vmem:[%s9046_s14 + $0x2590] sm:$0xff] %v6347_v18 }
 0x55a   : > { %v4779_v19 = vpop.f32.mrf.mxu0  ;;  %v6349_v20 = vpop.f32.mrf.mxu1 }
 0x55b   : > { %7046 = vst.msk [vmem:[%s9046_s14 + $0x11f8] sm:$0xff] %vm6471_vm1, %v4779_v19  ;;  %7674 = vst.msk [vmem:[%s9046_s14 + $0x2598] sm:$0xff] %vm6471_vm1, %v6349_v20 }
 0x55c   : > { %v4783_v21 = vpop.f32.mrf.mxu0  ;;  %v6353_v22 = vpop.f32.mrf.mxu1 }
 0x55d   : > { %7047 = vst [vmem:[%s9046_s14 + $0x1200] sm:$0xff] %v4783_v21  ;;  %7675 = vst [vmem:[%s9046_s14 + $0x25a0] sm:$0xff] %v6353_v22 }
 0x55e   : > { %v4785_v23 = vpop.f32.mrf.mxu0  ;;  %v6355_v24 = vpop.f32.mrf.mxu1 }
 0x55f   : > { %7048 = vst.msk [vmem:[%s9046_s14 + $0x1208] sm:$0xff] %vm6471_vm1, %v4785_v23  ;;  %7676 = vst.msk [vmem:[%s9046_s14 + $0x25a8] sm:$0xff] %vm6471_vm1, %v6355_v24 }
 0x560   : > { %v4787_v25 = vpop.f32.mrf.mxu0  ;;  %v6357_v26 = vpop.f32.mrf.mxu1 }
 0x561   : > { %7049 = vst [vmem:[%s9046_s14 + $0x1210] sm:$0xff] %v4787_v25  ;;  %7677 = vst [vmem:[%s9046_s14 + $0x25b0] sm:$0xff] %v6357_v26 }
 0x562   : > { %v4789_v27 = vpop.f32.mrf.mxu0  ;;  %v6359_v28 = vpop.f32.mrf.mxu1 }
 0x563   : > { %7050 = vst.msk [vmem:[%s9046_s14 + $0x1218] sm:$0xff] %vm6471_vm1, %v4789_v27  ;;  %7678 = vst.msk [vmem:[%s9046_s14 + $0x25b8] sm:$0xff] %vm6471_vm1, %v6359_v28 }
 0x564   : > { %v4793_v29 = vpop.f32.mrf.mxu0  ;;  %v6363_v30 = vpop.f32.mrf.mxu1 }
 0x565   : > { %7051 = vst [vmem:[%s9046_s14 + $0x1220] sm:$0xff] %v4793_v29  ;;  %7679 = vst [vmem:[%s9046_s14 + $0x25c0] sm:$0xff] %v6363_v30 }
 0x566   : > { %v4795_v31 = vpop.f32.mrf.mxu0  ;;  %v6365_v32 = vpop.f32.mrf.mxu1 }
 0x567   : > { %7052 = vst.msk [vmem:[%s9046_s14 + $0x1228] sm:$0xff] %vm6471_vm1, %v4795_v31  ;;  %7680 = vst.msk [vmem:[%s9046_s14 + $0x25c8] sm:$0xff] %vm6471_vm1, %v6365_v32 }
 0x568   : > { %v4797_v33 = vpop.f32.mrf.mxu0  ;;  %v6367_v34 = vpop.f32.mrf.mxu1 }
 0x569   : > { %7053 = vst [vmem:[%s9046_s14 + $0x1230] sm:$0xff] %v4797_v33  ;;  %7681 = vst [vmem:[%s9046_s14 + $0x25d0] sm:$0xff] %v6367_v34 }
 0x56a   : > { %v4799_v35 = vpop.f32.mrf.mxu0  ;;  %v6369_v36 = vpop.f32.mrf.mxu1 }
 0x56b   : > { %7054 = vst.msk [vmem:[%s9046_s14 + $0x1238] sm:$0xff] %vm6471_vm1, %v4799_v35  ;;  %7682 = vst.msk [vmem:[%s9046_s14 + $0x25d8] sm:$0xff] %vm6471_vm1, %v6369_v36 }
 0x56c   : > { %v4803_v37 = vpop.f32.mrf.mxu0  ;;  %v6373_v38 = vpop.f32.mrf.mxu1 }
 0x56d   : > { %7055 = vst [vmem:[%s9046_s14 + $0x1240] sm:$0xff] %v4803_v37  ;;  %7683 = vst [vmem:[%s9046_s14 + $0x25e0] sm:$0xff] %v6373_v38 }
 0x56e   : > { %v4805_v39 = vpop.f32.mrf.mxu0  ;;  %v6375_v40 = vpop.f32.mrf.mxu1 }
 0x56f   : > { %7056 = vst.msk [vmem:[%s9046_s14 + $0x1248] sm:$0xff] %vm6471_vm1, %v4805_v39  ;;  %7684 = vst.msk [vmem:[%s9046_s14 + $0x25e8] sm:$0xff] %vm6471_vm1, %v6375_v40 }
 0x570   : > { %v4807_v41 = vpop.f32.mrf.mxu0  ;;  %v6377_v42 = vpop.f32.mrf.mxu1 }
 0x571   : > { %7057 = vst [vmem:[%s9046_s14 + $0x1250] sm:$0xff] %v4807_v41  ;;  %7685 = vst [vmem:[%s9046_s14 + $0x25f0] sm:$0xff] %v6377_v42 }
 0x572   : > { %v4809_v43 = vpop.f32.mrf.mxu0  ;;  %v6379_v44 = vpop.f32.mrf.mxu1 }
 0x573   : > { %7058 = vst.msk [vmem:[%s9046_s14 + $0x1258] sm:$0xff] %vm6471_vm1, %v4809_v43  ;;  %7686 = vst.msk [vmem:[%s9046_s14 + $0x25f8] sm:$0xff] %vm6471_vm1, %v6379_v44 }
 0x574   : > { %v4813_v45 = vpop.f32.mrf.mxu0  ;;  %v6383_v46 = vpop.f32.mrf.mxu1 }
 0x575   : > { %7059 = vst [vmem:[%s9046_s14 + $0x1260] sm:$0xff] %v4813_v45  ;;  %7687 = vst [vmem:[%s9046_s14 + $0x2600] sm:$0xff] %v6383_v46 }
 0x576   : > { %v4815_v47 = vpop.f32.mrf.mxu0  ;;  %v6385_v48 = vpop.f32.mrf.mxu1 }
 0x577   : > { %7060 = vst.msk [vmem:[%s9046_s14 + $0x1268] sm:$0xff] %vm6471_vm1, %v4815_v47  ;;  %7688 = vst.msk [vmem:[%s9046_s14 + $0x2608] sm:$0xff] %vm6471_vm1, %v6385_v48 }
 0x578   : > { %v4817_v49 = vpop.f32.mrf.mxu0  ;;  %v6387_v50 = vpop.f32.mrf.mxu1 }
 0x579   : > { %7061 = vst [vmem:[%s9046_s14 + $0x1270] sm:$0xff] %v4817_v49  ;;  %7689 = vst [vmem:[%s9046_s14 + $0x2610] sm:$0xff] %v6387_v50 }
 0x57a   : > { %v4819_v0 = vpop.f32.mrf.mxu0  ;;  %v6389_v51 = vpop.f32.mrf.mxu1 }
 0x57b   : > { %7062 = vst.msk [vmem:[%s9046_s14 + $0x1278] sm:$0xff] %vm6471_vm1, %v4819_v0  ;;  %7690 = vst.msk [vmem:[%s9046_s14 + $0x2618] sm:$0xff] %vm6471_vm1, %v6389_v51 }
 0x57c   : > { %v4823_v52 = vpop.f32.mrf.mxu0  ;;  %v6393_v53 = vpop.f32.mrf.mxu1 }
 0x57d   : > { %7063 = vst [vmem:[%s9046_s14 + $0x1280] sm:$0xff] %v4823_v52  ;;  %7691 = vst [vmem:[%s9046_s14 + $0x2620] sm:$0xff] %v6393_v53 }
 0x57e   : > { %v4825_v54 = vpop.f32.mrf.mxu0  ;;  %v6395_v55 = vpop.f32.mrf.mxu1 }
 0x57f   : > { %7064 = vst.msk [vmem:[%s9046_s14 + $0x1288] sm:$0xff] %vm6471_vm1, %v4825_v54  ;;  %7692 = vst.msk [vmem:[%s9046_s14 + $0x2628] sm:$0xff] %vm6471_vm1, %v6395_v55 }
 0x580   : > { %v4827_v56 = vpop.f32.mrf.mxu0  ;;  %v6397_v57 = vpop.f32.mrf.mxu1 }
 0x581   : > { %7065 = vst [vmem:[%s9046_s14 + $0x1290] sm:$0xff] %v4827_v56  ;;  %7693 = vst [vmem:[%s9046_s14 + $0x2630] sm:$0xff] %v6397_v57 }
 0x582   : > { %v4829_v58 = vpop.f32.mrf.mxu0  ;;  %v6399_v59 = vpop.f32.mrf.mxu1 }
 0x583   : > { %7066 = vst.msk [vmem:[%s9046_s14 + $0x1298] sm:$0xff] %vm6471_vm1, %v4829_v58  ;;  %7694 = vst.msk [vmem:[%s9046_s14 + $0x2638] sm:$0xff] %vm6471_vm1, %v6399_v59 }
 0x584   : > { %v4833_v60 = vpop.f32.mrf.mxu0  ;;  %v6403_v61 = vpop.f32.mrf.mxu1 }
 0x585   : > { %7067 = vst [vmem:[%s9046_s14 + $0x12a0] sm:$0xff] %v4833_v60  ;;  %7695 = vst [vmem:[%s9046_s14 + $0x2640] sm:$0xff] %v6403_v61 }
 0x586   : > { %v4835_v62 = vpop.f32.mrf.mxu0  ;;  %v6405_v63 = vpop.f32.mrf.mxu1 }
 0x587   : > { %7068 = vst.msk [vmem:[%s9046_s14 + $0x12a8] sm:$0xff] %vm6471_vm1, %v4835_v62  ;;  %7696 = vst.msk [vmem:[%s9046_s14 + $0x2648] sm:$0xff] %vm6471_vm1, %v6405_v63 }
 0x588   : > { %v4837_v1 = vpop.f32.mrf.mxu0  ;;  %v6407_v2 = vpop.f32.mrf.mxu1 }
 0x589   : > { %7069 = vst [vmem:[%s9046_s14 + $0x12b0] sm:$0xff] %v4837_v1  ;;  %7697 = vst [vmem:[%s9046_s14 + $0x2650] sm:$0xff] %v6407_v2 }
 0x58a   : > { %v4839_v3 = vpop.f32.mrf.mxu0  ;;  %v6409_v4 = vpop.f32.mrf.mxu1 }
 0x58b   : > { %7070 = vst.msk [vmem:[%s9046_s14 + $0x12b8] sm:$0xff] %vm6471_vm1, %v4839_v3  ;;  %7698 = vst.msk [vmem:[%s9046_s14 + $0x2658] sm:$0xff] %vm6471_vm1, %v6409_v4 }
 0x58c   : > { %v4843_v5 = vpop.f32.mrf.mxu0  ;;  %v6413_v6 = vpop.f32.mrf.mxu1 }
 0x58d   : > { %7071 = vst [vmem:[%s9046_s14 + $0x12c0] sm:$0xff] %v4843_v5  ;;  %7699 = vst [vmem:[%s9046_s14 + $0x2660] sm:$0xff] %v6413_v6 }
 0x58e   : > { %v4845_v7 = vpop.f32.mrf.mxu0  ;;  %v6415_v8 = vpop.f32.mrf.mxu1 }
 0x58f   : > { %7072 = vst.msk [vmem:[%s9046_s14 + $0x12c8] sm:$0xff] %vm6471_vm1, %v4845_v7  ;;  %7700 = vst.msk [vmem:[%s9046_s14 + $0x2668] sm:$0xff] %vm6471_vm1, %v6415_v8 }
 0x590   : > { %v4847_v9 = vpop.f32.mrf.mxu0  ;;  %v6417_v10 = vpop.f32.mrf.mxu1 }
 0x591   : > { %7073 = vst [vmem:[%s9046_s14 + $0x12d0] sm:$0xff] %v4847_v9  ;;  %7701 = vst [vmem:[%s9046_s14 + $0x2670] sm:$0xff] %v6417_v10 }
 0x592   : > { %v4849_v11 = vpop.f32.mrf.mxu0  ;;  %v6419_v12 = vpop.f32.mrf.mxu1 }
 0x593   : > { %7074 = vst.msk [vmem:[%s9046_s14 + $0x12d8] sm:$0xff] %vm6471_vm1, %v4849_v11  ;;  %7702 = vst.msk [vmem:[%s9046_s14 + $0x2678] sm:$0xff] %vm6471_vm1, %v6419_v12 }
 0x594   : > { %v4853_v13 = vpop.f32.mrf.mxu0  ;;  %v6423_v14 = vpop.f32.mrf.mxu1 }
 0x595   : > { %7075 = vst [vmem:[%s9046_s14 + $0x12e0] sm:$0xff] %v4853_v13  ;;  %7703 = vst [vmem:[%s9046_s14 + $0x2680] sm:$0xff] %v6423_v14 }
 0x596   : > { %v4855_v15 = vpop.f32.mrf.mxu0  ;;  %v6425_v16 = vpop.f32.mrf.mxu1 }
 0x597   : > { %7076 = vst.msk [vmem:[%s9046_s14 + $0x12e8] sm:$0xff] %vm6471_vm1, %v4855_v15  ;;  %7704 = vst.msk [vmem:[%s9046_s14 + $0x2688] sm:$0xff] %vm6471_vm1, %v6425_v16 }
 0x598   : > { %v4857_v17 = vpop.f32.mrf.mxu0  ;;  %v6427_v18 = vpop.f32.mrf.mxu1 }
 0x599   : > { %7077 = vst [vmem:[%s9046_s14 + $0x12f0] sm:$0xff] %v4857_v17  ;;  %7705 = vst [vmem:[%s9046_s14 + $0x2690] sm:$0xff] %v6427_v18 }
 0x59a   : > { %v4859_v19 = vpop.f32.mrf.mxu0  ;;  %v6429_v20 = vpop.f32.mrf.mxu1 }
 0x59b   : > { %7078 = vst.msk [vmem:[%s9046_s14 + $0x12f8] sm:$0xff] %vm6471_vm1, %v4859_v19  ;;  %7706 = vst.msk [vmem:[%s9046_s14 + $0x2698] sm:$0xff] %vm6471_vm1, %v6429_v20 }
 0x59c   : > { %v4863_v21 = vpop.f32.mrf.mxu0  ;;  %v6433_v22 = vpop.f32.mrf.mxu1 }
 0x59d   : > { %7079 = vst [vmem:[%s9046_s14 + $0x1300] sm:$0xff] %v4863_v21  ;;  %7707 = vst [vmem:[%s9046_s14 + $0x26a0] sm:$0xff] %v6433_v22 }
 0x59e   : > { %v4865_v23 = vpop.f32.mrf.mxu0  ;;  %v6435_v24 = vpop.f32.mrf.mxu1 }
 0x59f   : > { %7080 = vst.msk [vmem:[%s9046_s14 + $0x1308] sm:$0xff] %vm6471_vm1, %v4865_v23  ;;  %7708 = vst.msk [vmem:[%s9046_s14 + $0x26a8] sm:$0xff] %vm6471_vm1, %v6435_v24 }
 0x5a0   : > { %v4867_v25 = vpop.f32.mrf.mxu0  ;;  %v6437_v26 = vpop.f32.mrf.mxu1 }
 0x5a1   : > { %7081 = vst [vmem:[%s9046_s14 + $0x1310] sm:$0xff] %v4867_v25  ;;  %7709 = vst [vmem:[%s9046_s14 + $0x26b0] sm:$0xff] %v6437_v26 }
 0x5a2   : > { %v4869_v27 = vpop.f32.mrf.mxu0  ;;  %v6439_v28 = vpop.f32.mrf.mxu1 }
 0x5a3   : > { %7082 = vst.msk [vmem:[%s9046_s14 + $0x1318] sm:$0xff] %vm6471_vm1, %v4869_v27  ;;  %7710 = vst.msk [vmem:[%s9046_s14 + $0x26b8] sm:$0xff] %vm6471_vm1, %v6439_v28 }
 0x5a4   : > { %v4873_v29 = vpop.f32.mrf.mxu0  ;;  %v6443_v30 = vpop.f32.mrf.mxu1 }
 0x5a5   : > { %7083 = vst [vmem:[%s9046_s14 + $0x1320] sm:$0xff] %v4873_v29  ;;  %7711 = vst [vmem:[%s9046_s14 + $0x26c0] sm:$0xff] %v6443_v30 }
 0x5a6   : > { %v4875_v31 = vpop.f32.mrf.mxu0  ;;  %v6445_v32 = vpop.f32.mrf.mxu1 }
 0x5a7   : > { %7084 = vst.msk [vmem:[%s9046_s14 + $0x1328] sm:$0xff] %vm6471_vm1, %v4875_v31  ;;  %7712 = vst.msk [vmem:[%s9046_s14 + $0x26c8] sm:$0xff] %vm6471_vm1, %v6445_v32 }
 0x5a8   : > { %v4877_v33 = vpop.f32.mrf.mxu0  ;;  %v6447_v34 = vpop.f32.mrf.mxu1 }
 0x5a9   : > { %7085 = vst [vmem:[%s9046_s14 + $0x1330] sm:$0xff] %v4877_v33  ;;  %7713 = vst [vmem:[%s9046_s14 + $0x26d0] sm:$0xff] %v6447_v34 }
 0x5aa   : > { %v4879_v35 = vpop.f32.mrf.mxu0  ;;  %v6449_v36 = vpop.f32.mrf.mxu1 }
 0x5ab   : > { %7086 = vst.msk [vmem:[%s9046_s14 + $0x1338] sm:$0xff] %vm6471_vm1, %v4879_v35  ;;  %7714 = vst.msk [vmem:[%s9046_s14 + $0x26d8] sm:$0xff] %vm6471_vm1, %v6449_v36 }
 0x5ac   : > { %v4883_v37 = vpop.f32.mrf.mxu0  ;;  %v6453_v38 = vpop.f32.mrf.mxu1 }
 0x5ad   : > { %7087 = vst [vmem:[%s9046_s14 + $0x1340] sm:$0xff] %v4883_v37  ;;  %7715 = vst [vmem:[%s9046_s14 + $0x26e0] sm:$0xff] %v6453_v38 }
 0x5ae   : > { %v4885_v39 = vpop.f32.mrf.mxu0  ;;  %v6455_v40 = vpop.f32.mrf.mxu1 }
 0x5af   : > { %7088 = vst.msk [vmem:[%s9046_s14 + $0x1348] sm:$0xff] %vm6471_vm1, %v4885_v39  ;;  %7716 = vst.msk [vmem:[%s9046_s14 + $0x26e8] sm:$0xff] %vm6471_vm1, %v6455_v40 }
 0x5b0   : > { %v4887_v41 = vpop.f32.mrf.mxu0  ;;  %v6457_v42 = vpop.f32.mrf.mxu1 }
 0x5b1   : > { %7089 = vst [vmem:[%s9046_s14 + $0x1350] sm:$0xff] %v4887_v41  ;;  %7717 = vst [vmem:[%s9046_s14 + $0x26f0] sm:$0xff] %v6457_v42 }
 0x5b2   : > { %v4889_v43 = vpop.f32.mrf.mxu0  ;;  %v6459_v44 = vpop.f32.mrf.mxu1 }
 0x5b3   : > { %7090 = vst.msk [vmem:[%s9046_s14 + $0x1358] sm:$0xff] %vm6471_vm1, %v4889_v43  ;;  %7718 = vst.msk [vmem:[%s9046_s14 + $0x26f8] sm:$0xff] %vm6471_vm1, %v6459_v44 }
 0x5b4   : > { %v4893_v45 = vpop.f32.mrf.mxu0  ;;  %v6463_v46 = vpop.f32.mrf.mxu1 }
 0x5b5   : > { %7091 = vst [vmem:[%s9046_s14 + $0x1360] sm:$0xff] %v4893_v45  ;;  %7719 = vst [vmem:[%s9046_s14 + $0x2700] sm:$0xff] %v6463_v46 }
 0x5b6   : > { %v4895_v47 = vpop.f32.mrf.mxu0  ;;  %v6465_v48 = vpop.f32.mrf.mxu1 }
 0x5b7   : > { %7092 = vst.msk [vmem:[%s9046_s14 + $0x1368] sm:$0xff] %vm6471_vm1, %v4895_v47  ;;  %7720 = vst.msk [vmem:[%s9046_s14 + $0x2708] sm:$0xff] %vm6471_vm1, %v6465_v48 }
 0x5b8   : > { %v4897_v49 = vpop.f32.mrf.mxu0  ;;  %v6467_v50 = vpop.f32.mrf.mxu1 }
 0x5b9   : > { %7093 = vst [vmem:[%s9046_s14 + $0x1370] sm:$0xff] %v4897_v49 }
 0x5ba   : > { %v4899_v0 = vpop.f32.mrf.mxu0  ;;  %v6468_v51 = vpop.f32.mrf.mxu1 }
 0x5bb   : > { %7094 = vst.msk [vmem:[%s9046_s14 + $0x1378] sm:$0xff] %vm6471_vm1, %v4899_v0 }
 0x5bc   : > { %v4903_v52 = vpop.f32.mrf.mxu0 }
 0x5bd   : > { %7095 = vst [vmem:[%s9046_s14 + $0x1380] sm:$0xff] %v4903_v52 }
 0x5be   : > { %v4905_v53 = vpop.f32.mrf.mxu0 }
 0x5bf   : > { %7096 = vst.msk [vmem:[%s9046_s14 + $0x1388] sm:$0xff] %vm6471_vm1, %v4905_v53 }
 0x5c0   : > { %v4907_v54 = vpop.f32.mrf.mxu0 }
 0x5c1   : > { %7097 = vst [vmem:[%s9046_s14 + $0x1390] sm:$0xff] %v4907_v54 }
 0x5c2   : > { %v4909_v55 = vpop.f32.mrf.mxu0 }
 0x5c3   : > { %7098 = vst.msk [vmem:[%s9046_s14 + $0x1398] sm:$0xff] %vm6471_vm1, %v4909_v55 }
 0x5c4 PF: > { %s12_s9 = sadd.s32 1, %s8762_s9  }
 0x5c5   : > { %p9_p4 = scmp.ge.s32.totalorder %s12_s9, 10  }
 0x5c7   :  { %11 = sbr.rel (!%p9_p4) target bundleno = 1 (0x1), region = 58 }

</bundles_post_ra>
